<compile_context>
chip_gen: v7x
topology: tpu7x:2x2x1
jax: 0.10.0
libtpu: 0.0.40
codegen_flags: <defaults>
</compile_context>

<pallas_src>
import functools

import jax
import jax.numpy as jnp
from jax.experimental import pallas as pl
from jax.experimental.pallas import tpu as pltpu

HEAD_SIZE = 8
EPS = 1e-6
NEG_INF = -1e9


def _layer_norm(x, gamma, beta):
    mean = jnp.mean(x, axis=-1, keepdims=True)
    var = jnp.mean((x - mean) ** 2, axis=-1, keepdims=True)
    return (x - mean) * jax.lax.rsqrt(var + EPS) * gamma + beta


# ---------------------------------------------------------------------------
# One full EncoderLayer (pre-LN self-attention + FFN, both with residual) for
# a single batch element per grid step. Optionally fuses the final LayerNorm.
# ---------------------------------------------------------------------------
def encoder_layer_kernel(x_ref, mask_ref,
                         ln1_g_ref, ln1_b_ref,
                         wq_ref, wk_ref, wv_ref, wo_ref,
                         ln2_g_ref, ln2_b_ref,
                         w1_ref, b1_ref, w2_ref, b2_ref,
                         lnf_g_ref, lnf_b_ref,
                         o_ref, *, apply_last_norm):
    x = x_ref[0]                              # (S, H) f32
    S, H = x.shape
    dk = H // HEAD_SIZE
    scale = float(dk) ** -0.5
    key_masked = mask_ref[0, 0, :] > 0.0      # (S,) bool, computed once

    # ---- self-attention block (pre-LN) ------------------------------------
    y = _layer_norm(x, ln1_g_ref[0], ln1_b_ref[0])
    y_bf = y.astype(jnp.bfloat16)
    q = jnp.dot(y_bf, wq_ref[...], preferred_element_type=jnp.float32) * scale
    k = jnp.dot(y_bf, wk_ref[...], preferred_element_type=jnp.float32)
    v = jnp.dot(y_bf, wv_ref[...], preferred_element_type=jnp.float32)

    # (S, H) -> (HEAD, S, dk): one relayout per tensor instead of 8 slices +
    # 8 XLU transposes + 1 lane-axis concat.
    split = lambda t: jnp.transpose(t.reshape(S, HEAD_SIZE, dk), (1, 0, 2))
    qh = split(q).astype(jnp.bfloat16)
    kh = split(k).astype(jnp.bfloat16)
    vh = split(v).astype(jnp.bfloat16)

    s = jnp.einsum("hqd,hkd->hqk", qh, kh,
                   preferred_element_type=jnp.float32)          # (HEAD, S, S) f32
    s = jnp.where(key_masked[None, None, :], NEG_INF, s)        # mask applied once
    s = s - jnp.max(s, axis=-1, keepdims=True)
    p = jnp.exp(s)
    p = p * pl.reciprocal(jnp.sum(p, axis=-1, keepdims=True), approx=True)
    # TODO(synk): attention dropout omitted (eval mode -> identity)
    ctx = jnp.einsum("hqk,hkd->hqd", p.astype(jnp.bfloat16), vh,
                     preferred_element_type=jnp.float32)        # (HEAD, S, dk)
    ctx = jnp.transpose(ctx, (1, 0, 2)).reshape(S, H)
    attn_out = jnp.dot(ctx.astype(jnp.bfloat16), wo_ref[...],
                       preferred_element_type=jnp.float32)
    x = x + attn_out

    # ---- feed-forward block (pre-LN) ---------------------------------------
    y = _layer_norm(x, ln2_g_ref[0], ln2_b_ref[0])
    h1 = jnp.dot(y.astype(jnp.bfloat16), w1_ref[...],
                 preferred_element_type=jnp.float32) + b1_ref[0]
    h1 = jnp.maximum(h1, 0.0)
    h2 = jnp.dot(h1.astype(jnp.bfloat16), w2_ref[...],
                 preferred_element_type=jnp.float32) + b2_ref[0]
    x = x + h2

    # ---- fused Encoder.last_norm on the final layer (static flag) ----------
    if apply_last_norm:
        x = _layer_norm(x, lnf_g_ref[0], lnf_b_ref[0])

    o_ref[0] = x


def encoder_layer(x, mask, lp, final_ln=None):
    B, S, H = x.shape
    F = lp["w1"].shape[1]
    apply_last = final_ln is not None
    if apply_last:
        lnf_g, lnf_b = final_ln
    else:
        # Placeholders (unused because the static flag is False).
        lnf_g, lnf_b = lp["ln2_g"], lp["ln2_b"]

    bf = lambda w: w.astype(jnp.bfloat16)     # bf16 weights -> native MXU rate
    kernel = functools.partial(encoder_layer_kernel, apply_last_norm=apply_last)
    rep = lambda shape: pl.BlockSpec(shape, lambda b: (0, 0))

    return pl.pallas_call(
        kernel,
        out_shape=jax.ShapeDtypeStruct((B, S, H), jnp.float32),
        grid=(B,),
        in_specs=[
            pl.BlockSpec((1, S, H), lambda b: (b, 0, 0)),   # x
            pl.BlockSpec((1, 1, S), lambda b: (b, 0, 0)),   # mask
            rep((1, H)), rep((1, H)),                        # ln1 gamma/beta
            rep((H, H)), rep((H, H)), rep((H, H)), rep((H, H)),  # wq wk wv wo (bf16)
            rep((1, H)), rep((1, H)),                        # ln2 gamma/beta
            rep((H, F)), rep((1, F)),                        # ffn layer1 w(bf16), b
            rep((F, H)), rep((1, H)),                        # ffn layer2 w(bf16), b
            rep((1, H)), rep((1, H)),                        # fused last_norm gamma/beta
        ],
        out_specs=pl.BlockSpec((1, S, H), lambda b: (b, 0, 0)),
        compiler_params=pltpu.CompilerParams(dimension_semantics=("parallel",)),
    )(x, mask,
      lp["ln1_g"], lp["ln1_b"],
      bf(lp["wq"]), bf(lp["wk"]), bf(lp["wv"]), bf(lp["wo"]),
      lp["ln2_g"], lp["ln2_b"],
      bf(lp["w1"]), lp["b1"], bf(lp["w2"]), lp["b2"],
      lnf_g, lnf_b)


# ---------------------------------------------------------------------------
# Full Encoder forward (plain-JAX glue over the Pallas kernels). The final
# LayerNorm is fused into the last layer's kernel (no separate launch).
# ---------------------------------------------------------------------------
def encoder_forward(x, mask, params):
    n = len(params["layers"])
    for i, lp in enumerate(params["layers"]):
        fin = (params["ln_g"], params["ln_b"]) if i == n - 1 else None
        x = encoder_layer(x, mask, lp, final_ln=fin)
    return x


# ---------------------------------------------------------------------------
# Deterministic parameter construction (mirrors module __init__ shapes)
# ---------------------------------------------------------------------------
def init_params(key, hidden_size, filter_size, n_layers):
    layers = []
    for _ in range(n_layers):
        key, *ks = jax.random.split(key, 7)
        layers.append(dict(
            ln1_g=jnp.ones((1, hidden_size), jnp.float32),
            ln1_b=jnp.zeros((1, hidden_size), jnp.float32),
            wq=0.1 * jax.random.normal(ks[0], (hidden_size, hidden_size), jnp.float32),
            wk=0.1 * jax.random.normal(ks[1], (hidden_size, hidden_size), jnp.float32),
            wv=0.1 * jax.random.normal(ks[2], (hidden_size, hidden_size), jnp.float32),
            wo=0.1 * jax.random.normal(ks[3], (hidden_size, hidden_size), jnp.float32),
            ln2_g=jnp.ones((1, hidden_size), jnp.float32),
            ln2_b=jnp.zeros((1, hidden_size), jnp.float32),
            w1=0.1 * jax.random.normal(ks[4], (hidden_size, filter_size), jnp.float32),
            b1=jnp.zeros((1, filter_size), jnp.float32),
            w2=0.1 * jax.random.normal(ks[5], (filter_size, hidden_size), jnp.float32),
            b2=jnp.zeros((1, hidden_size), jnp.float32),
        ))
    return dict(layers=layers,
                ln_g=jnp.ones((1, hidden_size), jnp.float32),
                ln_b=jnp.zeros((1, hidden_size), jnp.float32))


# ---------------------------------------------------------------------------
# Pure-JAX f32 reference (same math as the PyTorch module) for correctness
# ---------------------------------------------------------------------------
def ref_forward(x, mask, params):
    def ln(z, g, b):
        m = z.mean(-1, keepdims=True)
        v = ((z - m) ** 2).mean(-1, keepdims=True)
        return (z - m) / jnp.sqrt(v + EPS) * g + b

    B, S, H = x.shape
    dk = H // HEAD_SIZE
    scale = float(dk) ** -0.5
    for lp in params["layers"]:
        y = ln(x, lp["ln1_g"][0], lp["ln1_b"][0])
        q = (y @ lp["wq"]) * scale
        k = y @ lp["wk"]
        v = y @ lp["wv"]
        q = q.reshape(B, S, HEAD_SIZE, dk).transpose(0, 2, 1, 3)
        k = k.reshape(B, S, HEAD_SIZE, dk).transpose(0, 2, 1, 3)
        v = v.reshape(B, S, HEAD_SIZE, dk).transpose(0, 2, 1, 3)
        s = jnp.einsum("bhqd,bhkd->bhqk", q, k)
        s = jnp.where(mask[:, None, :, :] > 0, NEG_INF, s)
        p = jax.nn.softmax(s, axis=-1)
        ctx = jnp.einsum("bhqk,bhkd->bhqd", p, v).transpose(0, 2, 1, 3).reshape(B, S, H)
        x = x + ctx @ lp["wo"]
        y = ln(x, lp["ln2_g"][0], lp["ln2_b"][0])
        h1 = jnp.maximum(y @ lp["w1"] + lp["b1"][0], 0.0)
        x = x + h1 @ lp["w2"] + lp["b2"][0]
    return ln(x, params["ln_g"][0], params["ln_b"][0])


if __name__ == "__main__":
    B, S, H, F, L = 2, 8, 32, 64, 2

    key = jax.random.PRNGKey(0)
    k_x, k_p = jax.random.split(key)
    x = jax.random.normal(k_x, (B, S, H), jnp.float32)

    # mask[b, 0, s] > 0 means key position s is padded (masked out)
    mask = jnp.zeros((B, 1, S), jnp.float32)
    mask = mask.at[1, 0, S - 2:].set(1.0)   # last 2 keys of batch 1 are padding

    params = init_params(k_p, H, F, L)

    out = encoder_forward(x, mask, params)
    out = jax.block_until_ready(out)

    ref = ref_forward(x, mask, params)
    assert out.shape == (B, S, H)
    # Tolerance reflects bf16 MXU inputs with f32 accumulation (f32 reference).
    assert jnp.allclose(out, ref, atol=5e-2, rtol=5e-2), "mismatch vs JAX reference"

    print("KERNEL_OK")
</pallas_src>

<mosaic_0001>
module attributes {stable_mosaic.version = 11 : i64} {
  func.func @encoder_layer_kernel(%arg0: i32, %arg1: memref<1x8x32xf32, #tpu.memory_space<vmem>>, %arg2: memref<1x1x8xf32, #tpu.memory_space<vmem>>, %arg3: memref<1x32xf32, #tpu.memory_space<vmem>>, %arg4: memref<1x32xf32, #tpu.memory_space<vmem>>, %arg5: memref<32x32xbf16, #tpu.memory_space<vmem>>, %arg6: memref<32x32xbf16, #tpu.memory_space<vmem>>, %arg7: memref<32x32xbf16, #tpu.memory_space<vmem>>, %arg8: memref<32x32xbf16, #tpu.memory_space<vmem>>, %arg9: memref<1x32xf32, #tpu.memory_space<vmem>>, %arg10: memref<1x32xf32, #tpu.memory_space<vmem>>, %arg11: memref<32x64xbf16, #tpu.memory_space<vmem>>, %arg12: memref<1x64xf32, #tpu.memory_space<vmem>>, %arg13: memref<64x32xbf16, #tpu.memory_space<vmem>>, %arg14: memref<1x32xf32, #tpu.memory_space<vmem>>, %arg15: memref<1x32xf32, #tpu.memory_space<vmem>>, %arg16: memref<1x32xf32, #tpu.memory_space<vmem>>, %arg17: memref<1x8x32xf32, #tpu.memory_space<vmem>>) attributes {dimension_semantics = [#tpu.dimension_semantics<parallel>], iteration_bounds = array<i64: 2>, scalar_prefetch = 0 : i64, scratch_operands = 0 : i64, tpu.core_type = #tpu.core_type<tc>, window_params = [{transform_indices = @transform_0, window_bounds = array<i64: 1, 8, 32>}, {transform_indices = @transform_1, window_bounds = array<i64: 1, 1, 8>}, {pipeline_mode = #tpu.pipeline_mode<synchronous>, transform_indices = @transform_2, window_bounds = array<i64: 1, 32>}, {pipeline_mode = #tpu.pipeline_mode<synchronous>, transform_indices = @transform_3, window_bounds = array<i64: 1, 32>}, {pipeline_mode = #tpu.pipeline_mode<synchronous>, transform_indices = @transform_4, window_bounds = array<i64: 32, 32>}, {pipeline_mode = #tpu.pipeline_mode<synchronous>, transform_indices = @transform_5, window_bounds = array<i64: 32, 32>}, {pipeline_mode = #tpu.pipeline_mode<synchronous>, transform_indices = @transform_6, window_bounds = array<i64: 32, 32>}, {pipeline_mode = #tpu.pipeline_mode<synchronous>, transform_indices = @transform_7, window_bounds = array<i64: 32, 32>}, {pipeline_mode = #tpu.pipeline_mode<synchronous>, transform_indices = @transform_8, window_bounds = array<i64: 1, 32>}, {pipeline_mode = #tpu.pipeline_mode<synchronous>, transform_indices = @transform_9, window_bounds = array<i64: 1, 32>}, {pipeline_mode = #tpu.pipeline_mode<synchronous>, transform_indices = @transform_10, window_bounds = array<i64: 32, 64>}, {pipeline_mode = #tpu.pipeline_mode<synchronous>, transform_indices = @transform_11, window_bounds = array<i64: 1, 64>}, {pipeline_mode = #tpu.pipeline_mode<synchronous>, transform_indices = @transform_12, window_bounds = array<i64: 64, 32>}, {pipeline_mode = #tpu.pipeline_mode<synchronous>, transform_indices = @transform_13, window_bounds = array<i64: 1, 32>}, {pipeline_mode = #tpu.pipeline_mode<synchronous>, transform_indices = @transform_14, window_bounds = array<i64: 1, 32>}, {pipeline_mode = #tpu.pipeline_mode<synchronous>, transform_indices = @transform_15, window_bounds = array<i64: 1, 32>}, {transform_indices = @transform_16, window_bounds = array<i64: 1, 8, 32>}]} {
    %c0 = arith.constant 0 : index
    %c0_0 = arith.constant 0 : index
    %c0_1 = arith.constant 0 : index
    %0 = vector.load %arg1[%c0, %c0_0, %c0_1] : memref<1x8x32xf32, #tpu.memory_space<vmem>>, vector<1x8x32xf32>
    %1 = vector.shape_cast %0 : vector<1x8x32xf32> to vector<8x32xf32>
    %c0_2 = arith.constant 0 : index
    %c0_3 = arith.constant 0 : index
    %c0_4 = arith.constant 0 : index
    %2 = vector.load %arg2[%c0_2, %c0_3, %c0_4] : memref<1x1x8xf32, #tpu.memory_space<vmem>>, vector<1x1x8xf32>
    %3 = vector.shape_cast %2 : vector<1x1x8xf32> to vector<8xf32>
    %cst = arith.constant 0.000000e+00 : f32
    %4 = vector.broadcast %cst : f32 to vector<8xf32>
    %5 = arith.cmpf ogt, %3, %4 : vector<8xf32>
    %c0_5 = arith.constant 0 : index
    %c0_6 = arith.constant 0 : index
    %6 = vector.load %arg3[%c0_5, %c0_6] : memref<1x32xf32, #tpu.memory_space<vmem>>, vector<1x32xf32>
    %7 = vector.shape_cast %6 : vector<1x32xf32> to vector<32xf32>
    %c0_7 = arith.constant 0 : index
    %c0_8 = arith.constant 0 : index
    %8 = vector.load %arg4[%c0_7, %c0_8] : memref<1x32xf32, #tpu.memory_space<vmem>>, vector<1x32xf32>
    %9 = vector.shape_cast %8 : vector<1x32xf32> to vector<32xf32>
    %cst_9 = arith.constant dense<0.000000e+00> : vector<8xf32>
    %10 = vector.multi_reduction <add>, %1, %cst_9 [1] : vector<8x32xf32> to vector<8xf32>
    %11 = vector.shape_cast %10 : vector<8xf32> to vector<8x1xf32>
    %cst_10 = arith.constant 3.200000e+01 : f32
    %12 = vector.broadcast %cst_10 : f32 to vector<8x1xf32>
    %13 = arith.divf %11, %12 : vector<8x1xf32>
    %14 = vector.broadcast %13 : vector<8x1xf32> to vector<8x32xf32>
    %15 = arith.subf %1, %14 : vector<8x32xf32>
    %16 = arith.mulf %15, %15 : vector<8x32xf32>
    %cst_11 = arith.constant dense<0.000000e+00> : vector<8xf32>
    %17 = vector.multi_reduction <add>, %16, %cst_11 [1] : vector<8x32xf32> to vector<8xf32>
    %18 = vector.shape_cast %17 : vector<8xf32> to vector<8x1xf32>
    %cst_12 = arith.constant 3.200000e+01 : f32
    %19 = vector.broadcast %cst_12 : f32 to vector<8x1xf32>
    %20 = arith.divf %18, %19 : vector<8x1xf32>
    %21 = vector.broadcast %13 : vector<8x1xf32> to vector<8x32xf32>
    %22 = arith.subf %1, %21 : vector<8x32xf32>
    %cst_13 = arith.constant 9.99999997E-7 : f32
    %23 = vector.broadcast %cst_13 : f32 to vector<8x1xf32>
    %24 = arith.addf %20, %23 : vector<8x1xf32>
    %25 = math.rsqrt %24 : vector<8x1xf32>
    %26 = vector.broadcast %25 : vector<8x1xf32> to vector<8x32xf32>
    %27 = arith.mulf %22, %26 : vector<8x32xf32>
    %28 = vector.shape_cast %7 : vector<32xf32> to vector<1x32xf32>
    %29 = vector.broadcast %28 : vector<1x32xf32> to vector<8x32xf32>
    %30 = arith.mulf %27, %29 : vector<8x32xf32>
    %31 = vector.shape_cast %9 : vector<32xf32> to vector<1x32xf32>
    %32 = vector.broadcast %31 : vector<1x32xf32> to vector<8x32xf32>
    %33 = arith.addf %30, %32 : vector<8x32xf32>
    %34 = arith.truncf %33 : vector<8x32xf32> to vector<8x32xbf16>
    %c0_14 = arith.constant 0 : index
    %c0_15 = arith.constant 0 : index
    %35 = vector.load %arg5[%c0_14, %c0_15] : memref<32x32xbf16, #tpu.memory_space<vmem>>, vector<32x32xbf16>
    %cst_16 = arith.constant dense<0.000000e+00> : vector<8x32xf32>
    %36 = tpu.matmul %34, %35, %cst_16 {dimension_numbers = #tpu.dot_dimension_numbers<[1], [0], [0], [1], [0, 0, 1, 1], [], []>} : vector<8x32xbf16>, vector<32x32xbf16>, vector<8x32xf32> -> vector<8x32xf32>
    %cst_17 = arith.constant 5.000000e-01 : f32
    %37 = vector.broadcast %cst_17 : f32 to vector<8x32xf32>
    %38 = arith.mulf %36, %37 : vector<8x32xf32>
    %c0_18 = arith.constant 0 : index
    %c0_19 = arith.constant 0 : index
    %39 = vector.load %arg6[%c0_18, %c0_19] : memref<32x32xbf16, #tpu.memory_space<vmem>>, vector<32x32xbf16>
    %cst_20 = arith.constant dense<0.000000e+00> : vector<8x32xf32>
    %40 = tpu.matmul %34, %39, %cst_20 {dimension_numbers = #tpu.dot_dimension_numbers<[1], [0], [0], [1], [0, 0, 1, 1], [], []>} : vector<8x32xbf16>, vector<32x32xbf16>, vector<8x32xf32> -> vector<8x32xf32>
    %c0_21 = arith.constant 0 : index
    %c0_22 = arith.constant 0 : index
    %41 = vector.load %arg7[%c0_21, %c0_22] : memref<32x32xbf16, #tpu.memory_space<vmem>>, vector<32x32xbf16>
    %cst_23 = arith.constant dense<0.000000e+00> : vector<8x32xf32>
    %42 = tpu.matmul %34, %41, %cst_23 {dimension_numbers = #tpu.dot_dimension_numbers<[1], [0], [0], [1], [0, 0, 1, 1], [], []>} : vector<8x32xbf16>, vector<32x32xbf16>, vector<8x32xf32> -> vector<8x32xf32>
    %43 = vector.shape_cast %38 : vector<8x32xf32> to vector<8x8x4xf32>
    %44 = tpu.transpose %43, [1, 0, 2] : vector<8x8x4xf32> -> vector<8x8x4xf32>
    %45 = arith.truncf %44 : vector<8x8x4xf32> to vector<8x8x4xbf16>
    %46 = vector.shape_cast %40 : vector<8x32xf32> to vector<8x8x4xf32>
    %47 = tpu.transpose %46, [1, 0, 2] : vector<8x8x4xf32> -> vector<8x8x4xf32>
    %48 = arith.truncf %47 : vector<8x8x4xf32> to vector<8x8x4xbf16>
    %49 = vector.shape_cast %42 : vector<8x32xf32> to vector<8x8x4xf32>
    %50 = tpu.transpose %49, [1, 0, 2] : vector<8x8x4xf32> -> vector<8x8x4xf32>
    %51 = arith.truncf %50 : vector<8x8x4xf32> to vector<8x8x4xbf16>
    "tpu.trace_start"() <{level = 10 : i32, message = "hqd,hkd->hqk"}> : () -> ()
    %cst_24 = arith.constant dense<0.000000e+00> : vector<8x8x8xf32>
    %52 = tpu.matmul %45, %48, %cst_24 {dimension_numbers = #tpu.dot_dimension_numbers<[2], [2], [1], [1], [0, 0, 0, 1, 1, 1], [0], [0]>} : vector<8x8x4xbf16>, vector<8x8x4xbf16>, vector<8x8x8xf32> -> vector<8x8x8xf32>
    "tpu.trace_stop"() : () -> ()
    %53 = vector.shape_cast %5 : vector<8xi1> to vector<1x1x8xi1>
    %cst_25 = arith.constant -1.000000e+09 : f32
    %54 = vector.shape_cast %53 : vector<1x1x8xi1> to vector<1x1x8xi1>
    %55 = vector.broadcast %54 : vector<1x1x8xi1> to vector<8x8x8xi1>
    %56 = vector.broadcast %cst_25 : f32 to vector<8x8x8xf32>
    %57 = arith.select %55, %56, %52 : vector<8x8x8xi1>, vector<8x8x8xf32>
    %cst_26 = arith.constant dense<0xFF800000> : vector<8x8xf32>
    %58 = vector.multi_reduction <maximumf>, %57, %cst_26 [2] : vector<8x8x8xf32> to vector<8x8xf32>
    %59 = vector.shape_cast %58 : vector<8x8xf32> to vector<8x8x1xf32>
    %60 = vector.broadcast %59 : vector<8x8x1xf32> to vector<8x8x8xf32>
    %61 = arith.subf %57, %60 : vector<8x8x8xf32>
    %62 = math.exp %61 : vector<8x8x8xf32>
    %cst_27 = arith.constant dense<0.000000e+00> : vector<8x8xf32>
    %63 = vector.multi_reduction <add>, %62, %cst_27 [2] : vector<8x8x8xf32> to vector<8x8xf32>
    %64 = vector.shape_cast %63 : vector<8x8xf32> to vector<8x8x1xf32>
    %65 = tpu.reciprocal %64 {approx = true} : vector<8x8x1xf32> -> vector<8x8x1xf32>
    %66 = vector.broadcast %65 : vector<8x8x1xf32> to vector<8x8x8xf32>
    %67 = arith.mulf %62, %66 : vector<8x8x8xf32>
    %68 = arith.truncf %67 : vector<8x8x8xf32> to vector<8x8x8xbf16>
    "tpu.trace_start"() <{level = 10 : i32, message = "hqk,hkd->hqd"}> : () -> ()
    %cst_28 = arith.constant dense<0.000000e+00> : vector<8x8x4xf32>
    %69 = tpu.matmul %68, %51, %cst_28 {dimension_numbers = #tpu.dot_dimension_numbers<[2], [1], [1], [2], [0, 0, 0, 1, 1, 2], [0], [0]>} : vector<8x8x8xbf16>, vector<8x8x4xbf16>, vector<8x8x4xf32> -> vector<8x8x4xf32>
    "tpu.trace_stop"() : () -> ()
    %70 = tpu.transpose %69, [1, 0, 2] : vector<8x8x4xf32> -> vector<8x8x4xf32>
    %71 = vector.shape_cast %70 : vector<8x8x4xf32> to vector<8x32xf32>
    %72 = arith.truncf %71 : vector<8x32xf32> to vector<8x32xbf16>
    %c0_29 = arith.constant 0 : index
    %c0_30 = arith.constant 0 : index
    %73 = vector.load %arg8[%c0_29, %c0_30] : memref<32x32xbf16, #tpu.memory_space<vmem>>, vector<32x32xbf16>
    %cst_31 = arith.constant dense<0.000000e+00> : vector<8x32xf32>
    %74 = tpu.matmul %72, %73, %cst_31 {dimension_numbers = #tpu.dot_dimension_numbers<[1], [0], [0], [1], [0, 0, 1, 1], [], []>} : vector<8x32xbf16>, vector<32x32xbf16>, vector<8x32xf32> -> vector<8x32xf32>
    %75 = arith.addf %1, %74 : vector<8x32xf32>
    %c0_32 = arith.constant 0 : index
    %c0_33 = arith.constant 0 : index
    %76 = vector.load %arg9[%c0_32, %c0_33] : memref<1x32xf32, #tpu.memory_space<vmem>>, vector<1x32xf32>
    %77 = vector.shape_cast %76 : vector<1x32xf32> to vector<32xf32>
    %c0_34 = arith.constant 0 : index
    %c0_35 = arith.constant 0 : index
    %78 = vector.load %arg10[%c0_34, %c0_35] : memref<1x32xf32, #tpu.memory_space<vmem>>, vector<1x32xf32>
    %79 = vector.shape_cast %78 : vector<1x32xf32> to vector<32xf32>
    %cst_36 = arith.constant dense<0.000000e+00> : vector<8xf32>
    %80 = vector.multi_reduction <add>, %75, %cst_36 [1] : vector<8x32xf32> to vector<8xf32>
    %81 = vector.shape_cast %80 : vector<8xf32> to vector<8x1xf32>
    %cst_37 = arith.constant 3.200000e+01 : f32
    %82 = vector.broadcast %cst_37 : f32 to vector<8x1xf32>
    %83 = arith.divf %81, %82 : vector<8x1xf32>
    %84 = vector.broadcast %83 : vector<8x1xf32> to vector<8x32xf32>
    %85 = arith.subf %75, %84 : vector<8x32xf32>
    %86 = arith.mulf %85, %85 : vector<8x32xf32>
    %cst_38 = arith.constant dense<0.000000e+00> : vector<8xf32>
    %87 = vector.multi_reduction <add>, %86, %cst_38 [1] : vector<8x32xf32> to vector<8xf32>
    %88 = vector.shape_cast %87 : vector<8xf32> to vector<8x1xf32>
    %cst_39 = arith.constant 3.200000e+01 : f32
    %89 = vector.broadcast %cst_39 : f32 to vector<8x1xf32>
    %90 = arith.divf %88, %89 : vector<8x1xf32>
    %91 = vector.broadcast %83 : vector<8x1xf32> to vector<8x32xf32>
    %92 = arith.subf %75, %91 : vector<8x32xf32>
    %cst_40 = arith.constant 9.99999997E-7 : f32
    %93 = vector.broadcast %cst_40 : f32 to vector<8x1xf32>
    %94 = arith.addf %90, %93 : vector<8x1xf32>
    %95 = math.rsqrt %94 : vector<8x1xf32>
    %96 = vector.broadcast %95 : vector<8x1xf32> to vector<8x32xf32>
    %97 = arith.mulf %92, %96 : vector<8x32xf32>
    %98 = vector.shape_cast %77 : vector<32xf32> to vector<1x32xf32>
    %99 = vector.broadcast %98 : vector<1x32xf32> to vector<8x32xf32>
    %100 = arith.mulf %97, %99 : vector<8x32xf32>
    %101 = vector.shape_cast %79 : vector<32xf32> to vector<1x32xf32>
    %102 = vector.broadcast %101 : vector<1x32xf32> to vector<8x32xf32>
    %103 = arith.addf %100, %102 : vector<8x32xf32>
    %104 = arith.truncf %103 : vector<8x32xf32> to vector<8x32xbf16>
    %c0_41 = arith.constant 0 : index
    %c0_42 = arith.constant 0 : index
    %105 = vector.load %arg11[%c0_41, %c0_42] : memref<32x64xbf16, #tpu.memory_space<vmem>>, vector<32x64xbf16>
    %cst_43 = arith.constant dense<0.000000e+00> : vector<8x64xf32>
    %106 = tpu.matmul %104, %105, %cst_43 {dimension_numbers = #tpu.dot_dimension_numbers<[1], [0], [0], [1], [0, 0, 1, 1], [], []>} : vector<8x32xbf16>, vector<32x64xbf16>, vector<8x64xf32> -> vector<8x64xf32>
    %c0_44 = arith.constant 0 : index
    %c0_45 = arith.constant 0 : index
    %107 = vector.load %arg12[%c0_44, %c0_45] : memref<1x64xf32, #tpu.memory_space<vmem>>, vector<1x64xf32>
    %108 = vector.shape_cast %107 : vector<1x64xf32> to vector<64xf32>
    %109 = vector.shape_cast %108 : vector<64xf32> to vector<1x64xf32>
    %110 = vector.broadcast %109 : vector<1x64xf32> to vector<8x64xf32>
    %111 = arith.addf %106, %110 : vector<8x64xf32>
    %cst_46 = arith.constant 0.000000e+00 : f32
    %112 = vector.broadcast %cst_46 : f32 to vector<8x64xf32>
    %113 = arith.maximumf %111, %112 : vector<8x64xf32>
    %114 = arith.truncf %113 : vector<8x64xf32> to vector<8x64xbf16>
    %c0_47 = arith.constant 0 : index
    %c0_48 = arith.constant 0 : index
    %115 = vector.load %arg13[%c0_47, %c0_48] : memref<64x32xbf16, #tpu.memory_space<vmem>>, vector<64x32xbf16>
    %cst_49 = arith.constant dense<0.000000e+00> : vector<8x32xf32>
    %116 = tpu.matmul %114, %115, %cst_49 {dimension_numbers = #tpu.dot_dimension_numbers<[1], [0], [0], [1], [0, 0, 1, 1], [], []>} : vector<8x64xbf16>, vector<64x32xbf16>, vector<8x32xf32> -> vector<8x32xf32>
    %c0_50 = arith.constant 0 : index
    %c0_51 = arith.constant 0 : index
    %117 = vector.load %arg14[%c0_50, %c0_51] : memref<1x32xf32, #tpu.memory_space<vmem>>, vector<1x32xf32>
    %118 = vector.shape_cast %117 : vector<1x32xf32> to vector<32xf32>
    %119 = vector.shape_cast %118 : vector<32xf32> to vector<1x32xf32>
    %120 = vector.broadcast %119 : vector<1x32xf32> to vector<8x32xf32>
    %121 = arith.addf %116, %120 : vector<8x32xf32>
    %122 = arith.addf %75, %121 : vector<8x32xf32>
    %c0_52 = arith.constant 0 : index
    %c0_53 = arith.constant 0 : index
    %c0_54 = arith.constant 0 : index
    %123 = vector.load %arg17[%c0_52, %c0_53, %c0_54] : memref<1x8x32xf32, #tpu.memory_space<vmem>>, vector<1x8x32xf32>
    %124 = vector.shape_cast %123 : vector<1x8x32xf32> to vector<8x32xf32>
    %125 = vector.shape_cast %122 : vector<8x32xf32> to vector<1x8x32xf32>
    tpu.vector_store %arg17[%c0_52, %c0_53, %c0_54], %125 {strides = array<i32>} : memref<1x8x32xf32, #tpu.memory_space<vmem>>, vector<1x8x32xf32>,
    return
  }
  func.func @transform_0(%arg0: i32) -> (i32, i32, i32) {
    %c0_i32 = arith.constant 0 : i32
    %c0_i32_0 = arith.constant 0 : i32
    %c0_i32_1 = arith.constant 0 : i32
    return %arg0, %c0_i32, %c0_i32_0 : i32, i32, i32
  }
  func.func @transform_1(%arg0: i32) -> (i32, i32, i32) {
    %c0_i32 = arith.constant 0 : i32
    %c0_i32_0 = arith.constant 0 : i32
    %c0_i32_1 = arith.constant 0 : i32
    return %arg0, %c0_i32, %c0_i32_0 : i32, i32, i32
  }
  func.func @transform_2(%arg0: i32) -> (i32, i32) {
    %c0_i32 = arith.constant 0 : i32
    %c0_i32_0 = arith.constant 0 : i32
    %c0_i32_1 = arith.constant 0 : i32
    return %c0_i32, %c0_i32_0 : i32, i32
  }
  func.func @transform_3(%arg0: i32) -> (i32, i32) {
    %c0_i32 = arith.constant 0 : i32
    %c0_i32_0 = arith.constant 0 : i32
    %c0_i32_1 = arith.constant 0 : i32
    return %c0_i32, %c0_i32_0 : i32, i32
  }
  func.func @transform_4(%arg0: i32) -> (i32, i32) {
    %c0_i32 = arith.constant 0 : i32
    %c0_i32_0 = arith.constant 0 : i32
    %c0_i32_1 = arith.constant 0 : i32
    return %c0_i32, %c0_i32_0 : i32, i32
  }
  func.func @transform_5(%arg0: i32) -> (i32, i32) {
    %c0_i32 = arith.constant 0 : i32
    %c0_i32_0 = arith.constant 0 : i32
    %c0_i32_1 = arith.constant 0 : i32
    return %c0_i32, %c0_i32_0 : i32, i32
  }
  func.func @transform_6(%arg0: i32) -> (i32, i32) {
    %c0_i32 = arith.constant 0 : i32
    %c0_i32_0 = arith.constant 0 : i32
    %c0_i32_1 = arith.constant 0 : i32
    return %c0_i32, %c0_i32_0 : i32, i32
  }
  func.func @transform_7(%arg0: i32) -> (i32, i32) {
    %c0_i32 = arith.constant 0 : i32
    %c0_i32_0 = arith.constant 0 : i32
    %c0_i32_1 = arith.constant 0 : i32
    return %c0_i32, %c0_i32_0 : i32, i32
  }
  func.func @transform_8(%arg0: i32) -> (i32, i32) {
    %c0_i32 = arith.constant 0 : i32
    %c0_i32_0 = arith.constant 0 : i32
    %c0_i32_1 = arith.constant 0 : i32
    return %c0_i32, %c0_i32_0 : i32, i32
  }
  func.func @transform_9(%arg0: i32) -> (i32, i32) {
    %c0_i32 = arith.constant 0 : i32
    %c0_i32_0 = arith.constant 0 : i32
    %c0_i32_1 = arith.constant 0 : i32
    return %c0_i32, %c0_i32_0 : i32, i32
  }
  func.func @transform_10(%arg0: i32) -> (i32, i32) {
    %c0_i32 = arith.constant 0 : i32
    %c0_i32_0 = arith.constant 0 : i32
    %c0_i32_1 = arith.constant 0 : i32
    return %c0_i32, %c0_i32_0 : i32, i32
  }
  func.func @transform_11(%arg0: i32) -> (i32, i32) {
    %c0_i32 = arith.constant 0 : i32
    %c0_i32_0 = arith.constant 0 : i32
    %c0_i32_1 = arith.constant 0 : i32
    return %c0_i32, %c0_i32_0 : i32, i32
  }
  func.func @transform_12(%arg0: i32) -> (i32, i32) {
    %c0_i32 = arith.constant 0 : i32
    %c0_i32_0 = arith.constant 0 : i32
    %c0_i32_1 = arith.constant 0 : i32
    return %c0_i32, %c0_i32_0 : i32, i32
  }
  func.func @transform_13(%arg0: i32) -> (i32, i32) {
    %c0_i32 = arith.constant 0 : i32
    %c0_i32_0 = arith.constant 0 : i32
    %c0_i32_1 = arith.constant 0 : i32
    return %c0_i32, %c0_i32_0 : i32, i32
  }
  func.func @transform_14(%arg0: i32) -> (i32, i32) {
    %c0_i32 = arith.constant 0 : i32
    %c0_i32_0 = arith.constant 0 : i32
    %c0_i32_1 = arith.constant 0 : i32
    return %c0_i32, %c0_i32_0 : i32, i32
  }
  func.func @transform_15(%arg0: i32) -> (i32, i32) {
    %c0_i32 = arith.constant 0 : i32
    %c0_i32_0 = arith.constant 0 : i32
    %c0_i32_1 = arith.constant 0 : i32
    return %c0_i32, %c0_i32_0 : i32, i32
  }
  func.func @transform_16(%arg0: i32) -> (i32, i32, i32) {
    %c0_i32 = arith.constant 0 : i32
    %c0_i32_0 = arith.constant 0 : i32
    %c0_i32_1 = arith.constant 0 : i32
    return %arg0, %c0_i32, %c0_i32_0 : i32, i32, i32
  }
}

</mosaic_0001>

<bundles_post_ra>
// kernel: tpu_custom_call.1
= control target key start
LH: loop header
LB: loop body
LE: loop exit
PB: predicated region body
PF: predicated region fallthrough
CT: control target
= control target key end

     0   :  { %s8867_s0 = inlined_call_operand.vmem [shape: f32[2,8,32], index: 0, kind: input, shape index: {}]   ;;  %s8868_s1 = inlined_call_operand.vmem [shape: f32[2,1,8], index: 1, kind: input, shape index: {}]   ;;  %s8869_s2 = inlined_call_operand.hbm [shape: f32[1,32], index: 2, kind: input, shape index: {}]   ;;  %s8870_s3 = inlined_call_operand.hbm [shape: f32[1,32], index: 3, kind: input, shape index: {}]   ;;  %s8871_s4 = inlined_call_operand.vmem [shape: bf16[32,32], index: 4, kind: input, shape index: {}]   ;;  %s8872_s5 = inlined_call_operand.vmem [shape: bf16[32,32], index: 5, kind: input, shape index: {}]   ;;  %s8873_s6 = inlined_call_operand.hbm [shape: bf16[32,32], index: 6, kind: input, shape index: {}]   ;;  %s8874_s7 = inlined_call_operand.hbm [shape: bf16[32,32], index: 7, kind: input, shape index: {}]   ;;  %s8875_s8 = inlined_call_operand.hbm [shape: f32[1,32], index: 8, kind: input, shape index: {}]   ;;  %s8876_s9 = inlined_call_operand.hbm [shape: f32[1,32], index: 9, kind: input, shape index: {}]   ;;  %s8877_s10 = inlined_call_operand.vmem [shape: bf16[32,64], index: 10, kind: input, shape index: {}]   ;;  %s8878_s11 = inlined_call_operand.vmem [shape: f32[1,64], index: 11, kind: input, shape index: {}]   ;;  %s8879_s12 = inlined_call_operand.vmem [shape: bf16[64,32], index: 12, kind: input, shape index: {}]   ;;  %s8880_s13 = inlined_call_operand.vmem [shape: f32[1,32], index: 13, kind: input, shape index: {}]   ;;  %s8881_s14 = inlined_call_operand.vmem [shape: f32[1,32], index: 14, kind: input, shape index: {}]   ;;  %s8882_s15 = inlined_call_operand.vmem [shape: f32[1,32], index: 15, kind: input, shape index: {}]   ;;  %s8883_s16 = inlined_call_operand.hbm [shape: f32[2,8,32], index: 16, kind: output, shape index: {}]  }
   0x1   :  { %8980 = sst [smem:[#allocation67_spill]] %s8867_s0 }
   0x2   :  { %8981 = sst [smem:[#allocation68_spill]] %s8870_s3 }
   0x3   :  { %8982 = sst [smem:[#allocation69_spill]] %s8883_s16 }
   0x4   :  { %21 = vsyncpa [#allocation3], 0 }
   0x5   :  { %22 = vsyncpa [#allocation6], 0 }
   0x6   :  { %23 = vsyncpa [#allocation9], 0 }
   0x7   :  { %24 = vsyncpa [#allocation12], 0 }
   0x8   :  { %25 = vsyncpa [#allocation4], 0 }
   0x9   :  { %27 = vsyncpa [#allocation4 + $0x1], 0  ;;  %s6848_s21 = smov 0   ;;  %s6850_s22 = smov 0  }
   0xa   :  { %s6852_s23 = smov 0   ;;  %s6854_s24 = smov 0  }
   0xb LB: > { %8983 = sst [smem:[#allocation19_spill]] %s6721_s21  ;;  %s6869_s14 = sadd.s32 4294967295, %s6733_s24   ;;  %s6733_s24 = sphi %s6854_s24, %s9235_s24   ;;  %s6729_s23 = sphi %s6852_s23, %s9240_s23   ;;  %s6725_s22 = sphi %s6850_s22, %s9239_s22   ;;  %s6721_s21 = sphi %s6848_s21, %s9238_s21  }
   0xc   : > { %8984 = sst [smem:[#allocation20_spill]] %s6729_s23  ;;  %s5907_s15 = sadd.s32 4294967294, %s6733_s24  }
   0xd   : > { %8985 = sst [smem:[#allocation21_spill]] %s6733_s24  ;;  %s6873_s25 = sadd.s32 1, %s6733_s24  }
   0xe   : > { %8986 = sst [smem:[#allocation22_spill]] %s6873_s25  ;;  %s386_s26 = sadd.s32 1, %s6729_s23 }
   0xf   : > { %s383_s27 = ssub.s32 %s6733_s24, %s6873_s25  ;;  %p396_p0 = scmp.ne.s32.totalorder %s6729_s23, %s6725_s22 }
  0x10   : > { %p384_p1 = scmp.eq.s32.totalorder %s383_s27, 0  ;;  %p397_p2 = scmp.eq.s32.totalorder %s6869_s14, 1 }
  0x11   : > { %p402_p3 = scmp.ne.s32.totalorder %s6725_s22, %s6721_s21  ;;  %p403_p4 = scmp.eq.s32.totalorder %s5907_s15, 1 }
  0x12   : > { %s6884_s28 = scalar_select %p384_p1, %s6729_s23, %s386_s26  }
  0x13   : > { %p6886_p5 = por %p397_p2, %p396_p0  ;;  %p6890_p6 = por %p403_p4, %p402_p3 }
  0x14   : > { %8987 = sst [smem:[#allocation23_spill]] %s6884_s28  ;;  %p5908_p7 = scmp.ge.s32.totalorder %s6733_s24, 1 }
  0x15   : > { %s8988_s29 = scalar_select %p6886_p5, 1, 0 }
  0x16   : > { %s8989_s30 = scalar_select %p6890_p6, 1, 0 }
  0x17   : > { %p410_p8 = scmp.lt.s32.totalorder %s6733_s24, 3  ;;  %p8889_p9 = scmp.eq.s32.totalorder %s6869_s14, 0 }
  0x18   : > { %8990 = sst [smem:[#allocation24_spill]] %s8989_s30  ;;  %s6735_s17 = smov [#allocation5]  }
  0x19   : > { %p6897_p10 = pnand %p5908_p7, %p410_p8  ;;  %s434_s18 = sshll.u32 %s6735_s17, 4  ;;  %s435_s18 = int_to_ptr.vmem [resolvable:$true] %s434_s18 }
  0x1a   : > { %s6736_s20 = smov [#allocation8]   ;;  %s6737_s26 = smov [#allocation2]  }
  0x1b   : > { %s8991_s0 = scalar_select %p6897_p10, 1, 0 }
  0x1c   : > { %p6229_p11 = pneg %p6897_p10  ;;  %s463_s15 = sshll.u32 %s6736_s20, 4  ;;  %s6909_s15 = int_to_ptr.vmem [resolvable:$true] %s463_s15 }
  0x1d   : > { %s6911_s27 = sshll.u32 %s6737_s26, 4  ;;  %s8993_s3 = sld [smem:[#allocation68_spill]]  ;;  %s424_s27 = int_to_ptr.vmem [resolvable:$true] %s6911_s27 }
  0x1e   : > { %p6905_p12 = pnand %p8889_p9, %p6229_p11 }
  0x20   : > { %p6921_p0 = pneg %p6905_p12 }
  0x23   : > { %s6487_s17 = scalar_lea.hbm %s8993_s3, 16 }
  0x24   : > { %p6488_p13 = scmp.ne.s32.totalorder %s8993_s3, %s6487_s17  ;;  %p6494_p3 = scmp.lt.u32.totalorder %s6487_s17, %s8993_s3 }
  0x26   : > { %p6490_p1 = pnand %p6921_p0, %p6488_p13 }
  0x28   : > { %p6491_p2 = pneg %p6490_p1 }
  0x2a   : > { %p6496_p4 = pnand %p6494_p3, %p6491_p2 }
  0x2c   : > { %6499 = shalt.err (!%p6496_p4)
}
  0x2d   : > { %s6500_s23 = scalar_lea.vmem %s435_s18, 16  ;;  %s6507_s25 = scalar_lea.vmem %s435_s18, 32 }
  0x2e   : > { %p6501_p7 = scmp.ne.s32.totalorder %s435_s18, %s6500_s23  ;;  %p6508_p9 = scmp.lt.s32.totalorder %s435_s18, %s435_s18 }
  0x2f   : > { %p6509_p6 = scmp.lt.s32.totalorder %s6507_s25, %s6500_s23 }
  0x30   : > { %p6503_p8 = pnand %p6501_p7, %p6921_p0 }
  0x31   : > { %p6510_p5 = por %p6509_p6, %p6508_p9 }
  0x32   : > { %p6504_p11 = pneg %p6503_p8 }
  0x34   : > { %p6511_p10 = pnand %p6510_p5, %p6504_p11 }
  0x36   : > { %6514 = shalt.err (!%p6511_p10)
}
  0x37   : > { %6235 = dma.hbm_to_vmem [thread:$0]  (!%p6905_p12), %s8993_s3, 16, %s435_s18, [#allocation6]  }
  0x38   : > { %s6515_s26 = scalar_lea.hbm %s8874_s7, 256 }
  0x39   : > { %p6516_p13 = scmp.ne.s32.totalorder %s8874_s7, %s6515_s26  ;;  %p6522_p5 = scmp.lt.u32.totalorder %s6515_s26, %s8874_s7 }
  0x3b   : > { %p6518_p1 = pnand %p6516_p13, %p6921_p0 }
  0x3d   : > { %p6519_p6 = pneg %p6518_p1 }
  0x3f   : > { %p6524_p9 = pnand %p6522_p5, %p6519_p6 }
  0x41   : > { %6527 = shalt.err (!%p6524_p9)
}
  0x42   : > { %s6528_s18 = scalar_lea.vmem %s6909_s15, 256  ;;  %p6536_p4 = scmp.lt.s32.totalorder %s6909_s15, %s6909_s15 }
  0x43   : > { %p6529_p10 = scmp.ne.s32.totalorder %s6909_s15, %s6528_s18  ;;  %p6537_p7 = scmp.lt.s32.totalorder %s6528_s18, %s6528_s18 }
  0x45   : > { %p6531_p2 = pnand %p6529_p10, %p6921_p0  ;;  %p6538_p8 = por %p6537_p7, %p6536_p4 }
  0x47   : > { %p6532_p3 = pneg %p6531_p2 }
  0x49   : > { %p6539_p11 = pnand %p6538_p8, %p6532_p3 }
  0x4b   : > { %6542 = shalt.err (!%p6539_p11)
}
  0x4c   : > { %s8894_s16 = smov 64   ;;  %s8895_s24 = smov 4  }
  0x4d   : > { %6241 = dma.hbm_to_vmem [thread:$0]  (!%p6905_p12), %s8874_s7, 256, %s6909_s15, [#allocation9], %s8894_s16, %s8894_s16, %s8895_s24  }
  0x4e   : > { %s6543_s26 = scalar_lea.hbm %s8869_s2, 16 }
  0x4f   : > { %p6544_p13 = scmp.ne.s32.totalorder %s8869_s2, %s6543_s26  ;;  %p6550_p5 = scmp.lt.u32.totalorder %s6543_s26, %s8869_s2 }
  0x51   : > { %p6546_p1 = pnand %p6544_p13, %p6921_p0 }
  0x53   : > { %p6547_p6 = pneg %p6546_p1 }
  0x55   : > { %p6552_p9 = pnand %p6550_p5, %p6547_p6 }
  0x57   : > { %6555 = shalt.err (!%p6552_p9)
}
  0x58   : > { %s6556_s28 = scalar_lea.vmem %s424_s27, 16  ;;  %s6563_s15 = scalar_lea.vmem %s424_s27, 32 }
  0x59   : > { %p6557_p10 = scmp.ne.s32.totalorder %s424_s27, %s6556_s28  ;;  %p6564_p4 = scmp.lt.s32.totalorder %s424_s27, %s424_s27 }
  0x5a   : > { %p6565_p7 = scmp.lt.s32.totalorder %s6563_s15, %s6556_s28 }
  0x5b   : > { %p6559_p2 = pnand %p6557_p10, %p6921_p0 }
  0x5c   : > { %p6566_p8 = por %p6565_p7, %p6564_p4 }
  0x5d   : > { %p6560_p3 = pneg %p6559_p2 }
  0x5f   : > { %p6567_p11 = pnand %p6566_p8, %p6560_p3 }
  0x61   : > { %6570 = shalt.err (!%p6567_p11)
}
  0x62   : > { %6232 = dma.hbm_to_vmem [thread:$0]  (!%p6905_p12), %s8869_s2, 16, %s424_s27, [#allocation3]  }
  0x63   : > { %s6740_s3 = smov [#allocation7]   ;;  %s6741_s26 = smov [#allocation10]  }
  0x64   : > { %s450_s20 = sshll.u32 %s6740_s3, 4  ;;  %s477_s23 = sshll.u32 %s6741_s26, 4  ;;  %s451_s20 = int_to_ptr.vmem [resolvable:$true] %s450_s20  ;;  %s478_s23 = int_to_ptr.vmem [resolvable:$true] %s477_s23 }
  0x65   : > { %s6571_s16 = scalar_lea.hbm %s8873_s6, 256 }
  0x66   : > { %p6572_p13 = scmp.ne.s32.totalorder %s8873_s6, %s6571_s16  ;;  %p6578_p5 = scmp.lt.u32.totalorder %s6571_s16, %s8873_s6 }
  0x68   : > { %p6574_p1 = pnand %p6572_p13, %p6921_p0 }
  0x6a   : > { %p6575_p6 = pneg %p6574_p1 }
  0x6c   : > { %p6580_p9 = pnand %p6578_p5, %p6575_p6 }
  0x6e   : > { %6583 = shalt.err (!%p6580_p9)
}
  0x6f   : > { %s6584_s27 = scalar_lea.vmem %s451_s20, 256  ;;  %p6592_p4 = scmp.lt.s32.totalorder %s451_s20, %s451_s20 }
  0x70   : > { %p6585_p10 = scmp.ne.s32.totalorder %s451_s20, %s6584_s27  ;;  %p6593_p7 = scmp.lt.s32.totalorder %s6584_s27, %s6584_s27 }
  0x72   : > { %p6587_p2 = pnand %p6585_p10, %p6921_p0  ;;  %p6594_p8 = por %p6593_p7, %p6592_p4 }
  0x74   : > { %p6588_p3 = pneg %p6587_p2 }
  0x76   : > { %p6595_p11 = pnand %p6594_p8, %p6588_p3 }
  0x78   : > { %6598 = shalt.err (!%p6595_p11)
}
  0x79   : > { %s8995_s17 = smov 4   ;;  %s8996_s3 = smov 64  }
  0x7a   : > { %6238 = dma.hbm_to_vmem [thread:$0]  (!%p6905_p12), %s8873_s6, 256, %s451_s20, [#allocation6], %s8996_s3, %s8996_s3, %s8995_s17  }
  0x7b   : > { %s6599_s18 = scalar_lea.hbm %s8875_s8, 16 }
  0x7c   : > { %p6600_p13 = scmp.ne.s32.totalorder %s8875_s8, %s6599_s18  ;;  %p6606_p5 = scmp.lt.u32.totalorder %s6599_s18, %s8875_s8 }
  0x7e   : > { %p6602_p1 = pnand %p6600_p13, %p6921_p0 }
  0x80   : > { %p6603_p6 = pneg %p6602_p1 }
  0x82   : > { %p6608_p9 = pnand %p6606_p5, %p6603_p6 }
  0x84   : > { %6611 = shalt.err (!%p6608_p9)
}
  0x85   : > { %s6612_s24 = scalar_lea.vmem %s478_s23, 16  ;;  %s6619_s20 = scalar_lea.vmem %s478_s23, 32 }
  0x86   : > { %p6613_p10 = scmp.ne.s32.totalorder %s478_s23, %s6612_s24  ;;  %p6620_p4 = scmp.lt.s32.totalorder %s478_s23, %s478_s23 }
  0x87   : > { %p6621_p7 = scmp.lt.s32.totalorder %s6619_s20, %s6612_s24 }
  0x88   : > { %p6615_p2 = pnand %p6613_p10, %p6921_p0 }
  0x89   : > { %p6622_p8 = por %p6621_p7, %p6620_p4 }
  0x8a   : > { %p6616_p3 = pneg %p6615_p2 }
  0x8c   : > { %p6623_p11 = pnand %p6622_p8, %p6616_p3 }
  0x8e   : > { %6626 = shalt.err (!%p6623_p11)
}
  0x8f   : > { %6244 = dma.hbm_to_vmem [thread:$0]  (!%p6905_p12), %s8875_s8, 16, %s478_s23, [#allocation9]  }
  0x90   : > { %s6742_s16 = smov [#allocation11]   ;;  %s6627_s28 = scalar_lea.hbm %s8876_s9, 16 }
  0x91   : > { %s488_s26 = sshll.u32 %s6742_s16, 4  ;;  %p6628_p13 = scmp.ne.s32.totalorder %s8876_s9, %s6627_s28  ;;  %s489_s26 = int_to_ptr.vmem [resolvable:$true] %s488_s26 }
  0x92   : > { %p6634_p5 = scmp.lt.u32.totalorder %s6627_s28, %s8876_s9 }
  0x93   : > { %p6630_p1 = pnand %p6628_p13, %p6921_p0 }
  0x95   : > { %p6631_p6 = pneg %p6630_p1 }
  0x97   : > { %p6636_p9 = pnand %p6634_p5, %p6631_p6 }
  0x99   : > { %6639 = shalt.err (!%p6636_p9)
}
  0x9a   : > { %s6640_s23 = scalar_lea.vmem %s489_s26, 16  ;;  %s6647_s20 = scalar_lea.vmem %s489_s26, 32 }
  0x9b   : > { %p6641_p10 = scmp.ne.s32.totalorder %s489_s26, %s6640_s23  ;;  %p6648_p4 = scmp.lt.s32.totalorder %s489_s26, %s489_s26 }
  0x9c   : > { %p6649_p7 = scmp.lt.s32.totalorder %s6647_s20, %s6640_s23 }
  0x9d   : > { %p6643_p2 = pnand %p6641_p10, %p6921_p0 }
  0x9e   : > { %p6650_p8 = por %p6649_p7, %p6648_p4 }
  0x9f   : > { %p6644_p3 = pneg %p6643_p2 }
  0xa1   : > { %p6651_p11 = pnand %p6650_p8, %p6644_p3 }
  0xa3   : > { %6654 = shalt.err (!%p6651_p11)
}
  0xa4   : > { %6247 = dma.hbm_to_vmem [thread:$0]  (!%p6905_p12), %s8876_s9, 16, %s489_s26, [#allocation12]  }
  0xa5   : > { %p8997_p13 = scmp.ne.s32.totalorder %s8991_s0, 0 }
  0xa7   : > { %532 = sbr.rel (%p8997_p13) target bundleno = 2929 (0xb71), region = 84 }
  0xae   : > { %p8998_p1 = scmp.eq.s32.totalorder %s6869_s14, 0 }
  0xb0   : > { %6700 = dma.done.wait (%p8998_p1), [#allocation3], 16   ;;  %p8999_p0 = pmov %p8998_p1 }
  0xb2   : > { %6702 = vsyncadd (%p8999_p0), [#allocation3], 4294967280  ;;  %p9000_p6 = pmov %p8999_p0 }
  0xb3   : > { %p9001_p5 = pmov %p8999_p0 }
  0xb4   : > { %6704 = dma.done.wait (%p9000_p6), [#allocation6], 272  }
  0xb5   : > { %6706 = vsyncadd (%p9001_p5), [#allocation6], 4294967024  ;;  %p9002_p9 = pmov %p8999_p0 }
  0xb6   : > { %p9003_p12 = pmov %p8999_p0 }
  0xb7   : > { %6708 = dma.done.wait (%p9002_p9), [#allocation9], 272  }
  0xb8   : > { %6710 = vsyncadd (%p9003_p12), [#allocation9], 4294967024  ;;  %p9004_p10 = pmov %p8999_p0 }
  0xb9   : > { %p9005_p2 = pmov %p8999_p0 }
  0xba   : > { %6712 = dma.done.wait (%p9004_p10), [#allocation12], 16  }
  0xbb   : > { %6714 = vsyncadd (%p9005_p2), [#allocation12], 4294967280  ;;  %p604_p3 = scmp.lt.s32.totalorder %s6869_s14, 1  ;;  %s9006_s26 = sld [smem:[#allocation67_spill]]  ;;  %vm617_vm0 = vcmask 261120   ;;  %v6324_v7 = vld [vmem:[%s8871_s4] sm:$0xff]   ;;  %v846_v39 = vlaneseq }
  0xbc   : > { %v6325_v8 = vld [vmem:[%s8872_s5] sm:$0xff]   ;;  %v8896_v9 = vmov 0.0   ;;  %v6326_v10 = vld [vmem:[%s8871_s4 + $0x8] sm:$0xff]   ;;  %vm6744_vm1 = vmmov 0   ;;  %s6745_s17 = smov 116   ;;  %s6746_s3 = smov 124  }
  0xbd   : > { %s7059_s21 = scalar_select %p604_p3, %s6869_s14, 1  ;;  %6055 = vmatprep.subr.bf16.mxu0 %v8896_v9  ;;  %6063 = vmatprep.subr.bf16.mxu1 %v8896_v9  ;;  %v6327_v11 = vld [vmem:[%s8872_s5 + $0x8] sm:$0xff]   ;;  %v5925_v16 = vld [vmem:[#allocation2] ss:$0 sm:$0xff]  ;;  %v5926_v18 = vld [vmem:[#allocation5] ss:$0 sm:$0xff] }
  0xbe   : > { %6056 = vmatpush3.bf16.msra.mxu0 %v6324_v7  ;;  %6064 = vmatpush3.bf16.msra.mxu1 %v6325_v8  ;;  %v6328_v21 = vld [vmem:[#allocation7] sm:$0xff]   ;;  %v6329_v23 = vld [vmem:[#allocation7 + $0x8] sm:$0xff]   ;;  %s6748_s19 = smov 120   ;;  %s6749_s16 = smov 112   ;;  %v6752_v37 = vmov 1983009808  }
  0xbf   : > { %s5924_s0 = sshll.u32 %s7059_s21, 3  ;;  %6057 = vmatprep.subr.bf16.mxu0 %v8896_v9  ;;  %6065 = vmatprep.subr.bf16.mxu1 %v8896_v9  ;;  %s6751_s18 = smov 104   ;;  %v844_v38 = vunpack.c.l.s4 %v6752_v37  ;;  %v6753_v40 = vmov 1934713408   ;;  %v7128_v43 = vshrl.u32 %v846_v39, 7  ;;  %vm1725_vm2 = vcmask 31744  }
  0xc0   : > { %6059 = vmatprep.mubr.msk.bf16.mxu0 %vm6744_vm1, %v8896_v9  ;;  %6067 = vmatprep.mubr.msk.bf16.mxu1 %vm6744_vm1, %v8896_v9  ;;  %v908_v41 = vunpack.c.l.s4 %v6753_v40  ;;  %s610_s30 = scalar_lea.vmem %s8868_s1, %s7059_s21  ;;  %vm3088_vm4 = vcmask 64512   ;;  %vm4626_vm5 = vcmask 1043456   ;;  %vm4602_vm6 = vcmask 1041409   ;;  %s6755_s21 = smov 8  }
  0xc1   : > { %s7065_s25 = scalar_lea.vmem %s9006_s26, %s5924_s0  ;;  %s6747_s0 = smov 100   ;;  %v845_v42 = vunpack.c.0.s8 %v844_v38  ;;  %vm4605_vm7 = vcmask 1042434   ;;  %vm4608_vm8 = vcmask 1043459   ;;  %vm4611_vm9 = vcmask 1044484  }
  0xc2   : > { %v612_v0 = vld [vmem:[%s7065_s25] sm:$0xff]  ;;  %6058 = vmatpush3.bf16.msra.mxu0 %v6326_v10  ;;  %6066 = vmatpush3.bf16.msra.mxu1 %v6327_v11  ;;  %s6750_s26 = smov 108   ;;  %v909_v46 = vunpack.c.0.s8 %v908_v41  ;;  %vm4614_vm10 = vcmask 1045509   ;;  %vm4617_vm11 = vcmask 1046534   ;;  %vm4620_vm12 = vcmask 1047559   ;;  %s6756_s27 = smov 4  }
  0xc3   : > { %v618_v1 = vsel %vm617_vm0, %v612_v0, 0.0  ;;  %6071 = vmatprep.subr.bf16.mxu0 %v8896_v9  ;;  %6079 = vmatprep.subr.bf16.mxu1 %v8896_v9  ;;  %v7131_v47 = vsub.s32 %v845_v42, %v7128_v43  ;;  %s6757_s24 = smov 12   ;;  %s6758_s23 = smov 20   ;;  %vm5511_vm13 = vcmask 97280   ;;  %vm5513_vm14 = vcmask 130048  }
  0xc4   : > { %619 = vadd.xlane.f32.xlu0 %v618_v1  ;;  %v7136_v54 = vsub.s32 %v909_v46, %v7128_v43  ;;  %s6759_s20 = smov 16   ;;  %vm5515_vm15 = vcmask 162816   ;;  %s9229_s15 = sld [smem:[#allocation69_spill]] }
  0xc5   : > { %9008 = vst [vmem:[#allocation26_spill] sm:$0xff] %v7131_v47  ;;  %p9230_p7 = scmp.ne.s32.totalorder %s8988_s29, 0 }
  0xc6   : > { %9009 = vst [vmem:[#allocation27_spill] sm:$0xff] %v7136_v54 }
 0x151   : > { %v620_v2 = vpop.xlane.xlu0 %619 }
 0x152   : > { %v622_v3 = vmul.f32 0.03125, %v620_v2 }
 0x154   : > { %v623_v4 = vsub.f32 %v612_v0, %v622_v3 }
 0x156   : > { %v624_v5 = vmul.f32 %v623_v4, %v623_v4 }
 0x158   : > { %v625_v6 = vsel %vm617_vm0, %v624_v5, 0.0 }
 0x159   : > { %626 = vadd.xlane.f32.xlu0 %v625_v6 }
 0x1e6   : > { %v627_v12 = vpop.xlane.xlu0 %626 }
 0x1e7   : > { %v628_v13 = vmul.f32 0.03125, %v627_v12 }
 0x1e9   : > { %v629_v14 = vadd.f32 1e-06, %v628_v13 }
 0x1eb   : > { %6338 = vrsqrt.f32 %v629_v14 }
 0x1f5   : > { %v6339_v15 = vpop.eup %6338 }
 0x1f6   : > { %v631_v17 = vmul.f32 %v6339_v15, %v623_v4 }
 0x1f8   : > { %v638_v19 = vmul.f32 %v5925_v16, %v631_v17 }
 0x1fa   : > { %v645_v20 = vadd.f32 %v5926_v18, %v638_v19 }
 0x1fc   : > { %v646_v22 = vpack.c.bf16 %v645_v20, %v645_v20 }
 0x1fe   : > { %6060 = vmatmul.mubr.msk.bf16.vlgmr.msra.gmra.mrb[0].mxu0 %vm617_vm0, %v646_v22  ;;  %6068 = vmatmul.mubr.msk.bf16.vlgmr.msra.gmra.mrb[0].mxu1 %vm617_vm0, %v646_v22 }
 0x1ff   : > { %6072 = vmatpush3.bf16.msra.mxu0 %v6328_v21  ;;  %6075 = vmatprep.mubr.msk.bf16.mxu0 %vm6744_vm1, %v8896_v9 }
 0x200   : > { %6073 = vmatprep.subr.bf16.mxu0 %v8896_v9  ;;  %6081 = vmatprep.mubr.msk.bf16.mxu1 %vm6744_vm1, %v8896_v9 }
 0x203   : > { %6074 = vmatpush3.bf16.msra.mxu0 %v6329_v23 }
 0x204   : > { %6085 = vmatprep.subr.bf16.mxu0 %v8896_v9 }
 0x206   : > { %6076 = vmatmul.mubr.msk.bf16.vlgmr.msra.gmra.mrb[4].mxu0 %vm617_vm0, %v646_v22 }
 0x207   : > { %6087 = vmatprep.mubr.msk.bf16.mxu0 %vm6744_vm1, %v8896_v9 }
 0x2d1   : > { %v700_v24 = vpop.f32.mrb[0].mxu0  ;;  %v757_v25 = vpop.f32.mrb[0].mxu1 }
 0x2d2   : > { %1128 = vrot.lane.b32.xlu0 %v757_v25, %s6745_s17  ;;  %1122 = vrot.lane.b32.xlu1 %v757_v25, %s6746_s3  ;;  %v6061_v26 = vpop.f32.mrb[1].mxu0  ;;  %v6069_v27 = vpop.f32.mrb[1].mxu1  ;;  %v7107_v32 = vmul.f32 0.5, %v700_v24 }
 0x2d3   : > { %v703_v28 = vpop.f32.mrb[2].mxu0  ;;  %v760_v29 = vpop.f32.mrb[2].mxu1 }
 0x2d4   : > { %v6062_v30 = vpop.f32.mrb[3].mxu0  ;;  %v6070_v31 = vpop.f32.mrb[3].mxu1 }
 0x2d6   : > { %1140 = vrot.lane.b32.xlu0 %v757_v25, %s6747_s0  ;;  %1125 = vrot.lane.b32.xlu1 %v757_v25, %s6748_s19 }
 0x2d9   : > { %v7109_v33 = vpop.f32.mrb[4].mxu0 }
 0x2da   : > { %9007 = vst [vmem:[#allocation25_spill] sm:$0xff] %v7109_v33  ;;  %1131 = vrot.lane.b32.xlu1 %v757_v25, %s6749_s16  ;;  %832 = vrot.lane.b32.xlu0 %v7107_v32, %s6750_s26  ;;  %v6077_v34 = vpop.f32.mrb[5].mxu0 }
 0x2db   : > { %v816_v35 = vpop.f32.mrb[6].mxu0 }
 0x2dc   : > { %v6078_v36 = vpop.f32.mrb[7].mxu0 }
 0x2de   : > { %838 = vrot.lane.b32.xlu0 %v7107_v32, %s6747_s0  ;;  %820 = vrot.lane.b32.xlu1 %v7107_v32, %s6746_s3 }
 0x2e2   : > { %823 = vrot.lane.b32.xlu1 %v7107_v32, %s6748_s19 }
 0x2e6   : > { %826 = vrot.lane.b32.xlu1 %v7107_v32, %s6745_s17 }
 0x2ea   : > { %1134 = vrot.lane.b32.xlu1 %v757_v25, %s6750_s26 }
 0x2ee   : > { %1137 = vrot.lane.b32.xlu1 %v757_v25, %s6751_s18 }
 0x2f2   : > { %829 = vrot.lane.b32.xlu1 %v7107_v32, %s6749_s16 }
 0x2f6   : > { %835 = vrot.lane.b32.xlu1 %v7107_v32, %s6751_s18 }
 0x344   : > { %v1129_v44 = vpop.permute.xlu0 %1128  ;;  %v1123_v45 = vpop.permute.xlu1 %1122 }
 0x345   : > { %v1159_v48 = vcombine.low %v1123_v45, %v1129_v44  ;;  %v1160_v49 = vcombine.high %v1123_v45, %v1129_v44 }
 0x347   : > { %v1167_v55 = vrot.slane %v1159_v48, %v7131_v47  ;;  %v1174_v56 = vrot.slane %v1160_v49, %v7131_v47 }
 0x348   : > { %v1126_v50 = vpop.permute.xlu1 %1125  ;;  %v7133_v51 = vpop.permute.xlu0 %1140 }
 0x349   : > { %v1143_v52 = vcombine.low %v757_v25, %v1126_v50  ;;  %v1144_v53 = vcombine.high %v757_v25, %v1126_v50 }
 0x34b   : > { %v1151_v57 = vrot.slane %v1143_v52, %v7131_v47  ;;  %v1158_v58 = vrot.slane %v1144_v53, %v7131_v47 }
 0x34c   : > { %v7142_v59 = vpop.permute.xlu1 %1131  ;;  %v833_v4 = vpop.permute.xlu0 %832 }
 0x34d   : > { %v1207_v60 = vcombine.low %v1151_v57, %v1167_v55  ;;  %v1208_v61 = vcombine.high %v1151_v57, %v1167_v55  ;;  %v1223_v62 = vcombine.low %v1158_v58, %v1174_v56  ;;  %v1224_v63 = vcombine.high %v1158_v58, %v1174_v56 }
 0x34f   : > { %v1215_v0 = vrot.slane %v1207_v60, %v7136_v54  ;;  %v1222_v1 = vrot.slane %v1208_v61, %v7136_v54  ;;  %v1231_v2 = vrot.slane %v1223_v62, %v7136_v54  ;;  %v1238_v3 = vrot.slane %v1224_v63, %v7136_v54 }
 0x350   : > { %v821_v5 = vpop.permute.xlu1 %820  ;;  %v839_v16 = vpop.permute.xlu0 %838 }
 0x351   : > { %v5944_v6 = vcombine.low %v1215_v0, %v1222_v1  ;;  %v5946_v7 = vcombine.high %v1215_v0, %v1222_v1  ;;  %v5948_v8 = vcombine.low %v1231_v2, %v1238_v3  ;;  %v5950_v10 = vcombine.high %v1231_v2, %v1238_v3 }
 0x352   : > { %v889_v25 = vcombine.low %v833_v4, %v839_v16  ;;  %v890_v40 = vcombine.high %v833_v4, %v839_v16 }
 0x353   : > { %v1287_v11 = vrot.slane %v5944_v6, %v7131_v47  ;;  %v1303_v12 = vrot.slane %v5946_v7, %v7131_v47  ;;  %v1319_v13 = vrot.slane %v5948_v8, %v7131_v47  ;;  %v1335_v14 = vrot.slane %v5950_v10, %v7131_v47 }
 0x354   : > { %v824_v15 = vpop.permute.xlu1 %823  ;;  %v7163_v41 = vrot.slane %v889_v25, %v7131_v47  ;;  %v7176_v60 = vrot.slane %v890_v40, %v7131_v47 }
 0x355   : > { %v1343_v17 = vcombine.low %v1287_v11, %v1303_v12  ;;  %v1375_v18 = vcombine.low %v1319_v13, %v1335_v14  ;;  %v841_v19 = vcombine.low %v7107_v32, %v824_v15  ;;  %v842_v20 = vcombine.high %v7107_v32, %v824_v15 }
 0x356   : > { %v1344_v21 = vcombine.high %v1287_v11, %v1303_v12  ;;  %v1376_v22 = vcombine.high %v1319_v13, %v1335_v14 }
 0x357   : > { %v1351_v23 = vrot.slane %v1343_v17, %v7136_v54  ;;  %v1383_v24 = vrot.slane %v1375_v18, %v7136_v54  ;;  %v849_v31 = vrot.slane %v841_v19, %v7131_v47  ;;  %v856_v34 = vrot.slane %v842_v20, %v7131_v47 }
 0x358   : > { %v827_v26 = vpop.permute.xlu1 %826  ;;  %v1358_v35 = vrot.slane %v1344_v21, %v7136_v54  ;;  %v1390_v32 = vrot.slane %v1376_v22, %v7136_v54 }
 0x359   : > { %v857_v27 = vcombine.low %v821_v5, %v827_v26  ;;  %v858_v28 = vcombine.high %v821_v5, %v827_v26  ;;  %v1407_v29 = vcombine.low %v1351_v23, %v1383_v24  ;;  %v1408_v30 = vcombine.high %v1351_v23, %v1383_v24 }
 0x35a   : > { %v7167_v52 = vcombine.low %v1358_v35, %v1390_v32  ;;  %v7169_v53 = vcombine.high %v1358_v35, %v1390_v32 }
 0x35b   : > { %v865_v36 = vrot.slane %v857_v27, %v7131_v47  ;;  %v872_v37 = vrot.slane %v858_v28, %v7131_v47  ;;  %v1415_v38 = vpack.c.bf16 %v1407_v29, %v1407_v29  ;;  %v1416_v39 = vpack.c.bf16 %v1408_v30, %v1408_v30 }
 0x35c   : > { %v1135_v42 = vpop.permute.xlu1 %1134  ;;  %v1417_v6 = vpack.c.bf16 %v7167_v52, %v7167_v52 }
 0x35d   : > { %v905_v44 = vcombine.low %v849_v31, %v865_v36  ;;  %v906_v45 = vcombine.high %v849_v31, %v865_v36  ;;  %v921_v46 = vcombine.low %v856_v34, %v872_v37  ;;  %v922_v48 = vcombine.high %v856_v34, %v872_v37 }
 0x35e   : > { %v1730_v49 = vsel %vm1725_vm2, %v1415_v38, 0  ;;  %v1776_v50 = vsel %vm1725_vm2, %v1416_v39, 0  ;;  %v1191_v61 = vcombine.low %v1135_v42, %v7133_v51  ;;  %v1192_v62 = vcombine.high %v1135_v42, %v7133_v51 }
 0x35f   : > { %v913_v55 = vrot.slane %v905_v44, %v7136_v54  ;;  %v920_v56 = vrot.slane %v906_v45, %v7136_v54  ;;  %v929_v57 = vrot.slane %v921_v46, %v7136_v54  ;;  %v936_v58 = vrot.slane %v922_v48, %v7136_v54  ;;  %6080 = vmatpush3.bf16.xpose.msra.mxu1 %v1730_v49 }
 0x360   : > { %6086 = vmatpush3.bf16.xpose.msra.mxu0 %v1776_v50  ;;  %v1138_v63 = vpop.permute.xlu1 %1137  ;;  %6091 = vmatprep.subr.bf16.mxu1 %v8896_v9  ;;  %v1418_v51 = vpack.c.bf16 %v7169_v53, %v7169_v53  ;;  %v1199_v12 = vrot.slane %v1191_v61, %v7131_v47  ;;  %v1206_v13 = vrot.slane %v1192_v62, %v7131_v47  ;;  %v1822_v53 = vsel %vm1725_vm2, %v1417_v6, 0 }
 0x361   : > { %v5936_v0 = vcombine.low %v913_v55, %v920_v56  ;;  %v5938_v1 = vcombine.high %v913_v55, %v920_v56  ;;  %v5940_v2 = vcombine.low %v929_v57, %v936_v58  ;;  %v5942_v3 = vcombine.high %v929_v57, %v936_v58  ;;  %6097 = vmatprep.subr.bf16.mxu0 %v8896_v9 }
 0x362   : > { %v1175_v4 = vcombine.low %v7142_v59, %v1138_v63  ;;  %v1176_v5 = vcombine.high %v7142_v59, %v1138_v63  ;;  %v1868_v62 = vsel %vm1725_vm2, %v1418_v51, 0 }
 0x363   : > { %v985_v7 = vrot.slane %v5936_v0, %v7131_v47  ;;  %v1001_v8 = vrot.slane %v5938_v1, %v7131_v47  ;;  %v1017_v10 = vrot.slane %v5940_v2, %v7131_v47  ;;  %v1033_v11 = vrot.slane %v5942_v3, %v7131_v47 }
 0x364   : > { %v1183_v59 = vrot.slane %v1175_v4, %v7131_v47  ;;  %v1190_v14 = vrot.slane %v1176_v5, %v7131_v47  ;;  %v830_v15 = vpop.permute.xlu1 %829 }
 0x365   : > { %v1041_v16 = vcombine.low %v985_v7, %v1001_v8  ;;  %v1042_v17 = vcombine.high %v985_v7, %v1001_v8  ;;  %v1073_v18 = vcombine.low %v1017_v10, %v1033_v11  ;;  %v1074_v19 = vcombine.high %v1017_v10, %v1033_v11 }
 0x366   : > { %v1239_v20 = vcombine.low %v1183_v59, %v1199_v12  ;;  %v1240_v21 = vcombine.high %v1183_v59, %v1199_v12  ;;  %v1255_v22 = vcombine.low %v1190_v14, %v1206_v13  ;;  %v1256_v23 = vcombine.high %v1190_v14, %v1206_v13 }
 0x367   : > { %v1049_v24 = vrot.slane %v1041_v16, %v7136_v54  ;;  %v1081_v25 = vrot.slane %v1073_v18, %v7136_v54  ;;  %v1056_v26 = vrot.slane %v1042_v17, %v7136_v54  ;;  %v1088_v27 = vrot.slane %v1074_v19, %v7136_v54 }
 0x368   : > { %v1247_v28 = vrot.slane %v1239_v20, %v7136_v54  ;;  %v1254_v29 = vrot.slane %v1240_v21, %v7136_v54  ;;  %v1263_v30 = vrot.slane %v1255_v22, %v7136_v54  ;;  %v1270_v31 = vrot.slane %v1256_v23, %v7136_v54  ;;  %v836_v34 = vpop.permute.xlu1 %835 }
 0x369   : > { %v873_v35 = vcombine.low %v830_v15, %v836_v34  ;;  %v874_v32 = vcombine.high %v830_v15, %v836_v34  ;;  %v1105_v36 = vcombine.low %v1049_v24, %v1081_v25  ;;  %v1106_v37 = vcombine.high %v1049_v24, %v1081_v25 }
 0x36a   : > { %v5945_v38 = vcombine.low %v1247_v28, %v1254_v29  ;;  %v5947_v39 = vcombine.high %v1247_v28, %v1254_v29  ;;  %v5949_v40 = vcombine.low %v1263_v30, %v1270_v31  ;;  %v5951_v42 = vcombine.high %v1263_v30, %v1270_v31 }
 0x36b   : > { %v881_v44 = vrot.slane %v873_v35, %v7131_v47  ;;  %v888_v45 = vrot.slane %v874_v32, %v7131_v47  ;;  %v1113_v46 = vpack.c.bf16 %v1105_v36, %v1105_v36  ;;  %v1114_v48 = vpack.c.bf16 %v1106_v37, %v1106_v37 }
 0x36c   : > { %v1294_v49 = vrot.slane %v5945_v38, %v7131_v47  ;;  %v1310_v50 = vrot.slane %v5947_v39, %v7131_v47  ;;  %v1326_v52 = vrot.slane %v5949_v40, %v7131_v47  ;;  %v1342_v61 = vrot.slane %v5951_v42, %v7131_v47 }
 0x36d   : > { %v937_v55 = vcombine.low %v881_v44, %v7163_v41  ;;  %v938_v56 = vcombine.high %v881_v44, %v7163_v41  ;;  %v953_v57 = vcombine.low %v888_v45, %v7176_v60  ;;  %v954_v58 = vcombine.high %v888_v45, %v7176_v60  ;;  %6082 = vmatmul.mubr.msk.bf16.vlgmr.msra.gmra.mrb[4].mxu1 %vm1725_vm2, %v1113_v46 }
 0x36e   : > { %6088 = vmatmul.mubr.msk.bf16.vlgmr.msra.gmra.mrb[8].mxu0 %vm1725_vm2, %v1114_v48  ;;  %6092 = vmatpush3.bf16.xpose.msra.mxu1 %v1822_v53  ;;  %v1107_v63 = vcombine.low %v1056_v26, %v1088_v27  ;;  %v1359_v0 = vcombine.low %v1294_v49, %v1310_v50  ;;  %v1108_v4 = vcombine.high %v1056_v26, %v1088_v27  ;;  %v6754_v53 = vmov 1966171168  }
 0x36f   : > { %v945_v1 = vrot.slane %v937_v55, %v7136_v54  ;;  %v952_v2 = vrot.slane %v938_v56, %v7136_v54  ;;  %v961_v41 = vrot.slane %v953_v57, %v7136_v54  ;;  %v968_v3 = vrot.slane %v954_v58, %v7136_v54  ;;  %6098 = vmatpush3.bf16.xpose.msra.mxu0 %v1868_v62  ;;  %v7273_v58 = vld [vmem:[%s610_s30] sm:$0x1] }
 0x370   : > { %6093 = vmatprep.mubr.msk.bf16.mxu1 %vm6744_vm1, %v8896_v9  ;;  %6099 = vmatprep.mubr.msk.bf16.mxu0 %vm6744_vm1, %v8896_v9  ;;  %v1115_v60 = vpack.c.bf16 %v1107_v63, %v1107_v63  ;;  %v1367_v8 = vrot.slane %v1359_v0, %v7136_v54  ;;  %v1391_v10 = vcombine.low %v1326_v52, %v1342_v61  ;;  %v2106_v55 = vunpack.c.l.s4 %v6754_v53 }
 0x371   : > { %v5937_v5 = vcombine.low %v945_v1, %v952_v2  ;;  %v5939_v6 = vcombine.high %v945_v1, %v952_v2  ;;  %v5941_v51 = vcombine.low %v961_v41, %v968_v3  ;;  %v5943_v7 = vcombine.high %v961_v41, %v968_v3  ;;  %6103 = vmatprep.subr.bf16.mxu1 %v8896_v9 }
 0x372   : > { %6109 = vmatprep.subr.bf16.mxu0 %v8896_v9  ;;  %v1360_v11 = vcombine.high %v1294_v49, %v1310_v50  ;;  %v1392_v12 = vcombine.high %v1326_v52, %v1342_v61  ;;  %v1116_v16 = vpack.c.bf16 %v1108_v4, %v1108_v4  ;;  %v1399_v17 = vrot.slane %v1391_v10, %v7136_v54 }
 0x373   : > { %v992_v13 = vrot.slane %v5937_v5, %v7131_v47  ;;  %v1008_v59 = vrot.slane %v5939_v6, %v7131_v47  ;;  %v1024_v14 = vrot.slane %v5941_v51, %v7131_v47  ;;  %v1040_v15 = vrot.slane %v5943_v7, %v7131_v47 }
 0x374   : > { %v1374_v20 = vrot.slane %v1360_v11, %v7136_v54  ;;  %v1406_v21 = vrot.slane %v1392_v12, %v7136_v54  ;;  %v1411_v22 = vcombine.low %v1367_v8, %v1399_v17  ;;  %v1412_v23 = vcombine.high %v1367_v8, %v1399_v17 }
 0x375   : > { %v1057_v18 = vcombine.low %v992_v13, %v1008_v59  ;;  %v1089_v19 = vcombine.low %v1024_v14, %v1040_v15  ;;  %6094 = vmatmul.mubr.msk.bf16.vlgmr.msra.gmra.mrb[8].mxu1 %vm1725_vm2, %v1115_v60  ;;  %v1058_v32 = vcombine.high %v992_v13, %v1008_v59  ;;  %v1090_v36 = vcombine.high %v1024_v14, %v1040_v15 }
 0x376   : > { %6100 = vmatmul.mubr.msk.bf16.vlgmr.msra.gmra.mrb[12].mxu0 %vm1725_vm2, %v1116_v16  ;;  %6105 = vmatprep.mubr.msk.bf16.mxu1 %vm6744_vm1, %v8896_v9  ;;  %v1419_v26 = vpack.c.bf16 %v1411_v22, %v1411_v22  ;;  %v1420_v27 = vpack.c.bf16 %v1412_v23, %v1412_v23  ;;  %v1413_v28 = vcombine.low %v1374_v20, %v1406_v21  ;;  %v2107_v56 = vunpack.c.0.s8 %v2106_v55 }
 0x377   : > { %6111 = vmatprep.mubr.msk.bf16.mxu0 %vm6744_vm1, %v8896_v9  ;;  %v1065_v24 = vrot.slane %v1057_v18, %v7136_v54  ;;  %v1097_v25 = vrot.slane %v1089_v19, %v7136_v54  ;;  %v1414_v29 = vcombine.high %v1374_v20, %v1406_v21  ;;  %v1072_v42 = vrot.slane %v1058_v32, %v7136_v54 }
 0x378   : > { %v1914_v30 = vsel %vm1725_vm2, %v1419_v26, 0  ;;  %v1960_v31 = vsel %vm1725_vm2, %v1420_v27, 0  ;;  %v1421_v39 = vpack.c.bf16 %v1413_v28, %v1413_v28  ;;  %v1104_v44 = vrot.slane %v1090_v36, %v7136_v54 }
 0x379   : > { %v1109_v34 = vcombine.low %v1065_v24, %v1097_v25  ;;  %v1110_v35 = vcombine.high %v1065_v24, %v1097_v25  ;;  %6104 = vmatpush3.bf16.xpose.msra.mxu1 %v1914_v30  ;;  %6110 = vmatpush3.bf16.xpose.msra.mxu0 %v1960_v31  ;;  %v1422_v40 = vpack.c.bf16 %v1414_v29, %v1414_v29  ;;  %vm614_vm3 = vcmp.gt.f32.partialorder %v7273_v58, 0.0 }
 0x37a   : > { %6115 = vmatprep.subr.bf16.mxu1 %v8896_v9  ;;  %6121 = vmatprep.subr.bf16.mxu0 %v8896_v9  ;;  %v2006_v45 = vsel %vm1725_vm2, %v1421_v39, 0  ;;  %v1111_v48 = vcombine.low %v1072_v42, %v1104_v44  ;;  %v1112_v49 = vcombine.high %v1072_v42, %v1104_v44  ;;  %v7271_v57 = vsub.s32 %v2107_v56, %v7128_v43 }
 0x37b   : > { %v1117_v37 = vpack.c.bf16 %v1109_v34, %v1109_v34  ;;  %v1118_v38 = vpack.c.bf16 %v1110_v35, %v1110_v35  ;;  %v2052_v46 = vsel %vm1725_vm2, %v1422_v40, 0 }
 0x37c   : > { %v1119_v50 = vpack.c.bf16 %v1111_v48, %v1111_v48  ;;  %v1120_v52 = vpack.c.bf16 %v1112_v49, %v1112_v49  ;;  %9010 = vst [vmem:[#allocation28_spill] sm:$0xff] %v7271_v57 }
 0x380   : > { %6106 = vmatmul.mubr.msk.bf16.vlgmr.msra.gmra.mrb[12].mxu1 %vm1725_vm2, %v1117_v37  ;;  %6112 = vmatmul.mubr.msk.bf16.vlgmr.msra.gmra.mrb[16].mxu0 %vm1725_vm2, %v1118_v38 }
 0x381   : > { %6116 = vmatpush3.bf16.xpose.msra.mxu1 %v2006_v45  ;;  %6122 = vmatpush3.bf16.xpose.msra.mxu0 %v2052_v46 }
 0x382   : > { %6117 = vmatprep.mubr.msk.bf16.mxu1 %vm6744_vm1, %v8896_v9  ;;  %6123 = vmatprep.mubr.msk.bf16.mxu0 %vm6744_vm1, %v8896_v9 }
 0x383   : > { %6127 = vmatprep.subr.bf16.mxu1 %v8896_v9  ;;  %6133 = vmatprep.subr.bf16.mxu0 %v8896_v9 }
 0x388   : > { %6118 = vmatmul.mubr.msk.bf16.vlgmr.msra.gmra.mrb[16].mxu1 %vm1725_vm2, %v1119_v50  ;;  %6124 = vmatmul.mubr.msk.bf16.vlgmr.msra.gmra.mrb[20].mxu0 %vm1725_vm2, %v1120_v52 }
 0x389   : > { %6129 = vmatprep.mubr.msk.bf16.mxu1 %vm6744_vm1, %v8896_v9  ;;  %6135 = vmatprep.mubr.msk.bf16.mxu0 %vm6744_vm1, %v8896_v9 }
 0x440   : > { %v1766_v61 = vpop.f32.mrb[4].mxu1 }
 0x441   : > { %v2104_v62 = vcombine.high %v1766_v61, %v1766_v61  ;;  %v2111_v63 = vrot.slane %v1766_v61, %v7271_v57  ;;  %v1812_v0 = vpop.f32.mrb[8].mxu0  ;;  %v6083_v1 = vpop.f32.mrb[5].mxu1 }
 0x442   : > { %v2153_v2 = vcombine.high %v1812_v0, %v1812_v0  ;;  %v2160_v41 = vrot.slane %v1812_v0, %v7271_v57  ;;  %v6089_v3 = vpop.f32.mrb[9].mxu0  ;;  %v1769_v60 = vpop.f32.mrb[6].mxu1 }
 0x443   : > { %v2118_v4 = vrot.slane %v2104_v62, %v7271_v57  ;;  %v2119_v5 = vcombine.high %v2111_v63, %v2111_v63  ;;  %v2127_v6 = vrot.slane %v2111_v63, %v7271_v57  ;;  %v1815_v51 = vpop.f32.mrb[10].mxu0  ;;  %v6084_v7 = vpop.f32.mrb[7].mxu1 }
 0x444   : > { %v2167_v8 = vrot.slane %v2153_v2, %v7271_v57  ;;  %v2168_v10 = vcombine.high %v2160_v41, %v2160_v41  ;;  %v2176_v11 = vrot.slane %v2160_v41, %v7271_v57  ;;  %v6090_v12 = vpop.f32.mrb[11].mxu0 }
 0x445   : > { %v2120_v13 = vcombine.high %v2118_v4, %v2118_v4  ;;  %v2134_v59 = vrot.slane %v2118_v4, %v7271_v57  ;;  %v2141_v14 = vrot.slane %v2119_v5, %v7271_v57  ;;  %v2149_v15 = vcombine.high %v2127_v6, %v2127_v6 }
 0x446   : > { %v7286_v16 = vsel %vm614_vm3, -1e+09, %v2127_v6  ;;  %v2169_v17 = vcombine.high %v2167_v8, %v2167_v8  ;;  %v2183_v18 = vrot.slane %v2167_v8, %v7271_v57  ;;  %v2190_v19 = vrot.slane %v2168_v10, %v7271_v57 }
 0x447   : > { %v2148_v20 = vrot.slane %v2120_v13, %v7271_v57  ;;  %v2150_v21 = vcombine.high %v2134_v59, %v2134_v59  ;;  %v2151_v22 = vcombine.high %v2141_v14, %v2141_v14  ;;  %v7293_v23 = vsel %vm614_vm3, -1e+09, %v2141_v14 }
 0x448   : > { %v7297_v24 = vsel %vm614_vm3, -1e+09, %v2149_v15  ;;  %v7301_v25 = vsel %vm614_vm3, -1e+09, %v2134_v59  ;;  %v2688_v26 = vcombine.low %v7286_v16, %v7293_v23  ;;  %v7306_v27 = vrot.slane %v2169_v17, %v7271_v57  ;;  %v1858_v28 = vpop.f32.mrb[8].mxu1 }
 0x449   : > { %v2152_v29 = vcombine.high %v2148_v20, %v2148_v20  ;;  %v7310_v30 = vsel %vm614_vm3, -1e+09, %v2151_v22  ;;  %v7314_v31 = vsel %vm614_vm3, -1e+09, %v2148_v20  ;;  %v7318_v34 = vsel %vm614_vm3, -1e+09, %v2150_v21 }
 0x44a   : > { %9011 = vst [vmem:[#allocation29_spill] sm:$0xff] %v7318_v34  ;;  %v2689_v35 = vcombine.low %v7297_v24, %v7310_v30  ;;  %v2690_v32 = vcombine.low %v7301_v25, %v7314_v31  ;;  %v2198_v36 = vcombine.high %v2176_v11, %v2176_v11  ;;  %v2199_v37 = vcombine.high %v2183_v18, %v2183_v18  ;;  %v1904_v38 = vpop.f32.mrb[12].mxu0  ;;  %v6095_v39 = vpop.f32.mrb[9].mxu1 }
 0x44b   : > { %v2200_v40 = vcombine.high %v2190_v19, %v2190_v19  ;;  %v7328_v44 = vsel %vm614_vm3, -1e+09, %v2176_v11  ;;  %v7332_v45 = vsel %vm614_vm3, -1e+09, %v2190_v19  ;;  %v6101_v46 = vpop.f32.mrb[13].mxu0  ;;  %v1861_v48 = vpop.f32.mrb[10].mxu1  ;;  %v2202_v62 = vcombine.high %v1858_v28, %v1858_v28 }
 0x44c   : > { %9012 = vst [vmem:[#allocation30_spill] sm:$0xff] %v7328_v44  ;;  %9013 = vst [vmem:[#allocation31_spill] sm:$0xff] %v7332_v45  ;;  %v7336_v49 = vsel %vm614_vm3, -1e+09, %v2198_v36  ;;  %v7340_v50 = vsel %vm614_vm3, -1e+09, %v2183_v18  ;;  %v2209_v2 = vrot.slane %v1858_v28, %v7271_v57  ;;  %v2251_v41 = vcombine.high %v1904_v38, %v1904_v38 }
 0x44d   : > { %9014 = vst [vmem:[#allocation32_spill] sm:$0xff] %v7336_v49  ;;  %9015 = vst [vmem:[#allocation33_spill] sm:$0xff] %v7340_v50  ;;  %v7345_v52 = vsel %vm614_vm3, -1e+09, %v7306_v27  ;;  %v7351_v55 = vsel %vm614_vm3, -1e+09, %v2200_v40  ;;  %v2258_v3 = vrot.slane %v1904_v38, %v7271_v57  ;;  %v2216_v4 = vrot.slane %v2202_v62, %v7271_v57 }
 0x44e   : > { %9016 = vst [vmem:[#allocation34_spill] sm:$0xff] %v7345_v52  ;;  %9017 = vst [vmem:[#allocation35_spill] sm:$0xff] %v7351_v55  ;;  %v7355_v56 = vsel %vm614_vm3, -1e+09, %v2199_v37  ;;  %v1907_v63 = vpop.f32.mrb[14].mxu0  ;;  %v6096_v0 = vpop.f32.mrb[11].mxu1  ;;  %v7369_v6 = vrot.slane %v2688_v26, %v7271_v57  ;;  %v7372_v51 = vrot.slane %v2689_v35, %v7271_v57  ;;  %v2217_v7 = vcombine.high %v2209_v2, %v2209_v2 }
 0x44f   : > { %9018 = vst [vmem:[#allocation36_spill] sm:$0xff] %v7355_v56  ;;  %v6102_v60 = vpop.f32.mrb[15].mxu0  ;;  %v7366_v5 = vsel %vm614_vm3, -1e+09, %v2152_v29  ;;  %v2225_v8 = vrot.slane %v2209_v2, %v7271_v57  ;;  %v2265_v10 = vrot.slane %v2251_v41, %v7271_v57  ;;  %v2266_v11 = vcombine.high %v2258_v3, %v2258_v3 }
 0x450   : > { %9019 = vst [vmem:[#allocation37_spill] sm:$0xff] %v7366_v5  ;;  %v2218_v12 = vcombine.high %v2216_v4, %v2216_v4  ;;  %v2232_v13 = vrot.slane %v2216_v4, %v7271_v57  ;;  %v2274_v59 = vrot.slane %v2258_v3, %v7271_v57  ;;  %v2691_v14 = vcombine.low %v7318_v34, %v7366_v5 }
 0x451   : > { %v2239_v15 = vrot.slane %v2217_v7, %v7271_v57  ;;  %v2247_v17 = vcombine.high %v2225_v8, %v2225_v8  ;;  %v7383_v18 = vsel %vm614_vm3, -1e+09, %v2225_v8  ;;  %v2267_v19 = vcombine.high %v2265_v10, %v2265_v10 }
 0x452   : > { %v7386_v20 = vrot.slane %v2218_v12, %v7271_v57  ;;  %v2248_v21 = vcombine.high %v2232_v13, %v2232_v13  ;;  %v7390_v22 = vsel %vm614_vm3, -1e+09, %v2232_v13  ;;  %v2281_v26 = vrot.slane %v2265_v10, %v7271_v57 }
 0x453   : > { %9020 = vst [vmem:[#allocation38_spill] sm:$0xff] %v7390_v22  ;;  %v2249_v28 = vcombine.high %v2239_v15, %v2239_v15  ;;  %v7395_v29 = vsel %vm614_vm3, -1e+09, %v2239_v15  ;;  %v7399_v35 = vsel %vm614_vm3, -1e+09, %v2247_v17  ;;  %v2288_v36 = vrot.slane %v2266_v11, %v7271_v57  ;;  %v1950_v46 = vpop.f32.mrb[12].mxu1 }
 0x454   : > { %v7407_v38 = vsel %vm614_vm3, -1e+09, %v7386_v20  ;;  %v7411_v39 = vsel %vm614_vm3, -1e+09, %v2248_v21  ;;  %v1996_v48 = vpop.f32.mrb[16].mxu0  ;;  %v7422_v0 = vrot.slane %v2267_v19, %v7271_v57  ;;  %v2296_v2 = vcombine.high %v2274_v59, %v2274_v59  ;;  %v6107_v41 = vpop.f32.mrb[13].mxu1 }
 0x455   : > { %9021 = vst [vmem:[#allocation39_spill] sm:$0xff] %v7407_v38  ;;  %9022 = vst [vmem:[#allocation40_spill] sm:$0xff] %v7411_v39  ;;  %v7417_v62 = vsel %vm614_vm3, -1e+09, %v2249_v28  ;;  %v6113_v3 = vpop.f32.mrb[17].mxu0  ;;  %v2297_v4 = vcombine.high %v2281_v26, %v2281_v26  ;;  %v2298_v7 = vcombine.high %v2288_v36, %v2288_v36  ;;  %v1953_v10 = vpop.f32.mrb[14].mxu1  ;;  %v2307_v41 = vrot.slane %v1950_v46, %v7271_v57 }
 0x456   : > { %9023 = vst [vmem:[#allocation41_spill] sm:$0xff] %v7417_v62  ;;  %v7428_v8 = vsel %vm614_vm3, -1e+09, %v2274_v59  ;;  %v1999_v11 = vpop.f32.mrb[18].mxu0  ;;  %v7434_v13 = vsel %vm614_vm3, -1e+09, %v2288_v36  ;;  %v2349_v10 = vcombine.high %v1996_v48, %v1996_v48  ;;  %v2719_v9 = vrot.slane %v2691_v14, %v7271_v57 }
 0x457   : > { %9024 = vst [vmem:[#allocation42_spill] sm:$0xff] %v7434_v13  ;;  %v7438_v15 = vsel %vm614_vm3, -1e+09, %v2296_v2  ;;  %v7442_v17 = vsel %vm614_vm3, -1e+09, %v2281_v26  ;;  %v2300_v2 = vcombine.high %v1950_v46, %v1950_v46  ;;  %v6108_v3 = vpop.f32.mrb[15].mxu1  ;;  %v2356_v11 = vrot.slane %v1996_v48, %v7271_v57 }
 0x458   : > { %v7446_v59 = vsel %vm614_vm3, -1e+09, %v2298_v7  ;;  %v7451_v19 = vsel %vm614_vm3, -1e+09, %v7422_v0  ;;  %v7455_v21 = vsel %vm614_vm3, -1e+09, %v2297_v4  ;;  %v2712_v4 = vrot.slane %v2690_v32, %v7271_v57 }
 0x459   : > { %v6114_v7 = vpop.f32.mrb[19].mxu0  ;;  %v2314_v26 = vrot.slane %v2300_v2, %v7271_v57  ;;  %v2315_v28 = vcombine.high %v2307_v41, %v2307_v41  ;;  %v2323_v36 = vrot.slane %v2307_v41, %v7271_v57  ;;  %v2720_v46 = vcombine.low %v7369_v6, %v7372_v51 }
 0x45a   : > { %v2363_v3 = vrot.slane %v2349_v10, %v7271_v57  ;;  %v2364_v7 = vcombine.high %v2356_v11, %v2356_v11  ;;  %v2372_v48 = vrot.slane %v2356_v11, %v7271_v57  ;;  %v2721_v12 = vcombine.low %v2712_v4, %v2719_v9 }
 0x45b   : > { %v2042_v63 = vpop.f32.mrb[16].mxu1  ;;  %v7476_v60 = vpop.f32.mrb[20].mxu0  ;;  %v2316_v32 = vcombine.high %v2314_v26, %v2314_v26  ;;  %v2330_v14 = vrot.slane %v2314_v26, %v7271_v57  ;;  %v2337_v2 = vrot.slane %v2315_v28, %v7271_v57  ;;  %v2345_v40 = vcombine.high %v2323_v36, %v2323_v36 }
 0x45c   : > { %v6119_v37 = vpop.f32.mrb[17].mxu1  ;;  %v6125_v41 = vpop.f32.mrb[21].mxu0  ;;  %v7482_v6 = vsel %vm614_vm3, -1e+09, %v2323_v36  ;;  %v2365_v51 = vcombine.high %v2363_v3, %v2363_v3  ;;  %v2379_v10 = vrot.slane %v2363_v3, %v7271_v57  ;;  %v2386_v9 = vrot.slane %v2364_v7, %v7271_v57 }
 0x45d   : > { %v2045_v11 = vpop.f32.mrb[18].mxu1  ;;  %v2091_v4 = vpop.f32.mrb[22].mxu0  ;;  %v7487_v61 = vrot.slane %v2316_v32, %v7271_v57  ;;  %v2346_v26 = vcombine.high %v2330_v14, %v2330_v14  ;;  %v2347_v1 = vcombine.high %v2337_v2, %v2337_v2  ;;  %v7491_v37 = vsel %vm614_vm3, -1e+09, %v2337_v2 }
 0x45e   : > { %v6120_v28 = vpop.f32.mrb[19].mxu1  ;;  %v6126_v36 = vpop.f32.mrb[23].mxu0  ;;  %v7495_v41 = vsel %vm614_vm3, -1e+09, %v2345_v40  ;;  %v7499_v3 = vsel %vm614_vm3, -1e+09, %v2330_v14  ;;  %v7504_v32 = vrot.slane %v2365_v51, %v7271_v57  ;;  %v2396_v7 = vcombine.high %v2386_v9, %v2386_v9 }
 0x45f   : > { %v7510_v11 = vsel %vm614_vm3, -1e+09, %v2347_v1  ;;  %v7515_v40 = vsel %vm614_vm3, -1e+09, %v7487_v61  ;;  %v7519_v14 = vsel %vm614_vm3, -1e+09, %v2346_v26  ;;  %v2394_v28 = vcombine.high %v2372_v48, %v2372_v48 }
 0x460   : > { %9025 = vst [vmem:[#allocation43_spill] sm:$0xff] %v7510_v11  ;;  %9026 = vst [vmem:[#allocation44_spill] sm:$0xff] %v7515_v40  ;;  %v2395_v36 = vcombine.high %v2379_v10, %v2379_v10  ;;  %v7529_v2 = vsel %vm614_vm3, -1e+09, %v2372_v48  ;;  %v7533_v26 = vsel %vm614_vm3, -1e+09, %v2386_v9  ;;  %v2728_v53 = vrot.slane %v2720_v46, %v7271_v57 }
 0x461   : > { %9027 = vst [vmem:[#allocation45_spill] sm:$0xff] %v7519_v14  ;;  %v7537_v51 = vsel %vm614_vm3, -1e+09, %v2394_v28  ;;  %v7541_v4 = vsel %vm614_vm3, -1e+09, %v2379_v10  ;;  %v2735_v54 = vrot.slane %v2721_v12, %v7271_v57  ;;  %v9028_v48 = vcombine.high %v7306_v27, %v7306_v27 }
 0x462   : > { %v7546_v1 = vsel %vm614_vm3, -1e+09, %v7504_v32  ;;  %v7552_v9 = vsel %vm614_vm3, -1e+09, %v2396_v7  ;;  %v7556_v28 = vsel %vm614_vm3, -1e+09, %v2395_v36  ;;  %v9030_v36 = vcombine.low %v7328_v44, %v7332_v45 }
 0x463   : > { %v7569_v7 = vsel %vm614_vm3, -1e+09, %v9028_v48  ;;  %v9031_v10 = vcombine.low %v7336_v49, %v7351_v55  ;;  %v9032_v27 = vcombine.low %v7340_v50, %v7345_v52  ;;  %v2398_v48 = vcombine.high %v2042_v63, %v2042_v63 }
 0x464   : > { %9029 = vst [vmem:[#allocation46_spill] sm:$0xff] %v7569_v7  ;;  %v2747_v47 = vrot.slane %v9030_v36, %v7271_v57  ;;  %v2740_v46 = vcombine.low %v7355_v56, %v7569_v7  ;;  %v2736_v5 = vcombine.low %v2728_v53, %v2735_v54  ;;  %v2405_v34 = vrot.slane %v2042_v63, %v7271_v57 }
 0x465   : > { %v2754_v12 = vrot.slane %v9031_v10, %v7271_v57  ;;  %v2761_v42 = vrot.slane %v9032_v27, %v7271_v57  ;;  %v2447_v36 = vcombine.high %v7476_v60, %v7476_v60  ;;  %v2454_v7 = vrot.slane %v7476_v60, %v7271_v57 }
 0x466   : > { %v2768_v56 = vrot.slane %v2740_v46, %v7271_v57  ;;  %v2412_v10 = vrot.slane %v2398_v48, %v7271_v57  ;;  %v9033_v55 = vcombine.high %v7386_v20, %v7386_v20  ;;  %v3089_v54 = vsel %vm3088_vm4, %v2736_v5, -inf }
 0x467   : > { %v2769_v45 = vcombine.low %v2747_v47, %v2754_v12  ;;  %v2413_v53 = vcombine.high %v2405_v34, %v2405_v34  ;;  %v2421_v63 = vrot.slane %v2405_v34, %v7271_v57  ;;  %v2461_v52 = vrot.slane %v2447_v36, %v7271_v57  ;;  %3090 = vmax.xlane.f32.xlu1 %v3089_v54 }
 0x468   : > { %v7597_v27 = vsel %vm614_vm3, -1e+09, %v9033_v55  ;;  %v2770_v60 = vcombine.low %v2761_v42, %v2768_v56  ;;  %v2414_v46 = vcombine.high %v2412_v10, %v2412_v10  ;;  %v2428_v12 = vrot.slane %v2412_v10, %v7271_v57 }
 0x469   : > { %9034 = vst [vmem:[#allocation47_spill] sm:$0xff] %v7597_v27  ;;  %v2777_v47 = vrot.slane %v2769_v45, %v7271_v57  ;;  %v2435_v20 = vrot.slane %v2413_v53, %v7271_v57  ;;  %v2443_v48 = vcombine.high %v2421_v63, %v2421_v63  ;;  %v7607_v55 = vsel %vm614_vm3, -1e+09, %v2421_v63 }
 0x46a   : > { %v2462_v5 = vcombine.high %v2454_v7, %v2454_v7  ;;  %v2784_v50 = vrot.slane %v2770_v60, %v7271_v57  ;;  %v7611_v34 = vrot.slane %v2414_v46, %v7271_v57  ;;  %v2444_v36 = vcombine.high %v2428_v12, %v2428_v12 }
 0x46b   : > { %v7615_v42 = vsel %vm614_vm3, -1e+09, %v2428_v12  ;;  %v2445_v45 = vcombine.high %v2435_v20, %v2435_v20  ;;  %v7619_v56 = vsel %vm614_vm3, -1e+09, %v2435_v20  ;;  %v7623_v10 = vsel %vm614_vm3, -1e+09, %v2443_v48 }
 0x46c   : > { %9035 = vst [vmem:[#allocation48_spill] sm:$0xff] %v7615_v42  ;;  %v2463_v54 = vcombine.high %v2461_v52, %v2461_v52  ;;  %v2785_v53 = vcombine.low %v2777_v47, %v2784_v50  ;;  %v7630_v60 = vsel %vm614_vm3, -1e+09, %v7611_v34  ;;  %v7634_v46 = vsel %vm614_vm3, -1e+09, %v2444_v36 }
 0x46d   : > { %9036 = vst [vmem:[#allocation49_spill] sm:$0xff] %v7630_v60  ;;  %9037 = vst [vmem:[#allocation50_spill] sm:$0xff] %v7634_v46  ;;  %v7638_v12 = vsel %vm614_vm3, -1e+09, %v2445_v45  ;;  %v2470_v47 = vrot.slane %v2454_v7, %v7271_v57  ;;  %v2477_v36 = vrot.slane %v2461_v52, %v7271_v57  ;;  %v2484_v49 = vrot.slane %v2462_v5, %v7271_v57 }
 0x46e   : > { %9038 = vst [vmem:[#allocation51_spill] sm:$0xff] %v7638_v12  ;;  %v3092_v48 = vsel %vm3088_vm4, %v2785_v53, -inf  ;;  %v7651_v45 = vrot.slane %v2463_v54, %v7271_v57  ;;  %v2789_v7 = vcombine.low %v7411_v39, %v7597_v27  ;;  %v9046_v27 = vcombine.low %v7383_v18, %v7395_v29 }
 0x46f   : > { %3093 = vmax.xlane.f32.xlu0 %v3092_v48  ;;  %v2492_v44 = vcombine.high %v2470_v47, %v2470_v47  ;;  %v7655_v20 = vsel %vm614_vm3, -1e+09, %v2470_v47  ;;  %v2493_v53 = vcombine.high %v2477_v36, %v2477_v36  ;;  %v2494_v50 = vcombine.high %v2484_v49, %v2484_v49 }
 0x470   : > { %9039 = vst [vmem:[#allocation52_spill] sm:$0xff] %v7655_v20  ;;  %v7661_v63 = vsel %vm614_vm3, -1e+09, %v2484_v49  ;;  %v7665_v52 = vsel %vm614_vm3, -1e+09, %v2477_v36  ;;  %v2495_v5 = vcombine.high %v7651_v45, %v7651_v45 }
 0x471   : > { %9040 = vst [vmem:[#allocation53_spill] sm:$0xff] %v7661_v63  ;;  %9041 = vst [vmem:[#allocation54_spill] sm:$0xff] %v7665_v52  ;;  %v7671_v54 = vsel %vm614_vm3, -1e+09, %v2492_v44  ;;  %v7676_v47 = vsel %vm614_vm3, -1e+09, %v7651_v45  ;;  %v3031_v49 = vcombine.low %v7655_v20, %v7661_v63  ;;  %v2796_v45 = vrot.slane %v9046_v27, %v7271_v57 }
 0x472   : > { %9042 = vst [vmem:[#allocation55_spill] sm:$0xff] %v7671_v54  ;;  %9043 = vst [vmem:[#allocation56_spill] sm:$0xff] %v7676_v47  ;;  %v7682_v48 = vsel %vm614_vm3, -1e+09, %v2494_v50  ;;  %v7686_v36 = vsel %vm614_vm3, -1e+09, %v2493_v53  ;;  %v3033_v44 = vcombine.low %v7665_v52, %v7676_v47  ;;  %v9047_v50 = vcombine.low %v7399_v35, %v7417_v62 }
 0x473   : > { %9044 = vst [vmem:[#allocation57_spill] sm:$0xff] %v7682_v48  ;;  %9045 = vst [vmem:[#allocation58_spill] sm:$0xff] %v7686_v36  ;;  %v3032_v39 = vcombine.low %v7671_v54, %v7682_v48  ;;  %v9048_v53 = vcombine.low %v7390_v22, %v7407_v38  ;;  %v2817_v47 = vrot.slane %v2789_v7, %v7271_v57 }
 0x474   : > { %v2803_v63 = vrot.slane %v9047_v50, %v7271_v57  ;;  %v9049_v52 = vcombine.high %v7422_v0, %v7422_v0  ;;  %v9050_v48 = vcombine.low %v7428_v8, %v7434_v13  ;;  %v9051_v50 = vcombine.low %v7438_v15, %v7446_v59 }
 0x475   : > { %v2810_v20 = vrot.slane %v9048_v53, %v7271_v57  ;;  %v9052_v7 = vcombine.low %v7442_v17, %v7451_v19  ;;  %v9053_v62 = vcombine.high %v7487_v61, %v7487_v61 }
 0x476   : > { %v7710_v27 = vsel %vm614_vm3, -1e+09, %v9049_v52  ;;  %v2845_v54 = vrot.slane %v9050_v48, %v7271_v57  ;;  %v2852_v38 = vrot.slane %v9051_v50, %v7271_v57  ;;  %v2818_v0 = vcombine.low %v2796_v45, %v2803_v63 }
 0x477   : > { %v2859_v53 = vrot.slane %v9052_v7, %v7271_v57  ;;  %v2819_v22 = vcombine.low %v2810_v20, %v2817_v47  ;;  %v2838_v52 = vcombine.low %v7455_v21, %v7710_v27  ;;  %v7731_v48 = vsel %vm614_vm3, -1e+09, %v9053_v62 }
 0x478   : > { %9054 = vst [vmem:[#allocation59_spill] sm:$0xff] %v7731_v48  ;;  %v2867_v13 = vcombine.low %v2845_v54, %v2852_v38  ;;  %v2887_v50 = vcombine.low %v7519_v14, %v7731_v48  ;;  %v9055_v7 = vcombine.low %v7482_v6, %v7491_v37  ;;  %v9056_v20 = vcombine.low %v7495_v41, %v7510_v11 }
 0x479   : > { %v2826_v61 = vrot.slane %v2818_v0, %v7271_v57  ;;  %v2833_v45 = vrot.slane %v2819_v22, %v7271_v57  ;;  %v2866_v62 = vrot.slane %v2838_v52, %v7271_v57  ;;  %v9057_v38 = vcombine.low %v7499_v3, %v7515_v40 }
 0x47a   : > { %v2894_v63 = vrot.slane %v9055_v7, %v7271_v57  ;;  %v2901_v47 = vrot.slane %v9056_v20, %v7271_v57  ;;  %v2875_v48 = vrot.slane %v2867_v13, %v7271_v57  ;;  %v2915_v7 = vrot.slane %v2887_v50, %v7271_v57 }
 0x47b   : > { %v2908_v54 = vrot.slane %v9057_v38, %v7271_v57  ;;  %v9058_v11 = vcombine.high %v7504_v32, %v7504_v32  ;;  %v2834_v22 = vcombine.low %v2826_v61, %v2833_v45  ;;  %v2868_v20 = vcombine.low %v2859_v53, %v2866_v62 }
 0x47c   : > { %v2916_v14 = vcombine.low %v2894_v63, %v2901_v47  ;;  %v9059_v38 = vcombine.low %v7529_v2, %v7533_v26  ;;  %v9060_v32 = vcombine.low %v7537_v51, %v7552_v9  ;;  %v9062_v62 = vcombine.high %v7611_v34, %v7611_v34 }
 0x47d   : > { %v7757_v0 = vsel %vm614_vm3, -1e+09, %v9058_v11  ;;  %v2917_v40 = vcombine.low %v2908_v54, %v2915_v7  ;;  %v9061_v11 = vcombine.low %v7541_v4, %v7546_v1  ;;  %v3095_v47 = vsel %vm3088_vm4, %v2834_v22, -inf }
 0x47e   : > { %v2936_v52 = vcombine.low %v7556_v28, %v7757_v0  ;;  %v2943_v13 = vrot.slane %v9059_v38, %v7271_v57  ;;  %v2924_v50 = vrot.slane %v2916_v14, %v7271_v57  ;;  %v2950_v63 = vrot.slane %v9060_v32, %v7271_v57  ;;  %3096 = vmax.xlane.f32.xlu0 %v3095_v47 }
 0x47f   : > { %v2957_v53 = vrot.slane %v9061_v11, %v7271_v57  ;;  %v2882_v61 = vrot.slane %v2868_v20, %v7271_v57  ;;  %v7782_v14 = vsel %vm614_vm3, -1e+09, %v9062_v62  ;;  %v2931_v54 = vrot.slane %v2917_v40, %v7271_v57 }
 0x480   : > { %v2964_v45 = vrot.slane %v2936_v52, %v7271_v57  ;;  %9063 = vst [vmem:[#allocation60_spill] sm:$0xff] %v7782_v14  ;;  %v2965_v7 = vcombine.low %v2943_v13, %v2950_v63  ;;  %v2985_v38 = vcombine.low %v7634_v46, %v7782_v14  ;;  %v9064_v22 = vcombine.low %v7607_v55, %v7619_v56 }
 0x481   : > { %v2883_v52 = vcombine.low %v2875_v48, %v2882_v61  ;;  %v9065_v34 = vcombine.low %v7623_v10, %v7638_v12  ;;  %v9066_v40 = vcombine.low %v7615_v42, %v7630_v60  ;;  %v2932_v63 = vcombine.low %v2924_v50, %v2931_v54  ;;  %v9075_v60 = vld [vmem:[#allocation34_spill] sm:$0xff]  ;;  %v9076_v12 = vld [vmem:[#allocation36_spill] sm:$0xff] }
 0x482   : > { %v2992_v20 = vrot.slane %v9064_v22, %v7271_v57  ;;  %v2966_v32 = vcombine.low %v2957_v53, %v2964_v45  ;;  %v2973_v47 = vrot.slane %v2965_v7, %v7271_v57  ;;  %v3013_v62 = vrot.slane %v2985_v38, %v7271_v57 }
 0x483   : > { %v2999_v11 = vrot.slane %v9065_v34, %v7271_v57  ;;  %v3006_v13 = vrot.slane %v9066_v40, %v7271_v57  ;;  %v7803_v22 = vsel %vm614_vm3, -1e+09, %v2495_v5  ;;  %v3098_v48 = vsel %vm3088_vm4, %v2883_v52, -inf }
 0x484   : > { %9067 = vst [vmem:[#allocation61_spill] sm:$0xff] %v7803_v22  ;;  %v2980_v53 = vrot.slane %v2966_v32, %v7271_v57  ;;  %v3034_v45 = vcombine.low %v7686_v36, %v7803_v22  ;;  %3099 = vmax.xlane.f32.xlu1 %v3098_v48  ;;  %v3101_v34 = vsel %vm3088_vm4, %v2932_v63, -inf  ;;  %v3041_v54 = vrot.slane %v3031_v49, %v7271_v57  ;;  %v9068_v22 = vld [vmem:[#allocation29_spill] sm:$0xff] }
 0x485   : > { %v3014_v61 = vcombine.low %v2992_v20, %v2999_v11  ;;  %v3015_v50 = vcombine.low %v3006_v13, %v3013_v62  ;;  %v3048_v7 = vrot.slane %v3032_v39, %v7271_v57  ;;  %3102 = vmax.xlane.f32.xlu0 %v3101_v34  ;;  %v3055_v5 = vrot.slane %v3033_v44, %v7271_v57 }
 0x486   : > { %v2981_v58 = vcombine.low %v2973_v47, %v2980_v53  ;;  %v3062_v38 = vrot.slane %v3034_v45, %v7271_v57  ;;  %v7832_v62 = vsub.s32 0, %v7128_v43  ;;  %v7835_v48 = vsub.s32 1, %v7128_v43 }
 0x487   : > { %v3022_v52 = vrot.slane %v3014_v61, %v7271_v57  ;;  %v3029_v20 = vrot.slane %v3015_v50, %v7271_v57  ;;  %v3063_v32 = vcombine.low %v3041_v54, %v3048_v7  ;;  %v7838_v61 = vsub.s32 2, %v7128_v43 }
 0x488   : > { %v3104_v11 = vsel %vm3088_vm4, %v2981_v58, -inf  ;;  %v3064_v40 = vcombine.low %v3055_v5, %v3062_v38  ;;  %v7841_v45 = vsub.s32 3, %v7128_v43  ;;  %v7844_v34 = vsub.s32 4, %v7128_v43 }
 0x489   : > { %3105 = vmax.xlane.f32.xlu1 %v3104_v11  ;;  %v3030_v13 = vcombine.low %v3022_v52, %v3029_v20  ;;  %v3071_v49 = vrot.slane %v3063_v32, %v7271_v57  ;;  %v7847_v50 = vsub.s32 5, %v7128_v43  ;;  %v7850_v54 = vsub.s32 6, %v7128_v43 }
 0x48a   : > { %v3078_v39 = vrot.slane %v3064_v40, %v7271_v57  ;;  %v7856_v38 = vsub.s32 7, %v7128_v43  ;;  %vm5517_vm3 = vcmask 195584  }
 0x48b   : > { %v3107_v63 = vsel %vm3088_vm4, %v3030_v13, -inf }
 0x48c   : > { %3108 = vmax.xlane.f32.xlu0 %v3107_v63  ;;  %v3079_v44 = vcombine.low %v3071_v49, %v3078_v39 }
 0x48e   : > { %v3110_v47 = vsel %vm3088_vm4, %v3079_v44, -inf }
 0x48f   : > { %3111 = vmax.xlane.f32.xlu1 %v3110_v47 }
 0x4a0   : > { %1427 = vrot.lane.b32.xlu1 %v7109_v33, %s6748_s19 }
 0x4a2   : > { %1424 = vrot.lane.b32.xlu0 %v7109_v33, %s6746_s3  ;;  %s6761_s3 = smov 24  }
 0x4a4   : > { %1430 = vrot.lane.b32.xlu1 %v7109_v33, %s6745_s17  ;;  %s6760_s17 = smov 28  }
 0x4a6   : > { %1433 = vrot.lane.b32.xlu0 %v7109_v33, %s6749_s16 }
 0x4a8   : > { %1436 = vrot.lane.b32.xlu1 %v7109_v33, %s6750_s26 }
 0x4f4   : > { %v3091_v53 = vpop.xlane.xlu1 %3090 }
 0x4f5   : > { %v3124_v7 = vrot.slane %v3091_v53, %v7832_v62  ;;  %v3128_v58 = vrot.slane %v3091_v53, %v7835_v48  ;;  %v3132_v5 = vrot.slane %v3091_v53, %v7838_v61  ;;  %v3136_v52 = vrot.slane %v3091_v53, %v7841_v45 }
 0x4f6   : > { %v3140_v20 = vrot.slane %v3091_v53, %v7844_v34  ;;  %v3144_v32 = vrot.slane %v3091_v53, %v7847_v50  ;;  %v3148_v11 = vrot.slane %v3091_v53, %v7850_v54  ;;  %v3152_v63 = vrot.slane %v3091_v53, %v7856_v38 }
 0x4f7   : > { %v3441_v40 = vsub.f32 %v7286_v16, %v3124_v7  ;;  %v3442_v13 = vsub.f32 %v7293_v23, %v3128_v58  ;;  %v3443_v49 = vsub.f32 %v7297_v24, %v3132_v5  ;;  %v3444_v43 = vsub.f32 %v7310_v30, %v3136_v52  ;;  %v9069_v7 = vld [vmem:[#allocation37_spill] sm:$0xff] }
 0x4f8   : > { %v3445_v44 = vsub.f32 %v7301_v25, %v3140_v20  ;;  %v3446_v47 = vsub.f32 %v7314_v31, %v3144_v32  ;;  %v3447_v36 = vsub.f32 %v9068_v22, %v3148_v11  ;;  %v3448_v58 = vsub.f32 %v9069_v7, %v3152_v63  ;;  %v9070_v32 = vld [vmem:[#allocation30_spill] sm:$0xff]  ;;  %v9072_v63 = vld [vmem:[#allocation32_spill] sm:$0xff]  ;;  %v9074_v7 = vld [vmem:[#allocation33_spill] sm:$0xff] }
 0x4f9   : > { %v3505_v57 = vmul.f32 1.442695, %v3441_v40  ;;  %v3507_v14 = vmul.f32 1.442695, %v3442_v13  ;;  %v3509_v24 = vmul.f32 1.442695, %v3443_v49 }
 0x4fa   : > { %v3511_v53 = vmul.f32 1.442695, %v3444_v43  ;;  %v3513_v5 = vmul.f32 1.442695, %v3445_v44  ;;  %v3515_v30 = vmul.f32 1.442695, %v3446_v47 }
 0x4fb   : > { %6340 = vpow2.f32 %v3505_v57  ;;  %v3517_v22 = vmul.f32 1.442695, %v3447_v36  ;;  %v9071_v13 = vld [vmem:[#allocation31_spill] sm:$0xff]  ;;  %v3519_v46 = vmul.f32 1.442695, %v3448_v58 }
 0x4fc   : > { %v3094_v39 = vpop.xlane.xlu0 %3093  ;;  %6342 = vpow2.f32 %v3507_v14  ;;  %v9073_v44 = vld [vmem:[#allocation35_spill] sm:$0xff] }
 0x4fd   : > { %v3156_v33 = vrot.slane %v3094_v39, %v7832_v62  ;;  %v3160_v16 = vrot.slane %v3094_v39, %v7835_v48  ;;  %v3164_v23 = vrot.slane %v3094_v39, %v7838_v61  ;;  %v3168_v25 = vrot.slane %v3094_v39, %v7841_v45 }
 0x4fe   : > { %v3172_v31 = vrot.slane %v3094_v39, %v7844_v34  ;;  %v3176_v52 = vrot.slane %v3094_v39, %v7847_v50  ;;  %v3180_v20 = vrot.slane %v3094_v39, %v7850_v54  ;;  %v3184_v40 = vrot.slane %v3094_v39, %v7856_v38  ;;  %v9077_v39 = vld [vmem:[#allocation46_spill] sm:$0xff] }
 0x4ff   : > { %v3449_v11 = vsub.f32 %v9070_v32, %v3156_v33  ;;  %v3450_v49 = vsub.f32 %v9071_v13, %v3160_v16  ;;  %v3451_v43 = vsub.f32 %v9072_v63, %v3164_v23  ;;  %6344 = vpow2.f32 %v3509_v24 }
 0x500   : > { %6346 = vpow2.f32 %v3511_v53  ;;  %v3452_v47 = vsub.f32 %v9073_v44, %v3168_v25  ;;  %v3453_v57 = vsub.f32 %v9074_v7, %v3172_v31  ;;  %v3454_v42 = vsub.f32 %v9075_v60, %v3176_v52  ;;  %v9085_v7 = vld [vmem:[#allocation38_spill] sm:$0xff] }
 0x501   : > { %6348 = vpow2.f32 %v3513_v5  ;;  %v3455_v33 = vsub.f32 %v9076_v12, %v3180_v20  ;;  %v3521_v14 = vmul.f32 1.442695, %v3449_v11  ;;  %v3456_v32 = vsub.f32 %v9077_v39, %v3184_v40 }
 0x502   : > { %6350 = vpow2.f32 %v3515_v30  ;;  %v3523_v16 = vmul.f32 1.442695, %v3450_v49  ;;  %v7887_v23 = vmul.f32 1.442695, %v3451_v43  ;;  %v7895_v5 = vmul.f32 1.442695, %v3452_v47 }
 0x503   : > { %6352 = vpow2.f32 %v3517_v22  ;;  %v7898_v22 = vmul.f32 1.442695, %v3453_v57  ;;  %v7900_v52 = vmul.f32 1.442695, %v3454_v42  ;;  %v7905_v40 = vmul.f32 1.442695, %v3455_v33 }
 0x504   : > { %6354 = vpow2.f32 %v3519_v46  ;;  %v7907_v13 = vmul.f32 1.442695, %v3456_v32  ;;  %v9083_v43 = vld [vmem:[#allocation41_spill] sm:$0xff] }
 0x505   : > { %6356 = vpow2.f32 %v3521_v14  ;;  %v7902_v20 = vpop.eup %6340  ;;  %9078 = vst [vmem:[#allocation29_spill] sm:$0xff] %v7905_v40 }
 0x506   : > { %6358 = vpow2.f32 %v3523_v16  ;;  %9079 = vst [vmem:[#allocation37_spill] sm:$0xff] %v7907_v13  ;;  %v7909_v46 = vpop.eup %6342 }
 0x507   : > { %6360 = vpow2.f32 %v7887_v23 }
 0x508   : > { %6362 = vpow2.f32 %v7895_v5 }
 0x509   : > { %v7923_v47 = vpop.eup %6344  ;;  %6364 = vpow2.f32 %v7898_v22 }
 0x50a   : > { %v7933_v39 = vpop.eup %6346  ;;  %6366 = vpow2.f32 %v7900_v52 }
 0x50b   : > { %v3097_v36 = vpop.xlane.xlu0 %3096  ;;  %9089 = vst [vmem:[#allocation36_spill] sm:$0xff] %v7933_v39 }
 0x50c   : > { %v3188_v24 = vrot.slane %v3097_v36, %v7832_v62  ;;  %v3192_v53 = vrot.slane %v3097_v36, %v7835_v48  ;;  %v3196_v25 = vrot.slane %v3097_v36, %v7838_v61  ;;  %v3200_v58 = vrot.slane %v3097_v36, %v7841_v45 }
 0x50d   : > { %v3204_v60 = vrot.slane %v3097_v36, %v7844_v34  ;;  %v3208_v12 = vrot.slane %v3097_v36, %v7847_v50  ;;  %v3212_v30 = vrot.slane %v3097_v36, %v7850_v54  ;;  %v3216_v11 = vrot.slane %v3097_v36, %v7856_v38  ;;  %v9087_v36 = vld [vmem:[#allocation39_spill] sm:$0xff] }
 0x50e   : > { %v7912_v49 = vsub.f32 %v7383_v18, %v3188_v24  ;;  %v7915_v63 = vsub.f32 %v7395_v29, %v3192_v53  ;;  %v7918_v42 = vsub.f32 %v7399_v35, %v3196_v25  ;;  %v7921_v44 = vsub.f32 %v9083_v43, %v3200_v58  ;;  %v9090_v35 = vld [vmem:[#allocation40_spill] sm:$0xff]  ;;  %v7941_v58 = vpop.eup %6348 }
 0x50f   : > { %v7926_v57 = vsub.f32 %v9085_v7, %v3204_v60  ;;  %v7929_v33 = vsub.f32 %v9087_v36, %v3208_v12  ;;  %v7936_v32 = vsub.f32 %v9090_v35, %v3212_v30  ;;  %9092 = vst [vmem:[#allocation41_spill] sm:$0xff] %v7941_v58  ;;  %v9093_v60 = vld [vmem:[#allocation47_spill] sm:$0xff]  ;;  %v7949_v30 = vpop.eup %6350 }
 0x510   : > { %9080 = vst [vmem:[#allocation30_spill] sm:$0xff] %v7912_v49  ;;  %9081 = vst [vmem:[#allocation31_spill] sm:$0xff] %v7915_v63  ;;  %v7944_v12 = vsub.f32 %v9093_v60, %v3216_v11  ;;  %v9097_v60 = vld [vmem:[#allocation42_spill] sm:$0xff] }
 0x511   : > { %v3100_v31 = vpop.xlane.xlu1 %3099  ;;  %9082 = vst [vmem:[#allocation32_spill] sm:$0xff] %v7918_v42  ;;  %9084 = vst [vmem:[#allocation35_spill] sm:$0xff] %v7921_v44  ;;  %v7955_v44 = vpop.eup %6352 }
 0x512   : > { %9086 = vst [vmem:[#allocation33_spill] sm:$0xff] %v7926_v57  ;;  %9088 = vst [vmem:[#allocation34_spill] sm:$0xff] %v7929_v33  ;;  %v3220_v18 = vrot.slane %v3100_v31, %v7832_v62  ;;  %v3224_v14 = vrot.slane %v3100_v31, %v7835_v48  ;;  %v3103_v29 = vpop.xlane.xlu0 %3102  ;;  %v3228_v16 = vrot.slane %v3100_v31, %v7838_v61 }
 0x513   : > { %9091 = vst [vmem:[#allocation46_spill] sm:$0xff] %v7936_v32  ;;  %v3232_v24 = vrot.slane %v3100_v31, %v7841_v45  ;;  %v3236_v53 = vrot.slane %v3100_v31, %v7844_v34  ;;  %9094 = vst [vmem:[#allocation38_spill] sm:$0xff] %v7944_v12  ;;  %v3240_v43 = vrot.slane %v3100_v31, %v7847_v50 }
 0x514   : > { %v3244_v7 = vrot.slane %v3100_v31, %v7850_v54  ;;  %v3248_v36 = vrot.slane %v3100_v31, %v7856_v38  ;;  %9095 = vst [vmem:[#allocation39_spill] sm:$0xff] %v7949_v30  ;;  %v3252_v35 = vrot.slane %v3103_v29, %v7832_v62  ;;  %v3256_v32 = vrot.slane %v3103_v29, %v7835_v48 }
 0x515   : > { %v3260_v33 = vrot.slane %v3103_v29, %v7838_v61  ;;  %v3264_v57 = vrot.slane %v3103_v29, %v7841_v45  ;;  %9096 = vst [vmem:[#allocation40_spill] sm:$0xff] %v7955_v44  ;;  %v7958_v11 = vsub.f32 %v7428_v8, %v3220_v18  ;;  %v7961_v12 = vsub.f32 %v9097_v60, %v3224_v14  ;;  %v7977_v18 = vpop.eup %6354 }
 0x516   : > { %v3106_v25 = vpop.xlane.xlu1 %3105  ;;  %v3268_v31 = vrot.slane %v3103_v29, %v7844_v34  ;;  %v3272_v42 = vrot.slane %v3103_v29, %v7847_v50  ;;  %v7966_v63 = vsub.f32 %v7438_v15, %v3228_v16  ;;  %v7969_v13 = vsub.f32 %v7446_v59, %v3232_v24  ;;  %9098 = vst [vmem:[#allocation47_spill] sm:$0xff] %v7977_v18  ;;  %v7989_v16 = vpop.eup %6356 }
 0x517   : > { %v7972_v40 = vsub.f32 %v7442_v17, %v3236_v53  ;;  %v3276_v49 = vrot.slane %v3103_v29, %v7850_v54  ;;  %v7980_v14 = vsub.f32 %v7451_v19, %v3240_v43  ;;  %v7983_v60 = vsub.f32 %v7455_v21, %v3244_v7  ;;  %9099 = vst [vmem:[#allocation42_spill] sm:$0xff] %v7989_v16  ;;  %v9103_v19 = vld [vmem:[#allocation43_spill] sm:$0xff]  ;;  %v8003_v21 = vpop.eup %6358 }
 0x518   : > { %v7986_v15 = vsub.f32 %v7710_v27, %v3248_v36  ;;  %v3280_v59 = vrot.slane %v3103_v29, %v7856_v38  ;;  %v7992_v17 = vsub.f32 %v7482_v6, %v3252_v35  ;;  %v7995_v24 = vsub.f32 %v7491_v37, %v3256_v32  ;;  %9105 = vst [vmem:[#allocation65_spill] sm:$0xff] %v8003_v21  ;;  %v9107_v29 = vld [vmem:[#allocation44_spill] sm:$0xff]  ;;  %v9109_v32 = vld [vmem:[#allocation45_spill] sm:$0xff] }
 0x519   : > { %v7998_v53 = vsub.f32 %v7495_v41, %v3260_v33  ;;  %v8001_v43 = vsub.f32 %v9103_v19, %v3264_v57  ;;  %v8006_v27 = vsub.f32 %v7499_v3, %v3268_v31  ;;  %v8009_v7 = vsub.f32 %v9107_v29, %v3272_v42  ;;  %v3109_v37 = vpop.xlane.xlu0 %3108  ;;  %v9111_v19 = vld [vmem:[#allocation59_spill] sm:$0xff] }
 0x51a   : > { %9100 = vst [vmem:[#allocation62_spill] sm:$0xff] %v7992_v17  ;;  %9101 = vst [vmem:[#allocation63_spill] sm:$0xff] %v7995_v24  ;;  %v3284_v6 = vrot.slane %v3106_v25, %v7832_v62  ;;  %v3288_v36 = vrot.slane %v3106_v25, %v7835_v48  ;;  %v8014_v35 = vsub.f32 %v9109_v32, %v3276_v49 }
 0x51b   : > { %9102 = vst [vmem:[#allocation64_spill] sm:$0xff] %v7998_v53  ;;  %9104 = vst [vmem:[#allocation43_spill] sm:$0xff] %v8001_v43  ;;  %v3292_v41 = vrot.slane %v3106_v25, %v7838_v61  ;;  %v3296_v57 = vrot.slane %v3106_v25, %v7841_v45  ;;  %v3300_v33 = vrot.slane %v3106_v25, %v7844_v34 }
 0x51c   : > { %v7975_v8 = vpop.xlane.xlu1 %3111  ;;  %9106 = vst [vmem:[#allocation66_spill] sm:$0xff] %v8006_v27  ;;  %9108 = vst [vmem:[#allocation44_spill] sm:$0xff] %v8009_v7  ;;  %v8020_v3 = vsub.f32 %v9111_v19, %v3280_v59  ;;  %v3304_v42 = vrot.slane %v3106_v25, %v7847_v50  ;;  %v3308_v31 = vrot.slane %v3106_v25, %v7850_v54 }
 0x51d   : > { %9110 = vst [vmem:[#allocation45_spill] sm:$0xff] %v8014_v35  ;;  %v3312_v29 = vrot.slane %v3106_v25, %v7856_v38  ;;  %v3316_v7 = vrot.slane %v3109_v37, %v7832_v62  ;;  %v3320_v49 = vrot.slane %v3109_v37, %v7835_v48  ;;  %v3324_v32 = vrot.slane %v3109_v37, %v7838_v61 }
 0x51e   : > { %9112 = vst [vmem:[#allocation59_spill] sm:$0xff] %v8020_v3  ;;  %v3328_v35 = vrot.slane %v3109_v37, %v7841_v45  ;;  %v8030_v43 = vsub.f32 %v7529_v2, %v3284_v6  ;;  %v8033_v59 = vsub.f32 %v7533_v26, %v3288_v36  ;;  %v3332_v19 = vrot.slane %v3109_v37, %v7844_v34 }
 0x51f   : > { %v3336_v3 = vrot.slane %v3109_v37, %v7847_v50  ;;  %v8038_v25 = vsub.f32 %v7537_v51, %v3292_v41  ;;  %v8041_v53 = vsub.f32 %v7552_v9, %v3296_v57  ;;  %v8044_v24 = vsub.f32 %v7541_v4, %v3300_v33  ;;  %v9113_v41 = vld [vmem:[#allocation51_spill] sm:$0xff]  ;;  %v9114_v57 = vld [vmem:[#allocation48_spill] sm:$0xff]  ;;  %v9115_v33 = vld [vmem:[#allocation49_spill] sm:$0xff] }
 0x520   : > { %v1428_v27 = vpop.permute.xlu1 %1427  ;;  %v3340_v17 = vrot.slane %v3109_v37, %v7850_v54  ;;  %v8048_v2 = vsub.f32 %v7546_v1, %v3304_v42  ;;  %v8051_v26 = vsub.f32 %v7556_v28, %v3308_v31  ;;  %v8054_v6 = vsub.f32 %v7757_v0, %v3312_v29  ;;  %v9118_v29 = vld [vmem:[#allocation25_spill] sm:$0xff] }
 0x521   : > { %v3344_v51 = vrot.slane %v3109_v37, %v7856_v38  ;;  %v8058_v36 = vsub.f32 %v7607_v55, %v3316_v7  ;;  %v8061_v9 = vsub.f32 %v7619_v56, %v3320_v49  ;;  %v8064_v4 = vsub.f32 %v7623_v10, %v3324_v32  ;;  %v9116_v56 = vld [vmem:[#allocation50_spill] sm:$0xff]  ;;  %v9119_v32 = vld [vmem:[#allocation28_spill] sm:$0xff] }
 0x522   : > { %v8067_v1 = vsub.f32 %v9113_v41, %v3328_v35  ;;  %v8070_v28 = vsub.f32 %v9114_v57, %v3332_v19  ;;  %v8073_v0 = vsub.f32 %v9115_v33, %v3336_v3  ;;  %v3697_v37 = vcombine.low %v7902_v20, %v7909_v46  ;;  %v9117_v3 = vld [vmem:[#allocation60_spill] sm:$0xff] }
 0x523   : > { %v3698_v55 = vcombine.low %v7923_v47, %v7933_v39  ;;  %v8080_v7 = vsub.f32 %v9116_v56, %v3340_v17  ;;  %v3699_v10 = vcombine.low %v7941_v58, %v7949_v30  ;;  %v3700_v35 = vcombine.low %v7955_v44, %v7977_v18  ;;  %v1425_v17 = vpop.permute.xlu0 %1424 }
 0x524   : > { %v1431_v42 = vpop.permute.xlu1 %1430  ;;  %v8088_v31 = vsub.f32 %v9117_v3, %v3344_v51  ;;  %v1445_v49 = vcombine.low %v9118_v29, %v1428_v27  ;;  %v3707_v19 = vrot.slane %v3697_v37, %v9119_v32  ;;  %v1446_v57 = vcombine.high %v9118_v29, %v1428_v27  ;;  %v9121_v27 = vld [vmem:[#allocation26_spill] sm:$0xff] }
 0x525   : > { %v3714_v41 = vrot.slane %v3698_v55, %v9119_v32  ;;  %v3721_v33 = vrot.slane %v3699_v10, %v9119_v32  ;;  %v3728_v56 = vrot.slane %v3700_v35, %v9119_v32  ;;  %v1461_v51 = vcombine.low %v1425_v17, %v1431_v42  ;;  %v9120_v55 = vld [vmem:[#allocation30_spill] sm:$0xff]  ;;  %v9122_v35 = vld [vmem:[#allocation29_spill] sm:$0xff] }
 0x526   : > { %v1462_v3 = vcombine.high %v1425_v17, %v1431_v42  ;;  %v3348_v18 = vrot.slane %v7975_v8, %v7832_v62  ;;  %v3537_v44 = vmul.f32 1.442695, %v9120_v55  ;;  %v1453_v30 = vrot.slane %v1445_v49, %v9121_v27  ;;  %v8123_v49 = vpop.eup %6360 }
 0x527   : > { %v3729_v23 = vcombine.low %v3707_v19, %v3714_v41  ;;  %v3730_v37 = vcombine.low %v3721_v33, %v3728_v56  ;;  %6368 = vpow2.f32 %v9122_v35  ;;  %v1469_v5 = vrot.slane %v1461_v51, %v9121_v27  ;;  %v9123_v19 = vld [vmem:[#allocation37_spill] sm:$0xff]  ;;  %v9124_v41 = vld [vmem:[#allocation31_spill] sm:$0xff]  ;;  %v9125_v56 = vld [vmem:[#allocation32_spill] sm:$0xff]  ;;  %9127 = vst [vmem:[#allocation51_spill] sm:$0xff] %v8123_v49 }
 0x528   : > { %6370 = vpow2.f32 %v9123_v19  ;;  %v1476_v42 = vrot.slane %v1462_v3, %v9121_v27  ;;  %v3539_v17 = vmul.f32 1.442695, %v9124_v41  ;;  %v1460_v33 = vrot.slane %v1446_v57, %v9121_v27  ;;  %v9126_v41 = vld [vmem:[#allocation35_spill] sm:$0xff] }
 0x529   : > { %v3737_v10 = vrot.slane %v3729_v23, %v9119_v32  ;;  %v3744_v22 = vrot.slane %v3730_v37, %v9119_v32  ;;  %v3541_v23 = vmul.f32 1.442695, %v9125_v56  ;;  %v1509_v51 = vcombine.low %v1453_v30, %v1469_v5  ;;  %v9130_v37 = vld [vmem:[#allocation27_spill] sm:$0xff] }
 0x52a   : > { %v1510_v35 = vcombine.high %v1453_v30, %v1469_v5  ;;  %6372 = vpow2.f32 %v3537_v44  ;;  %v3746_v19 = vcombine.low %v7989_v16, %v8003_v21  ;;  %v3543_v52 = vmul.f32 1.442695, %v9126_v41  ;;  %v8133_v41 = vpop.eup %6362  ;;  %v9133_v44 = vld [vmem:[#allocation52_spill] sm:$0xff] }
 0x52b   : > { %v3745_v55 = vcombine.low %v3737_v10, %v3744_v22  ;;  %v1525_v56 = vcombine.low %v1460_v33, %v1476_v42  ;;  %v1526_v10 = vcombine.high %v1460_v33, %v1476_v42  ;;  %6374 = vpow2.f32 %v3539_v17  ;;  %v9128_v22 = vld [vmem:[#allocation33_spill] sm:$0xff]  ;;  %9129 = vst [vmem:[#allocation48_spill] sm:$0xff] %v8133_v41  ;;  %v9131_v42 = vld [vmem:[#allocation34_spill] sm:$0xff]  ;;  %v8138_v33 = vpop.eup %6364 }
 0x52c   : > { %v3545_v3 = vmul.f32 1.442695, %v9128_v22  ;;  %v1517_v21 = vrot.slane %v1509_v51, %v9130_v37  ;;  %6376 = vpow2.f32 %v3541_v23  ;;  %v3547_v17 = vmul.f32 1.442695, %v9131_v42  ;;  %9132 = vst [vmem:[#allocation49_spill] sm:$0xff] %v8138_v33  ;;  %v9134_v22 = vld [vmem:[#allocation46_spill] sm:$0xff]  ;;  %v8147_v58 = vpop.eup %6366 }
 0x52d   : > { %v4097_v57 = vsel %vm3088_vm4, %v3745_v55, 0.0  ;;  %v1524_v55 = vrot.slane %v1510_v35, %v9130_v37  ;;  %v8141_v16 = vsub.f32 %v9133_v44, %v3348_v18  ;;  %v3747_v5 = vcombine.low %v8123_v49, %v8133_v41  ;;  %9135 = vst [vmem:[#allocation50_spill] sm:$0xff] %v8147_v58  ;;  %v9136_v35 = vld [vmem:[#allocation38_spill] sm:$0xff] }
 0x52e   : > { %4098 = vadd.xlane.f32.xlu0 %v4097_v57  ;;  %v3756_v57 = vrot.slane %v3746_v19, %v9119_v32  ;;  %v3549_v30 = vmul.f32 1.442695, %v9134_v22  ;;  %v1533_v51 = vrot.slane %v1525_v56, %v9130_v37  ;;  %v1540_v23 = vrot.slane %v1526_v10, %v9130_v37 }
 0x52f   : > { %6378 = vpow2.f32 %v3543_v52  ;;  %v3551_v42 = vmul.f32 1.442695, %v9136_v35  ;;  %v3748_v18 = vcombine.low %v8138_v33, %v8147_v58  ;;  %v3763_v44 = vrot.slane %v3747_v5, %v9119_v32 }
 0x530   : > { %6380 = vpow2.f32 %v3545_v3  ;;  %v3553_v19 = vmul.f32 1.442695, %v7958_v11  ;;  %v5952_v41 = vcombine.low %v1517_v21, %v1524_v55  ;;  %v3555_v56 = vmul.f32 1.442695, %v7961_v12 }
 0x531   : > { %v8152_v39 = vpop.eup %6368  ;;  %6382 = vpow2.f32 %v3547_v17  ;;  %v3557_v52 = vmul.f32 1.442695, %v7966_v63  ;;  %v3770_v35 = vrot.slane %v3748_v18, %v9119_v32  ;;  %v3778_v49 = vcombine.low %v3756_v57, %v3763_v44  ;;  %v9139_v44 = vld [vmem:[#allocation63_spill] sm:$0xff] }
 0x532   : > { %v8158_v22 = vpop.eup %6370  ;;  %6384 = vpow2.f32 %v3549_v30  ;;  %v5954_v3 = vcombine.high %v1517_v21, %v1524_v55  ;;  %v5956_v5 = vcombine.low %v1533_v51, %v1540_v23  ;;  %v3559_v11 = vmul.f32 1.442695, %v7969_v13 }
 0x533   : > { %9137 = vst [vmem:[#allocation60_spill] sm:$0xff] %v8158_v22  ;;  %v3749_v10 = vcombine.low %v8152_v39, %v8158_v22  ;;  %6386 = vpow2.f32 %v3551_v42  ;;  %v5958_v33 = vcombine.high %v1533_v51, %v1540_v23  ;;  %v3561_v63 = vmul.f32 1.442695, %v7972_v40 }
 0x534   : > { %v8165_v58 = vpop.eup %6372  ;;  %6388 = vpow2.f32 %v3553_v19  ;;  %v8173_v22 = vrot.slane %v5952_v41, %v9121_v27  ;;  %v3563_v30 = vmul.f32 1.442695, %v7980_v14  ;;  %v3565_v21 = vmul.f32 1.442695, %v7983_v60 }
 0x535   : > { %v3777_v17 = vrot.slane %v3749_v10, %v9119_v32  ;;  %v8170_v12 = vpop.eup %6374  ;;  %6390 = vpow2.f32 %v3555_v56  ;;  %v3786_v57 = vrot.slane %v3778_v49, %v9119_v32  ;;  %v8183_v40 = vrot.slane %v5954_v3, %v9121_v27  ;;  %v9138_v49 = vld [vmem:[#allocation62_spill] sm:$0xff]  ;;  %v9140_v56 = vld [vmem:[#allocation64_spill] sm:$0xff]  ;;  %v9141_v10 = vld [vmem:[#allocation43_spill] sm:$0xff] }
 0x536   : > { %v3795_v13 = vcombine.low %v8165_v58, %v8170_v12  ;;  %6392 = vpow2.f32 %v3557_v52  ;;  %v8180_v51 = vpop.eup %6376  ;;  %v8186_v41 = vrot.slane %v5956_v5, %v9121_v27  ;;  %v3567_v14 = vmul.f32 1.442695, %v7986_v15 }
 0x537   : > { %v3779_v55 = vcombine.low %v3770_v35, %v3777_v17  ;;  %6394 = vpow2.f32 %v3559_v11  ;;  %v8191_v23 = vrot.slane %v5958_v33, %v9121_v27  ;;  %v3569_v42 = vmul.f32 1.442695, %v9138_v49  ;;  %v9143_v17 = vld [vmem:[#allocation66_spill] sm:$0xff]  ;;  %v9145_v49 = vld [vmem:[#allocation45_spill] sm:$0xff] }
 0x538   : > { %6396 = vpow2.f32 %v3561_v63  ;;  %v3571_v19 = vmul.f32 1.442695, %v9139_v44  ;;  %v3573_v52 = vmul.f32 1.442695, %v9140_v56  ;;  %v3575_v35 = vmul.f32 1.442695, %v9141_v10 }
 0x539   : > { %v3793_v60 = vrot.slane %v3779_v55, %v9119_v32  ;;  %v8194_v18 = vpop.eup %6378  ;;  %6398 = vpow2.f32 %v3563_v30  ;;  %v3805_v33 = vrot.slane %v3795_v13, %v9119_v32  ;;  %v3577_v63 = vmul.f32 1.442695, %v9143_v17  ;;  %v9144_v30 = vld [vmem:[#allocation44_spill] sm:$0xff]  ;;  %v9146_v13 = vld [vmem:[#allocation59_spill] sm:$0xff] }
 0x53a   : > { %v8199_v3 = vpop.eup %6380  ;;  %v3796_v5 = vcombine.low %v8180_v51, %v8194_v18  ;;  %6400 = vpow2.f32 %v3565_v21  ;;  %v3579_v55 = vmul.f32 1.442695, %v9144_v30  ;;  %v3581_v44 = vmul.f32 1.442695, %v9145_v49 }
 0x53b   : > { %v3794_v15 = vcombine.low %v3786_v57, %v3793_v60  ;;  %v8204_v11 = vpop.eup %6382  ;;  %6402 = vpow2.f32 %v3567_v14  ;;  %v3583_v14 = vmul.f32 1.442695, %v9146_v13  ;;  %v3585_v17 = vmul.f32 1.442695, %v8030_v43 }
 0x53c   : > { %9142 = vst [vmem:[#allocation25_spill] sm:$0xff] %v8204_v11  ;;  %v8209_v56 = vpop.eup %6384  ;;  %v3797_v57 = vcombine.low %v8199_v3, %v8204_v11  ;;  %v3812_v60 = vrot.slane %v3796_v5, %v9119_v32  ;;  %6404 = vpow2.f32 %v3569_v42  ;;  %v3587_v30 = vmul.f32 1.442695, %v8033_v59 }
 0x53d   : > { %v4100_v10 = vsel %vm3088_vm4, %v3794_v15, 0.0  ;;  %v8215_v21 = vpop.eup %6386  ;;  %6406 = vpow2.f32 %v3571_v19  ;;  %v3589_v19 = vmul.f32 1.442695, %v8038_v25  ;;  %v3591_v5 = vmul.f32 1.442695, %v8041_v53 }
 0x53e   : > { %4101 = vadd.xlane.f32.xlu1 %v4100_v10  ;;  %v8220_v49 = vpop.eup %6388  ;;  %v3798_v15 = vcombine.low %v8209_v56, %v8215_v21  ;;  %v3819_v27 = vrot.slane %v3797_v57, %v9119_v32  ;;  %v3827_v11 = vcombine.low %v3805_v33, %v3812_v60  ;;  %6408 = vpow2.f32 %v3573_v52 }
 0x53f   : > { %v8225_v42 = vpop.eup %6390  ;;  %6410 = vpow2.f32 %v3575_v35  ;;  %v3593_v43 = vmul.f32 1.442695, %v8044_v24  ;;  %v3595_v33 = vmul.f32 1.442695, %v8048_v2  ;;  %v3597_v25 = vmul.f32 1.442695, %v8051_v26 }
 0x540   : > { %v8230_v10 = vpop.eup %6392  ;;  %v3826_v59 = vrot.slane %v3798_v15, %v9119_v32  ;;  %v3844_v13 = vcombine.low %v8220_v49, %v8225_v42  ;;  %6412 = vpow2.f32 %v3577_v63  ;;  %v3835_v35 = vrot.slane %v3827_v11, %v9119_v32 }
 0x541   : > { %9147 = vst [vmem:[#allocation28_spill] sm:$0xff] %v8230_v10  ;;  %v8236_v52 = vpop.eup %6394  ;;  %6414 = vpow2.f32 %v3579_v55  ;;  %v3599_v53 = vmul.f32 1.442695, %v8054_v6  ;;  %v3601_v11 = vmul.f32 1.442695, %v8058_v36  ;;  %v1645_v36 = vcombine.low %v8173_v22, %v8183_v40 }
 0x542   : > { %9148 = vst [vmem:[#allocation30_spill] sm:$0xff] %v8236_v52  ;;  %v8241_v24 = vpop.eup %6396  ;;  %v3828_v57 = vcombine.low %v3819_v27, %v3826_v59  ;;  %v3845_v60 = vcombine.low %v8230_v10, %v8236_v52  ;;  %v3854_v15 = vrot.slane %v3844_v13, %v9119_v32  ;;  %6416 = vpow2.f32 %v3581_v44 }
 0x543   : > { %9149 = vst [vmem:[#allocation29_spill] sm:$0xff] %v8241_v24  ;;  %v8246_v2 = vpop.eup %6398  ;;  %6418 = vpow2.f32 %v3583_v14  ;;  %v8250_v63 = vmul.f32 1.442695, %v8061_v9  ;;  %v8253_v26 = vmul.f32 1.442695, %v8064_v4  ;;  %v1677_v9 = vcombine.low %v8186_v41, %v8191_v23 }
 0x544   : > { %9150 = vst [vmem:[#allocation37_spill] sm:$0xff] %v8246_v2  ;;  %v8255_v6 = vpop.eup %6400  ;;  %v3842_v27 = vrot.slane %v3828_v57, %v9119_v32  ;;  %v3846_v55 = vcombine.low %v8241_v24, %v8246_v2  ;;  %v3861_v44 = vrot.slane %v3845_v60, %v9119_v32  ;;  %6420 = vpow2.f32 %v3585_v17 }
 0x545   : > { %v8261_v59 = vpop.eup %6402  ;;  %6422 = vpow2.f32 %v3587_v30  ;;  %v1646_v4 = vcombine.high %v8173_v22, %v8183_v40  ;;  %v1653_v30 = vrot.slane %v1645_v36, %v9130_v37  ;;  %v1685_v24 = vrot.slane %v1677_v9, %v9130_v37 }
 0x546   : > { %v8269_v14 = vpop.eup %6404  ;;  %v3843_v13 = vcombine.low %v3835_v35, %v3842_v27  ;;  %v3847_v57 = vcombine.low %v8255_v6, %v8261_v59  ;;  %v3868_v17 = vrot.slane %v3846_v55, %v9119_v32  ;;  %v3876_v60 = vcombine.low %v3854_v15, %v3861_v44 }
 0x547   : > { %v8274_v2 = vpop.eup %6406  ;;  %6424 = vpow2.f32 %v3589_v19  ;;  %v1660_v52 = vrot.slane %v1646_v4, %v9130_v37  ;;  %v1709_v19 = vcombine.low %v1653_v30, %v1685_v24  ;;  %v1710_v55 = vcombine.high %v1653_v30, %v1685_v24 }
 0x548   : > { %v8279_v10 = vpop.eup %6408  ;;  %v4103_v22 = vsel %vm3088_vm4, %v3843_v13, 0.0  ;;  %v3875_v40 = vrot.slane %v3847_v57, %v9119_v32  ;;  %v3884_v35 = vrot.slane %v3876_v60, %v9119_v32  ;;  %v3893_v15 = vcombine.low %v8269_v14, %v8274_v2 }
 0x549   : > { %v8286_v27 = vpop.eup %6410  ;;  %4104 = vadd.xlane.f32.xlu0 %v4103_v22  ;;  %6426 = vpow2.f32 %v3591_v5  ;;  %v1678_v44 = vcombine.high %v8186_v41, %v8191_v23  ;;  %v1717_v60 = vpack.c.bf16 %v1709_v19, %v1709_v19  ;;  %v1718_v22 = vpack.c.bf16 %v1710_v55, %v1710_v55 }
 0x54a   : > { %v8290_v36 = vpop.eup %6412  ;;  %v3877_v9 = vcombine.low %v3868_v17, %v3875_v40  ;;  %v3894_v4 = vcombine.low %v8279_v10, %v8286_v27  ;;  %v3903_v13 = vrot.slane %v3893_v15, %v9119_v32  ;;  %6428 = vpow2.f32 %v3593_v43 }
 0x54b   : > { %v8295_v57 = vpop.eup %6414  ;;  %6430 = vpow2.f32 %v3595_v33  ;;  %v1692_v5 = vrot.slane %v1678_v44, %v9130_v37  ;;  %v4628_v43 = vsel %vm4626_vm5, %v1717_v60, 0  ;;  %v4705_v33 = vsel %vm4626_vm5, %v1718_v22, 0 }
 0x54c   : > { %v8298_v24 = vpop.eup %6416  ;;  %v3891_v41 = vrot.slane %v3877_v9, %v9119_v32  ;;  %v3895_v23 = vcombine.low %v8290_v36, %v8295_v57  ;;  %v3910_v17 = vrot.slane %v3894_v4, %v9119_v32  ;;  %6432 = vpow2.f32 %v3597_v25  ;;  %6128 = vmatpush3.bf16.msra.mxu1 %v4628_v43  ;;  %v9154_v4 = vld [vmem:[#allocation53_spill] sm:$0xff]  ;;  %6134 = vmatpush3.bf16.msra.mxu0 %v4705_v33 }
 0x54d   : > { %v8304_v30 = vpop.eup %6418  ;;  %6434 = vpow2.f32 %v3599_v53  ;;  %v8308_v40 = vcombine.low %v1660_v52, %v1692_v5  ;;  %v9153_v53 = vrot.slane %v7975_v8, %v7835_v48  ;;  %v3607_v22 = vmul.f32 1.442695, %v8067_v1 }
 0x54e   : > { %v8310_v15 = vpop.eup %6420  ;;  %v3892_v19 = vcombine.low %v3884_v35, %v3891_v41  ;;  %v3896_v55 = vcombine.low %v8298_v24, %v8304_v30  ;;  %v3917_v44 = vrot.slane %v3895_v23, %v9119_v32  ;;  %v3925_v9 = vcombine.low %v3903_v13, %v3910_v17 }
 0x54f   : > { %9151 = vst [vmem:[#allocation31_spill] sm:$0xff] %v8310_v15  ;;  %v8315_v25 = vpop.eup %6422  ;;  %v3498_v60 = vsub.f32 %v9154_v4, %v9153_v53  ;;  %6436 = vpow2.f32 %v3601_v11  ;;  %v9155_v37 = vmov 0.0   ;;  %v8323_v35 = vcombine.high %v1660_v52, %v1692_v5  ;;  %v9158_v11 = vld [vmem:[#allocation55_spill] sm:$0xff]  ;;  %v9160_v5 = vld [vmem:[#allocation57_spill] sm:$0xff] }
 0x550   : > { %9152 = vst [vmem:[#allocation32_spill] sm:$0xff] %v8315_v25  ;;  %6139 = vmatprep.subr.bf16.mxu1 %v9155_v37  ;;  %v4106_v41 = vsel %vm3088_vm4, %v3892_v19, 0.0  ;;  %v3924_v13 = vrot.slane %v3896_v55, %v9119_v32  ;;  %v3942_v23 = vcombine.low %v8310_v15, %v8315_v25  ;;  %v3609_v17 = vmul.f32 1.442695, %v8070_v28  ;;  %6145 = vmatprep.subr.bf16.mxu0 %v9155_v37 }
 0x551   : > { %v8331_v43 = vpop.eup %6424  ;;  %v9157_v1 = vrot.slane %v7975_v8, %v7838_v61  ;;  %v9159_v52 = vrot.slane %v7975_v8, %v7841_v45  ;;  %4107 = vadd.xlane.f32.xlu1 %v4106_v41  ;;  %6438 = vpow2.f32 %v8250_v63  ;;  %v3611_v55 = vmul.f32 1.442695, %v8073_v0  ;;  %v9165_v63 = vld [vmem:[#allocation56_spill] sm:$0xff] }
 0x552   : > { %9156 = vst [vmem:[#allocation35_spill] sm:$0xff] %v8331_v43  ;;  %v3926_v28 = vcombine.low %v3917_v44, %v3924_v13  ;;  %v3933_v53 = vrot.slane %v3925_v9, %v9119_v32  ;;  %6440 = vpow2.f32 %v8253_v26  ;;  %v3613_v4 = vmul.f32 1.442695, %v8080_v7 }
 0x553   : > { %v3499_v33 = vsub.f32 %v9158_v11, %v9157_v1  ;;  %v3500_v19 = vsub.f32 %v9160_v5, %v9159_v52  ;;  %v8346_v25 = vpop.eup %6426  ;;  %v9162_v1 = vrot.slane %v7975_v8, %v7844_v34  ;;  %v9163_v11 = vld [vmem:[#allocation54_spill] sm:$0xff]  ;;  %v9164_v41 = vrot.slane %v7975_v8, %v7847_v50 }
 0x554   : > { %9161 = vst [vmem:[#allocation33_spill] sm:$0xff] %v8346_v25  ;;  %6442 = vpow2.f32 %v3607_v22  ;;  %v3615_v0 = vmul.f32 1.442695, %v8088_v31  ;;  %v8357_v44 = vpop.eup %6428  ;;  %v3940_v26 = vrot.slane %v3926_v28, %v9119_v32  ;;  %v3943_v7 = vcombine.low %v8331_v43, %v8346_v25  ;;  %v9171_v43 = vld [vmem:[#allocation61_spill] sm:$0xff] }
 0x555   : > { %v3501_v15 = vsub.f32 %v9163_v11, %v9162_v1  ;;  %v3502_v52 = vsub.f32 %v9165_v63, %v9164_v41  ;;  %v3952_v9 = vrot.slane %v3942_v23, %v9119_v32  ;;  %6444 = vpow2.f32 %v3609_v17  ;;  %v8363_v13 = vpop.eup %6430  ;;  %v9167_v1 = vld [vmem:[#allocation58_spill] sm:$0xff] }
 0x556   : > { %v9166_v5 = vrot.slane %v7975_v8, %v7850_v54  ;;  %6446 = vpow2.f32 %v3611_v55  ;;  %v3617_v31 = vmul.f32 1.442695, %v8141_v16  ;;  %v3619_v22 = vmul.f32 1.442695, %v3498_v60  ;;  %v8370_v41 = vpop.eup %6432 }
 0x557   : > { %9168 = vst [vmem:[#allocation34_spill] sm:$0xff] %v8370_v41  ;;  %v3941_v28 = vcombine.low %v3933_v53, %v3940_v26  ;;  %v3944_v63 = vcombine.low %v8357_v44, %v8363_v13  ;;  %v3959_v23 = vrot.slane %v3943_v7, %v9119_v32  ;;  %6448 = vpow2.f32 %v3613_v4  ;;  %v8375_v17 = vpop.eup %6434 }
 0x558   : > { %v3503_v11 = vsub.f32 %v9167_v1, %v9166_v5  ;;  %9169 = vst [vmem:[#allocation52_spill] sm:$0xff] %v8375_v17  ;;  %v9170_v25 = vrot.slane %v7975_v8, %v7856_v38  ;;  %6450 = vpow2.f32 %v3615_v0  ;;  %v3621_v55 = vmul.f32 1.442695, %v3499_v33 }
 0x559   : > { %v3623_v16 = vmul.f32 1.442695, %v3500_v19  ;;  %v4109_v60 = vsel %vm3088_vm4, %v3941_v28, 0.0  ;;  %v3945_v53 = vcombine.low %v8370_v41, %v8375_v17  ;;  %v3966_v26 = vrot.slane %v3944_v63, %v9119_v32  ;;  %v8385_v7 = vpop.eup %6436 }
 0x55a   : > { %v3504_v5 = vsub.f32 %v9171_v43, %v9170_v25  ;;  %v3974_v1 = vcombine.low %v3952_v9, %v3959_v23  ;;  %9172 = vst [vmem:[#allocation46_spill] sm:$0xff] %v8385_v7  ;;  %4110 = vadd.xlane.f32.xlu0 %v4109_v60  ;;  %6452 = vpow2.f32 %v3617_v31  ;;  %v3625_v4 = vmul.f32 1.442695, %v3501_v15 }
 0x55b   : > { %v3973_v8 = vrot.slane %v3945_v53, %v9119_v32  ;;  %6454 = vpow2.f32 %v3619_v22  ;;  %v3627_v25 = vmul.f32 1.442695, %v3502_v52  ;;  %v8388_v43 = vpop.eup %6438  ;;  %v3629_v33 = vmul.f32 1.442695, %v3503_v11 }
 0x55c   : > { %9173 = vst [vmem:[#allocation38_spill] sm:$0xff] %v8388_v43  ;;  %6456 = vpow2.f32 %v3621_v55  ;;  %v3631_v19 = vmul.f32 1.442695, %v3504_v5  ;;  %v8390_v0 = vpop.eup %6440  ;;  %v3982_v63 = vrot.slane %v3974_v1, %v9119_v32  ;;  %v3991_v9 = vcombine.low %v8385_v7, %v8388_v43 }
 0x55d   : > { %9174 = vst [vmem:[#allocation62_spill] sm:$0xff] %v8390_v0  ;;  %v3975_v28 = vcombine.low %v3966_v26, %v3973_v8  ;;  %6458 = vpow2.f32 %v3623_v16 }
 0x55e   : > { %v8395_v31 = vpop.eup %6442  ;;  %6460 = vpow2.f32 %v3625_v4  ;;  %v4001_v22 = vrot.slane %v3991_v9, %v9119_v32 }
 0x55f   : > { %9175 = vst [vmem:[#allocation63_spill] sm:$0xff] %v8395_v31  ;;  %v8397_v15 = vpop.eup %6444  ;;  %v3989_v52 = vrot.slane %v3975_v28, %v9119_v32  ;;  %v3992_v11 = vcombine.low %v8390_v0, %v8395_v31  ;;  %6462 = vpow2.f32 %v3627_v25  ;;  %v9192_v31 = vld [vmem:[#allocation47_spill] sm:$0xff] }
 0x560   : > { %9176 = vst [vmem:[#allocation64_spill] sm:$0xff] %v8397_v15  ;;  %v8403_v23 = vpop.eup %6446  ;;  %6464 = vpow2.f32 %v3629_v33 }
 0x561   : > { %9177 = vst [vmem:[#allocation43_spill] sm:$0xff] %v8403_v23  ;;  %v8405_v5 = vpop.eup %6448  ;;  %v3990_v55 = vcombine.low %v3982_v63, %v3989_v52  ;;  %v3993_v16 = vcombine.low %v8397_v15, %v8403_v23  ;;  %v4008_v60 = vrot.slane %v3992_v11, %v9119_v32  ;;  %6466 = vpow2.f32 %v3631_v19  ;;  %v9191_v23 = vld [vmem:[#allocation40_spill] sm:$0xff] }
 0x562   : > { %9178 = vst [vmem:[#allocation66_spill] sm:$0xff] %v8405_v5  ;;  %v8410_v53 = vpop.eup %6450 }
 0x563   : > { %9179 = vst [vmem:[#allocation44_spill] sm:$0xff] %v8410_v53  ;;  %v4112_v26 = vsel %vm3088_vm4, %v3990_v55, 0.0  ;;  %v3994_v1 = vcombine.low %v8405_v5, %v8410_v53  ;;  %v4015_v4 = vrot.slane %v3993_v16, %v9119_v32  ;;  %v4023_v8 = vcombine.low %v4001_v22, %v4008_v60 }
 0x564   : > { %v8416_v25 = vpop.eup %6452  ;;  %4113 = vadd.xlane.f32.xlu1 %v4112_v26 }
 0x565   : > { %9180 = vst [vmem:[#allocation45_spill] sm:$0xff] %v8416_v25  ;;  %v8418_v33 = vpop.eup %6454  ;;  %v4022_v28 = vrot.slane %v3994_v1, %v9119_v32  ;;  %v4031_v11 = vrot.slane %v4023_v8, %v9119_v32 }
 0x566   : > { %9181 = vst [vmem:[#allocation59_spill] sm:$0xff] %v8418_v33  ;;  %v8421_v63 = vpop.eup %6456  ;;  %v4040_v19 = vcombine.low %v8416_v25, %v8418_v33 }
 0x567   : > { %9182 = vst [vmem:[#allocation53_spill] sm:$0xff] %v8421_v63  ;;  %v8425_v9 = vpop.eup %6458  ;;  %v4024_v52 = vcombine.low %v4015_v4, %v4022_v28 }
 0x568   : > { %9183 = vst [vmem:[#allocation55_spill] sm:$0xff] %v8425_v9  ;;  %v8428_v55 = vpop.eup %6460  ;;  %v4041_v22 = vcombine.low %v8421_v63, %v8425_v9  ;;  %v4050_v16 = vrot.slane %v4040_v19, %v9119_v32 }
 0x569   : > { %9184 = vst [vmem:[#allocation57_spill] sm:$0xff] %v8428_v55  ;;  %v8433_v60 = vpop.eup %6462  ;;  %v4038_v26 = vrot.slane %v4024_v52, %v9119_v32 }
 0x56a   : > { %9185 = vst [vmem:[#allocation54_spill] sm:$0xff] %v8433_v60  ;;  %v8436_v1 = vpop.eup %6464  ;;  %v4042_v33 = vcombine.low %v8428_v55, %v8433_v60  ;;  %v4057_v4 = vrot.slane %v4041_v22, %v9119_v32 }
 0x56b   : > { %9186 = vst [vmem:[#allocation56_spill] sm:$0xff] %v8436_v1  ;;  %v8441_v28 = vpop.eup %6466  ;;  %v4039_v8 = vcombine.low %v4031_v11, %v4038_v26 }
 0x56c   : > { %9187 = vst [vmem:[#allocation58_spill] sm:$0xff] %v8441_v28  ;;  %v4043_v25 = vcombine.low %v8436_v1, %v8441_v28  ;;  %v4064_v9 = vrot.slane %v4042_v33, %v9119_v32  ;;  %v4072_v19 = vcombine.low %v4050_v16, %v4057_v4  ;;  %v8455_v33 = vpop.permute.xlu0 %1433  ;;  %v9190_v28 = vld [vmem:[#allocation39_spill] sm:$0xff] }
 0x56d   : > { %v4115_v63 = vsel %vm3088_vm4, %v4039_v8, 0.0 }
 0x56e   : > { %4116 = vadd.xlane.f32.xlu0 %v4115_v63  ;;  %v4071_v52 = vrot.slane %v4043_v25, %v9119_v32  ;;  %v4080_v5 = vrot.slane %v4072_v19, %v9119_v32  ;;  %v9188_v19 = vld [vmem:[#allocation36_spill] sm:$0xff] }
 0x570   : > { %v4073_v53 = vcombine.low %v4064_v9, %v4071_v52 }
 0x572   : > { %v4087_v60 = vrot.slane %v4073_v53, %v9119_v32  ;;  %v8461_v53 = vpop.permute.xlu1 %1436 }
 0x574   : > { %v4088_v22 = vcombine.low %v4080_v5, %v4087_v60 }
 0x576   : > { %v4118_v55 = vsel %vm3088_vm4, %v4088_v22, 0.0  ;;  %v9189_v22 = vld [vmem:[#allocation41_spill] sm:$0xff] }
 0x577   : > { %4119 = vadd.xlane.f32.xlu1 %v4118_v55 }
 0x584   : > { %1439 = vrot.lane.b32.xlu0 %v9118_v29, %s6751_s18 }
 0x588   : > { %1442 = vrot.lane.b32.xlu1 %v9118_v29, %s6747_s0 }
 0x5bb   : > { %v4099_v63 = vpop.xlane.xlu0 %4098 }
 0x5bc   : > { %6468 = vrcp.f32 %v4099_v63 }
 0x5c6   : > { %v6469_v25 = vpop.eup %6468 }
 0x5c7   : > { %v4140_v9 = vrot.slane %v6469_v25, %v7832_v62  ;;  %v4144_v11 = vrot.slane %v6469_v25, %v7835_v48  ;;  %v4148_v32 = vrot.slane %v6469_v25, %v7838_v61  ;;  %v4152_v5 = vrot.slane %v6469_v25, %v7841_v45 }
 0x5c8   : > { %v4156_v55 = vrot.slane %v6469_v25, %v7844_v34  ;;  %v4160_v16 = vrot.slane %v6469_v25, %v7847_v50  ;;  %v4164_v29 = vrot.slane %v6469_v25, %v7850_v54  ;;  %v4168_v60 = vrot.slane %v6469_v25, %v7856_v38 }
 0x5c9   : > { %v4457_v26 = vmul.f32 %v7902_v20, %v4140_v9  ;;  %v4458_v4 = vmul.f32 %v7909_v46, %v4144_v11  ;;  %v4459_v8 = vmul.f32 %v7923_v47, %v4148_v32  ;;  %v4460_v52 = vmul.f32 %v9188_v19, %v4152_v5 }
 0x5ca   : > { %v4461_v63 = vmul.f32 %v9189_v22, %v4156_v55  ;;  %v4462_v1 = vmul.f32 %v9190_v28, %v4160_v16  ;;  %v4463_v15 = vmul.f32 %v9191_v23, %v4164_v29  ;;  %v4464_v0 = vmul.f32 %v9192_v31, %v4168_v60 }
 0x5cb   : > { %v4521_v43 = vpack.c.bf16 %v4457_v26, %v4457_v26  ;;  %v4522_v7 = vpack.c.bf16 %v4458_v4, %v4458_v4  ;;  %v4523_v17 = vpack.c.bf16 %v4459_v8, %v4459_v8  ;;  %v4524_v25 = vpack.c.bf16 %v4460_v52, %v4460_v52  ;;  %v4102_v41 = vpop.xlane.xlu1 %4101 }
 0x5cc   : > { %v4525_v20 = vpack.c.bf16 %v4461_v63, %v4461_v63  ;;  %v4526_v9 = vpack.c.bf16 %v4462_v1, %v4462_v1  ;;  %v4527_v46 = vpack.c.bf16 %v4463_v15, %v4463_v15  ;;  %6470 = vrcp.f32 %v4102_v41 }
 0x5cd   : > { %v4528_v47 = vpack.c.bf16 %v4464_v0, %v4464_v0  ;;  %v4594_v11 = vunpack.c.l.b16 %v4522_v7  ;;  %v4595_v32 = vunpack.c.l.b16 %v4523_v17  ;;  %v4596_v5 = vunpack.c.l.b16 %v4524_v25 }
 0x5ce   : > { %v4597_v55 = vunpack.c.l.b16 %v4525_v20  ;;  %v4593_v28 = vunpack.c.l.b16 %v4521_v43  ;;  %v4598_v23 = vunpack.c.l.b16 %v4526_v9  ;;  %v4599_v29 = vunpack.c.l.b16 %v4527_v46 }
 0x5cf   : > { %v4601_v16 = vrot.slane %v4594_v11, 7  ;;  %v4604_v31 = vrot.slane %v4595_v32, 6  ;;  %v4600_v60 = vunpack.c.l.b16 %v4528_v47  ;;  %v4607_v4 = vrot.slane %v4596_v5, 5 }
 0x5d0   : > { %v4610_v0 = vrot.slane %v4597_v55, 4  ;;  %v4613_v7 = vrot.slane %v4598_v23, 3  ;;  %v1719_v43 = vpack.c.bf16 %v8308_v40, %v8308_v40  ;;  %v4616_v1 = vrot.slane %v4599_v29, 2  ;;  %v9193_v23 = vld [vmem:[#allocation42_spill] sm:$0xff] }
 0x5d1   : > { %v4603_v26 = vsel %vm4602_vm6, %v4601_v16, %v4593_v28  ;;  %v4619_v19 = vrot.slane %v4600_v60, 1  ;;  %v9195_v60 = vld [vmem:[#allocation51_spill] sm:$0xff] }
 0x5d2   : > { %v4606_v41 = vsel %vm4605_vm7, %v4604_v31, %v4603_v26  ;;  %v4782_v25 = vsel %vm4626_vm5, %v1719_v43, 0  ;;  %v9194_v31 = vld [vmem:[#allocation65_spill] sm:$0xff] }
 0x5d3   : > { %v4609_v17 = vsel %vm4608_vm8, %v4607_v4, %v4606_v41  ;;  %v9196_v4 = vld [vmem:[#allocation48_spill] sm:$0xff] }
 0x5d4   : > { %v4612_v15 = vsel %vm4611_vm9, %v4610_v0, %v4609_v17  ;;  %v9197_v0 = vld [vmem:[#allocation49_spill] sm:$0xff] }
 0x5d5   : > { %v4615_v8 = vsel %vm4614_vm10, %v4613_v7, %v4612_v15  ;;  %v9198_v7 = vld [vmem:[#allocation50_spill] sm:$0xff] }
 0x5d6   : > { %v4618_v52 = vsel %vm4617_vm11, %v4616_v1, %v4615_v8  ;;  %v6471_v22 = vpop.eup %6470  ;;  %v4105_v20 = vpop.xlane.xlu0 %4104  ;;  %v9199_v1 = vld [vmem:[#allocation60_spill] sm:$0xff] }
 0x5d7   : > { %v4621_v63 = vsel %vm4620_vm12, %v4619_v19, %v4618_v52  ;;  %v4172_v46 = vrot.slane %v6471_v22, %v7832_v62  ;;  %v4176_v40 = vrot.slane %v6471_v22, %v7835_v48  ;;  %v4180_v47 = vrot.slane %v6471_v22, %v7838_v61 }
 0x5d8   : > { %v4622_v9 = vpack.c.b16 %v4621_v63, %v4621_v63  ;;  %6472 = vrcp.f32 %v4105_v20  ;;  %v4184_v11 = vrot.slane %v6471_v22, %v7841_v45  ;;  %v4188_v32 = vrot.slane %v6471_v22, %v7844_v34 }
 0x5d9   : > { %v4192_v5 = vrot.slane %v6471_v22, %v7847_v50  ;;  %v4196_v55 = vrot.slane %v6471_v22, %v7850_v54  ;;  %v4200_v28 = vrot.slane %v6471_v22, %v7856_v38  ;;  %v4465_v16 = vmul.f32 %v9193_v23, %v4172_v46 }
 0x5da   : > { %6130 = vmatmul.mubr.msk.bf16.vlgmr.msra.gmra.mrb[20].mxu1 %vm3088_vm4, %v4622_v9  ;;  %v4466_v29 = vmul.f32 %v9194_v31, %v4176_v40  ;;  %v4467_v26 = vmul.f32 %v9195_v60, %v4180_v47  ;;  %v4468_v41 = vmul.f32 %v9196_v4, %v4184_v11  ;;  %v4469_v17 = vmul.f32 %v9197_v0, %v4188_v32 }
 0x5db   : > { %v4470_v43 = vmul.f32 %v9198_v7, %v4192_v5  ;;  %6140 = vmatpush3.bf16.msra.mxu1 %v4782_v25  ;;  %v4471_v15 = vmul.f32 %v8152_v39, %v4196_v55  ;;  %v4472_v8 = vmul.f32 %v9199_v1, %v4200_v28  ;;  %v4529_v19 = vpack.c.bf16 %v4465_v16, %v4465_v16 }
 0x5dc   : > { %v4530_v52 = vpack.c.bf16 %v4466_v29, %v4466_v29  ;;  %6141 = vmatprep.mubr.msk.bf16.mxu1 %vm6744_vm1, %v9155_v37  ;;  %v4531_v22 = vpack.c.bf16 %v4467_v26, %v4467_v26  ;;  %v4532_v63 = vpack.c.bf16 %v4468_v41, %v4468_v41  ;;  %v4533_v20 = vpack.c.bf16 %v4469_v17, %v4469_v17 }
 0x5dd   : > { %v4534_v9 = vpack.c.bf16 %v4470_v43, %v4470_v43  ;;  %6151 = vmatprep.subr.bf16.mxu1 %v9155_v37  ;;  %v4535_v46 = vpack.c.bf16 %v4471_v15, %v4471_v15  ;;  %v4536_v40 = vpack.c.bf16 %v4472_v8, %v4472_v8  ;;  %v1720_v25 = vpack.c.bf16 %v8323_v35, %v8323_v35 }
 0x5de   : > { %v4679_v47 = vunpack.c.l.b16 %v4530_v52  ;;  %v4680_v39 = vunpack.c.l.b16 %v4531_v22  ;;  %v4681_v11 = vunpack.c.l.b16 %v4532_v63  ;;  %v4682_v32 = vunpack.c.l.b16 %v4533_v20  ;;  %v4108_v55 = vpop.xlane.xlu1 %4107 }
 0x5df   : > { %v4683_v5 = vunpack.c.l.b16 %v4534_v9  ;;  %v4678_v28 = vunpack.c.l.b16 %v4529_v19  ;;  %v4684_v23 = vunpack.c.l.b16 %v4535_v46  ;;  %v4685_v16 = vunpack.c.l.b16 %v4536_v40 }
 0x5e0   : > { %v4686_v31 = vrot.slane %v4679_v47, 7  ;;  %6474 = vrcp.f32 %v4108_v55  ;;  %v4688_v29 = vrot.slane %v4680_v39, 6  ;;  %v4690_v26 = vrot.slane %v4681_v11, 5 }
 0x5e1   : > { %v4692_v4 = vrot.slane %v4682_v32, 4  ;;  %v4859_v41 = vsel %vm4626_vm5, %v1720_v25, 0  ;;  %v4694_v17 = vrot.slane %v4683_v5, 3  ;;  %v4696_v7 = vrot.slane %v4684_v23, 2  ;;  %v9200_v23 = vld [vmem:[#allocation25_spill] sm:$0xff] }
 0x5e2   : > { %v4687_v60 = vsel %vm4602_vm6, %v4686_v31, %v4678_v28  ;;  %v6473_v0 = vpop.eup %6472  ;;  %v4698_v43 = vrot.slane %v4685_v16, 1 }
 0x5e3   : > { %v4689_v35 = vsel %vm4605_vm7, %v4688_v29, %v4687_v60  ;;  %v4204_v1 = vrot.slane %v6473_v0, %v7832_v62  ;;  %v4208_v8 = vrot.slane %v6473_v0, %v7835_v48  ;;  %v4212_v19 = vrot.slane %v6473_v0, %v7838_v61 }
 0x5e4   : > { %v4691_v15 = vsel %vm4608_vm8, %v4690_v26, %v4689_v35  ;;  %v4216_v22 = vrot.slane %v6473_v0, %v7841_v45  ;;  %v4220_v63 = vrot.slane %v6473_v0, %v7844_v34  ;;  %v4224_v20 = vrot.slane %v6473_v0, %v7847_v50 }
 0x5e5   : > { %v4693_v52 = vsel %vm4611_vm9, %v4692_v4, %v4691_v15  ;;  %v4228_v46 = vrot.slane %v6473_v0, %v7850_v54  ;;  %v4232_v40 = vrot.slane %v6473_v0, %v7856_v38  ;;  %v4473_v47 = vmul.f32 %v8165_v58, %v4204_v1 }
 0x5e6   : > { %v4695_v9 = vsel %vm4614_vm10, %v4694_v17, %v4693_v52  ;;  %v4474_v39 = vmul.f32 %v8170_v12, %v4208_v8  ;;  %v4475_v11 = vmul.f32 %v8180_v51, %v4212_v19  ;;  %v4476_v32 = vmul.f32 %v8194_v18, %v4216_v22 }
 0x5e7   : > { %v4697_v25 = vsel %vm4617_vm11, %v4696_v7, %v4695_v9  ;;  %v4111_v5 = vpop.xlane.xlu0 %4110  ;;  %v4477_v28 = vmul.f32 %v8199_v3, %v4220_v63  ;;  %v4478_v16 = vmul.f32 %v9200_v23, %v4224_v20  ;;  %v4479_v31 = vmul.f32 %v8209_v56, %v4228_v46 }
 0x5e8   : > { %v4699_v55 = vsel %vm4620_vm12, %v4698_v43, %v4697_v25  ;;  %6476 = vrcp.f32 %v4111_v5  ;;  %v4480_v58 = vmul.f32 %v8215_v21, %v4232_v40  ;;  %v4537_v60 = vpack.c.bf16 %v4473_v47, %v4473_v47 }
 0x5e9   : > { %v4700_v29 = vpack.c.b16 %v4699_v55, %v4699_v55  ;;  %v4538_v26 = vpack.c.bf16 %v4474_v39, %v4474_v39  ;;  %v4539_v12 = vpack.c.bf16 %v4475_v11, %v4475_v11  ;;  %v4540_v4 = vpack.c.bf16 %v4476_v32, %v4476_v32 }
 0x5ea   : > { %v4541_v51 = vpack.c.bf16 %v4477_v28, %v4477_v28  ;;  %v6475_v0 = vpop.eup %6474  ;;  %v4542_v18 = vpack.c.bf16 %v4478_v16, %v4478_v16  ;;  %v4543_v35 = vpack.c.bf16 %v4479_v31, %v4479_v31  ;;  %v4544_v17 = vpack.c.bf16 %v4480_v58, %v4480_v58  ;;  %v9201_v58 = vld [vmem:[#allocation28_spill] sm:$0xff] }
 0x5eb   : > { %6136 = vmatmul.mubr.msk.bf16.vlgmr.msra.gmra.mrb[24].mxu0 %vm3088_vm4, %v4700_v29  ;;  %v4755_v3 = vunpack.c.l.b16 %v4537_v60  ;;  %v4756_v56 = vunpack.c.l.b16 %v4538_v26  ;;  %v4757_v7 = vunpack.c.l.b16 %v4539_v12  ;;  %v4758_v43 = vunpack.c.l.b16 %v4540_v4  ;;  %v9202_v4 = vld [vmem:[#allocation30_spill] sm:$0xff] }
 0x5ec   : > { %6146 = vmatpush3.bf16.msra.mxu0 %v4859_v41  ;;  %6147 = vmatprep.mubr.msk.bf16.mxu0 %vm6744_vm1, %v9155_v37  ;;  %v4759_v21 = vunpack.c.l.b16 %v4541_v51  ;;  %v4760_v15 = vunpack.c.l.b16 %v4542_v18  ;;  %v4761_v1 = vunpack.c.l.b16 %v4543_v35  ;;  %v4762_v8 = vunpack.c.l.b16 %v4544_v17  ;;  %v9203_v18 = vld [vmem:[#allocation29_spill] sm:$0xff] }
 0x5ed   : > { %v4236_v19 = vrot.slane %v6475_v0, %v7832_v62  ;;  %6157 = vmatprep.subr.bf16.mxu0 %v9155_v37  ;;  %v4763_v52 = vrot.slane %v4756_v56, 7  ;;  %v4765_v22 = vrot.slane %v4757_v7, 6  ;;  %v4767_v63 = vrot.slane %v4758_v43, 5 }
 0x5ee   : > { %v4769_v20 = vrot.slane %v4759_v21, 4  ;;  %v4771_v9 = vrot.slane %v4760_v15, 3  ;;  %v4773_v41 = vrot.slane %v4761_v1, 2  ;;  %v4775_v46 = vrot.slane %v4762_v8, 1 }
 0x5ef   : > { %v4240_v40 = vrot.slane %v6475_v0, %v7835_v48  ;;  %v4764_v47 = vsel %vm4602_vm6, %v4763_v52, %v4755_v3  ;;  %v4244_v25 = vrot.slane %v6475_v0, %v7838_v61  ;;  %v4248_v39 = vrot.slane %v6475_v0, %v7841_v45 }
 0x5f0   : > { %v4252_v11 = vrot.slane %v6475_v0, %v7844_v34  ;;  %v4766_v32 = vsel %vm4605_vm7, %v4765_v22, %v4764_v47  ;;  %v4256_v5 = vrot.slane %v6475_v0, %v7847_v50  ;;  %v4260_v55 = vrot.slane %v6475_v0, %v7850_v54 }
 0x5f1   : > { %v4264_v28 = vrot.slane %v6475_v0, %v7856_v38  ;;  %v4114_v23 = vpop.xlane.xlu1 %4113  ;;  %v4768_v16 = vsel %vm4608_vm8, %v4767_v63, %v4766_v32  ;;  %v4481_v31 = vmul.f32 %v8220_v49, %v4236_v19  ;;  %v4482_v29 = vmul.f32 %v8225_v42, %v4240_v40  ;;  %v9204_v0 = vld [vmem:[#allocation37_spill] sm:$0xff] }
 0x5f2   : > { %v4483_v60 = vmul.f32 %v9201_v58, %v4244_v25  ;;  %v6477_v26 = vpop.eup %6476  ;;  %6478 = vrcp.f32 %v4114_v23  ;;  %v4770_v12 = vsel %vm4611_vm9, %v4769_v20, %v4768_v16  ;;  %v4484_v51 = vmul.f32 %v9202_v4, %v4248_v39 }
 0x5f3   : > { %v4485_v35 = vmul.f32 %v9203_v18, %v4252_v11  ;;  %v4772_v17 = vsel %vm4614_vm10, %v4771_v9, %v4770_v12  ;;  %v4486_v3 = vmul.f32 %v9204_v0, %v4256_v5  ;;  %v4487_v56 = vmul.f32 %v8255_v6, %v4260_v55 }
 0x5f4   : > { %v4488_v49 = vmul.f32 %v8261_v59, %v4264_v28  ;;  %v4774_v42 = vsel %vm4617_vm11, %v4773_v41, %v4772_v17  ;;  %v4545_v7 = vpack.c.bf16 %v4481_v31, %v4481_v31  ;;  %v4546_v43 = vpack.c.bf16 %v4482_v29, %v4482_v29 }
 0x5f5   : > { %v4547_v21 = vpack.c.bf16 %v4483_v60, %v4483_v60  ;;  %v4776_v15 = vsel %vm4620_vm12, %v4775_v46, %v4774_v42  ;;  %v4548_v1 = vpack.c.bf16 %v4484_v51, %v4484_v51  ;;  %v4549_v8 = vpack.c.bf16 %v4485_v35, %v4485_v35 }
 0x5f6   : > { %v4550_v19 = vpack.c.bf16 %v4486_v3, %v4486_v3  ;;  %v4777_v52 = vpack.c.b16 %v4776_v15, %v4776_v15  ;;  %v4551_v22 = vpack.c.bf16 %v4487_v56, %v4487_v56  ;;  %v4552_v63 = vpack.c.bf16 %v4488_v49, %v4488_v49 }
 0x5f7   : > { %v4832_v20 = vunpack.c.l.b16 %v4545_v7  ;;  %v4833_v9 = vunpack.c.l.b16 %v4546_v43  ;;  %v4834_v40 = vunpack.c.l.b16 %v4547_v21  ;;  %v4835_v47 = vunpack.c.l.b16 %v4548_v1 }
 0x5f8   : > { %v4836_v6 = vunpack.c.l.b16 %v4549_v8  ;;  %6142 = vmatmul.mubr.msk.bf16.vlgmr.msra.gmra.mrb[24].mxu1 %vm3088_vm4, %v4777_v52  ;;  %v4837_v59 = vunpack.c.l.b16 %v4550_v19  ;;  %v4838_v41 = vunpack.c.l.b16 %v4551_v22  ;;  %v4839_v25 = vunpack.c.l.b16 %v4552_v63  ;;  %v9205_v63 = vld [vmem:[#allocation26_spill] sm:$0xff] }
 0x5f9   : > { %v4268_v39 = vrot.slane %v6477_v26, %v7832_v62  ;;  %v4840_v11 = vrot.slane %v4833_v9, 7  ;;  %v4842_v46 = vrot.slane %v4834_v40, 6  ;;  %v4844_v32 = vrot.slane %v4835_v47, 5  ;;  %6153 = vmatprep.mubr.msk.bf16.mxu1 %vm6744_vm1, %v9155_v37 }
 0x5fa   : > { %v4846_v5 = vrot.slane %v4836_v6, 4  ;;  %v4848_v55 = vrot.slane %v4837_v59, 3  ;;  %v4850_v28 = vrot.slane %v4838_v41, 2  ;;  %v4852_v23 = vrot.slane %v4839_v25, 1 }
 0x5fb   : > { %v4272_v16 = vrot.slane %v6477_v26, %v7835_v48  ;;  %v4117_v31 = vpop.xlane.xlu0 %4116  ;;  %v4841_v29 = vsel %vm4602_vm6, %v4840_v11, %v4832_v20  ;;  %v4276_v58 = vrot.slane %v6477_v26, %v7838_v61  ;;  %v4280_v60 = vrot.slane %v6477_v26, %v7841_v45 }
 0x5fc   : > { %v4284_v12 = vrot.slane %v6477_v26, %v7844_v34  ;;  %v8567_v4 = vpop.eup %6478  ;;  %6480 = vrcp.f32 %v4117_v31  ;;  %v4843_v51 = vsel %vm4605_vm7, %v4842_v46, %v4841_v29  ;;  %v4288_v18 = vrot.slane %v6477_v26, %v7847_v50 }
 0x5fd   : > { %v4292_v35 = vrot.slane %v6477_v26, %v7850_v54  ;;  %v4845_v17 = vsel %vm4608_vm8, %v4844_v32, %v4843_v51  ;;  %v4296_v0 = vrot.slane %v6477_v26, %v7856_v38  ;;  %v4489_v3 = vmul.f32 %v8269_v14, %v4268_v39 }
 0x5fe   : > { %v4490_v56 = vmul.f32 %v8274_v2, %v4272_v16  ;;  %v4847_v49 = vsel %vm4611_vm9, %v4846_v5, %v4845_v17  ;;  %v4491_v42 = vmul.f32 %v8279_v10, %v4276_v58  ;;  %v4492_v7 = vmul.f32 %v8286_v27, %v4280_v60 }
 0x5ff   : > { %v4493_v43 = vmul.f32 %v8290_v36, %v4284_v12  ;;  %v1440_v21 = vpop.permute.xlu0 %1439  ;;  %v4849_v15 = vsel %vm4614_vm10, %v4848_v55, %v4847_v49  ;;  %v4494_v1 = vmul.f32 %v8295_v57, %v4288_v18  ;;  %v4495_v8 = vmul.f32 %v8298_v24, %v4292_v35 }
 0x600   : > { %v4496_v26 = vmul.f32 %v8304_v30, %v4296_v0  ;;  %v1477_v14 = vcombine.low %v8455_v33, %v1440_v21  ;;  %v1478_v2 = vcombine.high %v8455_v33, %v1440_v21  ;;  %v4851_v19 = vsel %vm4617_vm11, %v4850_v28, %v4849_v15 }
 0x601   : > { %v4553_v10 = vpack.c.bf16 %v4489_v3, %v4489_v3  ;;  %v4853_v27 = vsel %vm4620_vm12, %v4852_v23, %v4851_v19  ;;  %v4554_v52 = vpack.c.bf16 %v4490_v56, %v4490_v56  ;;  %v4555_v36 = vpack.c.bf16 %v4491_v42, %v4491_v42 }
 0x602   : > { %v4556_v22 = vpack.c.bf16 %v4492_v7, %v4492_v7  ;;  %v1485_v20 = vrot.slane %v1477_v14, %v9205_v63  ;;  %v1492_v57 = vrot.slane %v1478_v2, %v9205_v63  ;;  %v4854_v9 = vpack.c.b16 %v4853_v27, %v4853_v27  ;;  %v9207_v2 = vld [vmem:[#allocation32_spill] sm:$0xff] }
 0x603   : > { %v4557_v24 = vpack.c.bf16 %v4493_v43, %v4493_v43  ;;  %v4558_v40 = vpack.c.bf16 %v4494_v1, %v4494_v1  ;;  %v4559_v30 = vpack.c.bf16 %v4495_v8, %v4495_v8  ;;  %v4560_v47 = vpack.c.bf16 %v4496_v26, %v4496_v26  ;;  %v9206_v8 = vld [vmem:[#allocation31_spill] sm:$0xff] }
 0x604   : > { %v4909_v6 = vunpack.c.l.b16 %v4553_v10  ;;  %v4120_v59 = vpop.xlane.xlu1 %4119  ;;  %6148 = vmatmul.mubr.msk.bf16.vlgmr.msra.gmra.mrb[28].mxu0 %vm3088_vm4, %v4854_v9  ;;  %v4910_v33 = vunpack.c.l.b16 %v4554_v52  ;;  %v4911_v41 = vunpack.c.l.b16 %v4555_v36  ;;  %v4912_v25 = vunpack.c.l.b16 %v4556_v22  ;;  %v9208_v10 = vld [vmem:[#allocation35_spill] sm:$0xff]  ;;  %v9209_v52 = vld [vmem:[#allocation33_spill] sm:$0xff] }
 0x605   : > { %v4913_v39 = vunpack.c.l.b16 %v4557_v24  ;;  %6482 = vrcp.f32 %v4120_v59  ;;  %6159 = vmatprep.mubr.msk.bf16.mxu0 %vm6744_vm1, %v9155_v37  ;;  %v4914_v11 = vunpack.c.l.b16 %v4558_v40  ;;  %v4915_v46 = vunpack.c.l.b16 %v4559_v30 }
 0x606   : > { %v4916_v32 = vunpack.c.l.b16 %v4560_v47  ;;  %v8593_v5 = vpop.eup %6480  ;;  %v4917_v55 = vrot.slane %v4910_v33, 7  ;;  %v4919_v28 = vrot.slane %v4911_v41, 6  ;;  %v4921_v23 = vrot.slane %v4912_v25, 5  ;;  %v9211_v41 = vld [vmem:[#allocation27_spill] sm:$0xff] }
 0x607   : > { %v4923_v16 = vrot.slane %v4913_v39, 4  ;;  %v4925_v31 = vrot.slane %v4914_v11, 3  ;;  %v4927_v29 = vrot.slane %v4915_v46, 2  ;;  %v4300_v60 = vrot.slane %v8567_v4, %v7832_v62  ;;  %v9212_v46 = vld [vmem:[#allocation52_spill] sm:$0xff] }
 0x608   : > { %v4929_v58 = vrot.slane %v4916_v32, 1  ;;  %v1443_v12 = vpop.permute.xlu1 %1442  ;;  %v4918_v51 = vsel %vm4602_vm6, %v4917_v55, %v4909_v6  ;;  %v4304_v18 = vrot.slane %v8567_v4, %v7835_v48  ;;  %v4308_v35 = vrot.slane %v8567_v4, %v7838_v61  ;;  %v9210_v6 = vld [vmem:[#allocation34_spill] sm:$0xff] }
 0x609   : > { %v4312_v17 = vrot.slane %v8567_v4, %v7841_v45  ;;  %v1493_v0 = vcombine.low %v8461_v53, %v1443_v12  ;;  %v1494_v3 = vcombine.high %v8461_v53, %v1443_v12  ;;  %v4920_v56 = vsel %vm4605_vm7, %v4919_v28, %v4918_v51 }
 0x60a   : > { %v4316_v49 = vrot.slane %v8567_v4, %v7844_v34  ;;  %v4922_v42 = vsel %vm4608_vm8, %v4921_v23, %v4920_v56  ;;  %v4320_v7 = vrot.slane %v8567_v4, %v7847_v50  ;;  %v4324_v43 = vrot.slane %v8567_v4, %v7850_v54 }
 0x60b   : > { %v4328_v21 = vrot.slane %v8567_v4, %v7856_v38  ;;  %v1501_v15 = vrot.slane %v1493_v0, %v9205_v63  ;;  %v1508_v53 = vrot.slane %v1494_v3, %v9205_v63  ;;  %v4924_v1 = vsel %vm4611_vm9, %v4923_v16, %v4922_v42 }
 0x60c   : > { %v4497_v26 = vmul.f32 %v9206_v8, %v4300_v60  ;;  %v4926_v14 = vsel %vm4614_vm10, %v4925_v31, %v4924_v1  ;;  %v4498_v19 = vmul.f32 %v9207_v2, %v4304_v18  ;;  %v4499_v27 = vmul.f32 %v9208_v10, %v4308_v35 }
 0x60d   : > { %v4500_v36 = vmul.f32 %v9209_v52, %v4312_v17  ;;  %v1541_v22 = vcombine.low %v1485_v20, %v1501_v15  ;;  %v1542_v9 = vcombine.high %v1485_v20, %v1501_v15  ;;  %v1557_v24 = vcombine.low %v1492_v57, %v1508_v53 }
 0x60e   : > { %v1558_v4 = vcombine.high %v1492_v57, %v1508_v53  ;;  %v4928_v40 = vsel %vm4617_vm11, %v4927_v29, %v4926_v14  ;;  %v4501_v30 = vmul.f32 %v8357_v44, %v4316_v49  ;;  %v4502_v47 = vmul.f32 %v8363_v13, %v4320_v7 }
 0x60f   : > { %v4503_v59 = vmul.f32 %v9210_v6, %v4324_v43  ;;  %v8628_v33 = vpop.eup %6482  ;;  %v1549_v25 = vrot.slane %v1541_v22, %v9211_v41  ;;  %v1556_v39 = vrot.slane %v1542_v9, %v9211_v41  ;;  %v1565_v11 = vrot.slane %v1557_v24, %v9211_v41 }
 0x610   : > { %v1572_v20 = vrot.slane %v1558_v4, %v9211_v41  ;;  %v8635_v57 = vsel %vm4620_vm12, %v4929_v58, %v4928_v40  ;;  %v4504_v32 = vmul.f32 %v9212_v46, %v4328_v21  ;;  %v4561_v44 = vpack.c.bf16 %v4497_v26, %v4497_v26 }
 0x611   : > { %v4562_v55 = vpack.c.bf16 %v4498_v19, %v4498_v19  ;;  %v5953_v13 = vcombine.low %v1549_v25, %v1556_v39  ;;  %v5955_v28 = vcombine.high %v1549_v25, %v1556_v39  ;;  %v4931_v31 = vpack.c.b16 %v8635_v57, %v8635_v57 }
 0x612   : > { %v5957_v23 = vcombine.low %v1565_v11, %v1572_v20  ;;  %v5959_v16 = vcombine.high %v1565_v11, %v1572_v20  ;;  %v4563_v29 = vpack.c.bf16 %v4499_v27, %v4499_v27  ;;  %v4564_v60 = vpack.c.bf16 %v4500_v36, %v4500_v36 }
 0x613   : > { %v4565_v12 = vpack.c.bf16 %v4501_v30, %v4501_v30  ;;  %v1596_v51 = vrot.slane %v5953_v13, %v9205_v63  ;;  %v1612_v18 = vrot.slane %v5955_v28, %v9205_v63  ;;  %v4566_v17 = vpack.c.bf16 %v4502_v47, %v4502_v47 }
 0x614   : > { %v1628_v58 = vrot.slane %v5957_v23, %v9205_v63  ;;  %v1644_v35 = vrot.slane %v5959_v16, %v9205_v63  ;;  %v4567_v0 = vpack.c.bf16 %v4503_v59, %v4503_v59  ;;  %v4568_v3 = vpack.c.bf16 %v4504_v32, %v4504_v32 }
 0x615   : > { %v4986_v56 = vunpack.c.l.b16 %v4561_v44  ;;  %v1661_v49 = vcombine.low %v1596_v51, %v1612_v18  ;;  %v4987_v7 = vunpack.c.l.b16 %v4562_v55  ;;  %v4988_v43 = vunpack.c.l.b16 %v4563_v29 }
 0x616   : > { %v1693_v42 = vcombine.low %v1628_v58, %v1644_v35  ;;  %v4989_v21 = vunpack.c.l.b16 %v4564_v60  ;;  %v4990_v15 = vunpack.c.l.b16 %v4565_v12  ;;  %v4991_v53 = vunpack.c.l.b16 %v4566_v17 }
 0x617   : > { %v4992_v1 = vunpack.c.l.b16 %v4567_v0  ;;  %v1669_v8 = vrot.slane %v1661_v49, %v9211_v41  ;;  %v4993_v14 = vunpack.c.l.b16 %v4568_v3  ;;  %v4994_v2 = vrot.slane %v4987_v7, 7  ;;  %v9213_v3 = vld [vmem:[#allocation46_spill] sm:$0xff] }
 0x618   : > { %v1701_v26 = vrot.slane %v1693_v42, %v9211_v41  ;;  %v4996_v19 = vrot.slane %v4988_v43, 6  ;;  %v4998_v10 = vrot.slane %v4989_v21, 5  ;;  %v5000_v27 = vrot.slane %v4990_v15, 4  ;;  %v9214_v49 = vld [vmem:[#allocation38_spill] sm:$0xff]  ;;  %v9216_v15 = vld [vmem:[#allocation63_spill] sm:$0xff] }
 0x619   : > { %v5002_v52 = vrot.slane %v4991_v53, 3  ;;  %v4995_v9 = vsel %vm4602_vm6, %v4994_v2, %v4986_v56  ;;  %v5004_v24 = vrot.slane %v4992_v1, 2  ;;  %v5006_v40 = vrot.slane %v4993_v14, 1  ;;  %v9219_v14 = vld [vmem:[#allocation66_spill] sm:$0xff] }
 0x61a   : > { %v1713_v36 = vcombine.low %v1669_v8, %v1701_v26  ;;  %v1714_v22 = vcombine.high %v1669_v8, %v1701_v26  ;;  %v4997_v4 = vsel %vm4605_vm7, %v4996_v19, %v4995_v9  ;;  %v1662_v30 = vcombine.high %v1596_v51, %v1612_v18  ;;  %v9218_v8 = vld [vmem:[#allocation43_spill] sm:$0xff]  ;;  %v9220_v19 = vld [vmem:[#allocation44_spill] sm:$0xff] }
 0x61b   : > { %v1694_v47 = vcombine.high %v1628_v58, %v1644_v35  ;;  %v4999_v25 = vsel %vm4608_vm8, %v4998_v10, %v4997_v4  ;;  %v4332_v39 = vrot.slane %v8593_v5, %v7832_v62  ;;  %v4336_v46 = vrot.slane %v8593_v5, %v7835_v48 }
 0x61c   : > { %v1721_v6 = vpack.c.bf16 %v1713_v36, %v1713_v36  ;;  %v1722_v59 = vpack.c.bf16 %v1714_v22, %v1714_v22  ;;  %v5001_v11 = vsel %vm4611_vm9, %v5000_v27, %v4999_v25  ;;  %v1676_v20 = vrot.slane %v1662_v30, %v9211_v41 }
 0x61d   : > { %v1708_v57 = vrot.slane %v1694_v47, %v9211_v41  ;;  %v5003_v55 = vsel %vm4614_vm10, %v5002_v52, %v5001_v11  ;;  %v4340_v13 = vrot.slane %v8593_v5, %v7838_v61  ;;  %v4344_v60 = vrot.slane %v8593_v5, %v7841_v45 }
 0x61e   : > { %v4936_v32 = vsel %vm4626_vm5, %v1721_v6, 0  ;;  %v5013_v44 = vsel %vm4626_vm5, %v1722_v59, 0  ;;  %v5005_v28 = vsel %vm4617_vm11, %v5004_v24, %v5003_v55  ;;  %v4348_v12 = vrot.slane %v8593_v5, %v7844_v34 }
 0x61f   : > { %6152 = vmatpush3.bf16.msra.mxu1 %v4936_v32  ;;  %6158 = vmatpush3.bf16.msra.mxu0 %v5013_v44  ;;  %v1715_v23 = vcombine.low %v1676_v20, %v1708_v57  ;;  %v1716_v16 = vcombine.high %v1676_v20, %v1708_v57  ;;  %v5007_v29 = vsel %vm4620_vm12, %v5006_v40, %v5005_v28 }
 0x620   : > { %6163 = vmatprep.subr.bf16.mxu1 %v9155_v37  ;;  %6169 = vmatprep.subr.bf16.mxu0 %v9155_v37  ;;  %v5008_v51 = vpack.c.b16 %v5007_v29, %v5007_v29  ;;  %v4352_v35 = vrot.slane %v8593_v5, %v7847_v50  ;;  %v4356_v17 = vrot.slane %v8593_v5, %v7850_v54 }
 0x621   : > { %v1723_v18 = vpack.c.bf16 %v1715_v23, %v1715_v23  ;;  %v1724_v58 = vpack.c.bf16 %v1716_v16, %v1716_v16  ;;  %v4360_v0 = vrot.slane %v8593_v5, %v7856_v38  ;;  %v4505_v56 = vmul.f32 %v9213_v3, %v4332_v39  ;;  %v9217_v5 = vld [vmem:[#allocation64_spill] sm:$0xff]  ;;  %v9222_v3 = vld [vmem:[#allocation59_spill] sm:$0xff] }
 0x622   : > { %6154 = vmatmul.mubr.msk.bf16.vlgmr.msra.gmra.mrb[28].mxu1 %vm3088_vm4, %v4931_v31  ;;  %v4506_v42 = vmul.f32 %v9214_v49, %v4336_v46  ;;  %6160 = vmatmul.mubr.msk.bf16.vlgmr.msra.gmra.mrb[32].mxu0 %vm3088_vm4, %v5008_v51  ;;  %v9215_v31 = vld [vmem:[#allocation62_spill] sm:$0xff]  ;;  %v4508_v53 = vmul.f32 %v9216_v15, %v4344_v60  ;;  %v4509_v1 = vmul.f32 %v9217_v5, %v4348_v12 }
 0x623   : > { %v5090_v7 = vsel %vm4626_vm5, %v1723_v18, 0  ;;  %v5167_v43 = vsel %vm4626_vm5, %v1724_v58, 0  ;;  %6165 = vmatprep.mubr.msk.bf16.mxu1 %vm6744_vm1, %v9155_v37  ;;  %v4507_v21 = vmul.f32 %v9215_v31, %v4340_v13  ;;  %v4510_v26 = vmul.f32 %v9218_v8, %v4352_v35  ;;  %6171 = vmatprep.mubr.msk.bf16.mxu0 %vm6744_vm1, %v9155_v37  ;;  %v9226_v31 = vld [vmem:[#allocation54_spill] sm:$0xff] }
 0x624   : > { %6164 = vmatpush3.bf16.msra.mxu1 %v5090_v7  ;;  %6170 = vmatpush3.bf16.msra.mxu0 %v5167_v43  ;;  %v4511_v2 = vmul.f32 %v9219_v14, %v4356_v17  ;;  %v4512_v10 = vmul.f32 %v9220_v19, %v4360_v0  ;;  %v4569_v27 = vpack.c.bf16 %v4505_v56, %v4505_v56  ;;  %v9223_v56 = vld [vmem:[#allocation53_spill] sm:$0xff]  ;;  %vm5519_vm5 = vcmask 228352  }
 0x625   : > { %v4570_v52 = vpack.c.bf16 %v4506_v42, %v4506_v42  ;;  %v4571_v36 = vpack.c.bf16 %v4507_v21, %v4507_v21  ;;  %v4572_v22 = vpack.c.bf16 %v4508_v53, %v4508_v53  ;;  %v4573_v9 = vpack.c.bf16 %v4509_v1, %v4509_v1  ;;  %6175 = vmatprep.subr.bf16.mxu1 %v9155_v37  ;;  %v9225_v7 = vld [vmem:[#allocation57_spill] sm:$0xff] }
 0x626   : > { %v4574_v24 = vpack.c.bf16 %v4510_v26, %v4510_v26  ;;  %v4575_v4 = vpack.c.bf16 %v4511_v2, %v4511_v2  ;;  %v4576_v40 = vpack.c.bf16 %v4512_v10, %v4512_v10  ;;  %v5063_v30 = vunpack.c.l.b16 %v4569_v27  ;;  %6183 = vmatprep.subr.bf16.mxu0 %v9155_v37 }
 0x627   : > { %v5064_v47 = vunpack.c.l.b16 %v4570_v52  ;;  %v5065_v6 = vunpack.c.l.b16 %v4571_v36  ;;  %v5066_v59 = vunpack.c.l.b16 %v4572_v22  ;;  %v5067_v25 = vunpack.c.l.b16 %v4573_v9 }
 0x628   : > { %v5068_v39 = vunpack.c.l.b16 %v4574_v24  ;;  %v5069_v11 = vunpack.c.l.b16 %v4575_v4  ;;  %v5070_v20 = vunpack.c.l.b16 %v4576_v40  ;;  %v4364_v32 = vrot.slane %v8628_v33, %v7832_v62 }
 0x629   : > { %v5071_v57 = vrot.slane %v5064_v47, 7  ;;  %v5073_v46 = vrot.slane %v5065_v6, 6  ;;  %v5075_v44 = vrot.slane %v5066_v59, 5  ;;  %v5077_v55 = vrot.slane %v5067_v25, 4 }
 0x62a   : > { %v5079_v13 = vrot.slane %v5068_v39, 3  ;;  %v5081_v28 = vrot.slane %v5069_v11, 2  ;;  %v5083_v16 = vrot.slane %v5070_v20, 1  ;;  %v4368_v29 = vrot.slane %v8628_v33, %v7835_v48 }
 0x62b   : > { %v5072_v23 = vsel %vm4602_vm6, %v5071_v57, %v5063_v30  ;;  %v4372_v60 = vrot.slane %v8628_v33, %v7838_v61  ;;  %v4376_v51 = vrot.slane %v8628_v33, %v7841_v45  ;;  %v4380_v62 = vrot.slane %v8628_v33, %v7844_v34  ;;  %v9221_v61 = vld [vmem:[#allocation45_spill] sm:$0xff]  ;;  %v9224_v34 = vld [vmem:[#allocation55_spill] sm:$0xff] }
 0x62c   : > { %v5074_v12 = vsel %vm4605_vm7, %v5073_v46, %v5072_v23  ;;  %v4384_v18 = vrot.slane %v8628_v33, %v7847_v50  ;;  %v4388_v35 = vrot.slane %v8628_v33, %v7850_v54  ;;  %v4392_v48 = vrot.slane %v8628_v33, %v7856_v38  ;;  %v9227_v54 = vld [vmem:[#allocation56_spill] sm:$0xff]  ;;  %v9228_v33 = vld [vmem:[#allocation58_spill] sm:$0xff] }
 0x62d   : > { %v5076_v58 = vsel %vm4608_vm8, %v5075_v44, %v5074_v12  ;;  %v4513_v17 = vmul.f32 %v9221_v61, %v4364_v32  ;;  %v4514_v45 = vmul.f32 %v9222_v3, %v4368_v29  ;;  %v4515_v49 = vmul.f32 %v9223_v56, %v4372_v60 }
 0x62e   : > { %v5078_v0 = vsel %vm4611_vm9, %v5077_v55, %v5076_v58  ;;  %v4516_v42 = vmul.f32 %v9224_v34, %v4376_v51  ;;  %v4517_v43 = vmul.f32 %v9225_v7, %v4380_v62  ;;  %v4518_v21 = vmul.f32 %v9226_v31, %v4384_v18 }
 0x62f   : > { %v5080_v50 = vsel %vm4614_vm10, %v5079_v13, %v5078_v0  ;;  %v4519_v15 = vmul.f32 %v9227_v54, %v4388_v35  ;;  %v4520_v53 = vmul.f32 %v9228_v33, %v4392_v48  ;;  %v4577_v5 = vpack.c.bf16 %v4513_v17, %v4513_v17 }
 0x630   : > { %v5082_v38 = vsel %vm4617_vm11, %v5081_v28, %v5080_v50  ;;  %v4578_v1 = vpack.c.bf16 %v4514_v45, %v4514_v45  ;;  %v4579_v26 = vpack.c.bf16 %v4515_v49, %v4515_v49  ;;  %v4580_v14 = vpack.c.bf16 %v4516_v42, %v4516_v42 }
 0x631   : > { %v5084_v8 = vsel %vm4620_vm12, %v5083_v16, %v5082_v38  ;;  %v4581_v2 = vpack.c.bf16 %v4517_v43, %v4517_v43  ;;  %v4582_v10 = vpack.c.bf16 %v4518_v21, %v4518_v21  ;;  %v4583_v27 = vpack.c.bf16 %v4519_v15, %v4519_v15 }
 0x632   : > { %v5085_v19 = vpack.c.b16 %v5084_v8, %v5084_v8  ;;  %v4584_v52 = vpack.c.bf16 %v4520_v53, %v4520_v53  ;;  %v5141_v36 = vunpack.c.l.b16 %v4578_v1  ;;  %v5142_v22 = vunpack.c.l.b16 %v4579_v26 }
 0x633   : > { %v5143_v9 = vunpack.c.l.b16 %v4580_v14  ;;  %v5144_v24 = vunpack.c.l.b16 %v4581_v2  ;;  %v5140_v4 = vunpack.c.l.b16 %v4577_v5  ;;  %v5145_v40 = vunpack.c.l.b16 %v4582_v10 }
 0x634   : > { %6166 = vmatmul.mubr.msk.bf16.vlgmr.msra.gmra.mrb[32].mxu1 %vm3088_vm4, %v5085_v19  ;;  %v5148_v30 = vrot.slane %v5141_v36, 7  ;;  %v5150_v47 = vrot.slane %v5142_v22, 6  ;;  %v5146_v6 = vunpack.c.l.b16 %v4583_v27  ;;  %v5147_v59 = vunpack.c.l.b16 %v4584_v52 }
 0x635   : > { %6179 = vmatprep.mubr.msk.bf16.mxu1 %vm6744_vm1, %v9155_v37  ;;  %v5152_v39 = vrot.slane %v5143_v9, 5  ;;  %v5154_v20 = vrot.slane %v5144_v24, 4  ;;  %v5156_v46 = vrot.slane %v5145_v40, 3 }
 0x636   : > { %v5149_v25 = vsel %vm4602_vm6, %v5148_v30, %v5140_v4  ;;  %v5158_v44 = vrot.slane %v5146_v6, 2  ;;  %v5160_v13 = vrot.slane %v5147_v59, 1 }
 0x637   : > { %v5151_v11 = vsel %vm4605_vm7, %v5150_v47, %v5149_v25 }
 0x638   : > { %v5153_v57 = vsel %vm4608_vm8, %v5152_v39, %v5151_v11 }
 0x639   : > { %v5155_v32 = vsel %vm4611_vm9, %v5154_v20, %v5153_v57 }
 0x63a   : > { %v5157_v55 = vsel %vm4614_vm10, %v5156_v46, %v5155_v32 }
 0x63b   : > { %v5159_v28 = vsel %vm4617_vm11, %v5158_v44, %v5157_v55 }
 0x63c   : > { %v5161_v23 = vsel %vm4620_vm12, %v5160_v13, %v5159_v28 }
 0x63d   : > { %v5162_v16 = vpack.c.b16 %v5161_v23, %v5161_v23 }
 0x63f   : > { %6172 = vmatmul.mubr.msk.bf16.vlgmr.msra.gmra.mrb[36].mxu0 %vm3088_vm4, %v5162_v16 }
 0x640   : > { %6187 = vmatprep.mubr.msk.bf16.mxu0 %vm6744_vm1, %v9155_v37 }
 0x6ad   : > { %v4664_v29 = vpop.f32.mrb[20].mxu1 }
 0x6ae   : > { %v6131_v60 = vpop.f32.mrb[21].mxu1 }
 0x6af   : > { %v4667_v12 = vpop.f32.mrb[22].mxu1 }
 0x6b0   : > { %v6132_v51 = vpop.f32.mrb[23].mxu1 }
 0x6be   : > { %v4741_v62 = vpop.f32.mrb[24].mxu0 }
 0x6bf   : > { %v6137_v18 = vpop.f32.mrb[25].mxu0 }
 0x6c0   : > { %v4744_v58 = vpop.f32.mrb[26].mxu0 }
 0x6c1   : > { %v6138_v35 = vpop.f32.mrb[27].mxu0 }
 0x6cb   : > { %v4818_v48 = vpop.f32.mrb[24].mxu1 }
 0x6cc   : > { %v5209_v61 = vcombine.low %v4664_v29, %v4818_v48  ;;  %v5210_v17 = vcombine.high %v4664_v29, %v4818_v48  ;;  %v6143_v0 = vpop.f32.mrb[25].mxu1 }
 0x6cd   : > { %v4821_v3 = vpop.f32.mrb[26].mxu1 }
 0x6ce   : > { %v6144_v45 = vpop.f32.mrb[27].mxu1  ;;  %v5217_v49 = vrot.slane %v5209_v61, %v9205_v63  ;;  %v5224_v34 = vrot.slane %v5210_v17, %v9205_v63 }
 0x6d7   : > { %v4895_v56 = vpop.f32.mrb[28].mxu0 }
 0x6d8   : > { %v5225_v42 = vcombine.low %v4741_v62, %v4895_v56  ;;  %v5226_v50 = vcombine.high %v4741_v62, %v4895_v56  ;;  %v6149_v7 = vpop.f32.mrb[29].mxu0 }
 0x6d9   : > { %v4898_v43 = vpop.f32.mrb[30].mxu0  ;;  %v6330_v7 = vld [vmem:[#allocation8] sm:$0xff]  }
 0x6da   : > { %v5233_v31 = vrot.slane %v5225_v42, %v9205_v63  ;;  %v5240_v21 = vrot.slane %v5226_v50, %v9205_v63  ;;  %v6150_v54 = vpop.f32.mrb[31].mxu0  ;;  %6176 = vmatpush3.bf16.msra.mxu1 %v6330_v7  ;;  %v5988_v7 = vld [vmem:[#allocation11] ss:$0 sm:$0xff] }
 0x6db   : > { %6177 = vmatprep.subr.bf16.mxu1 %v9155_v37 }
 0x6dc   : > { %v5273_v15 = vcombine.low %v5217_v49, %v5233_v31  ;;  %v5274_v38 = vcombine.high %v5217_v49, %v5233_v31  ;;  %v5289_v33 = vcombine.low %v5224_v34, %v5240_v21  ;;  %v5290_v53 = vcombine.high %v5224_v34, %v5240_v21 }
 0x6de   : > { %v5281_v5 = vrot.slane %v5273_v15, %v9211_v41  ;;  %v5288_v1 = vrot.slane %v5274_v38, %v9211_v41  ;;  %v5297_v8 = vrot.slane %v5289_v33, %v9211_v41  ;;  %v5304_v26 = vrot.slane %v5290_v53, %v9211_v41 }
 0x6e0   : > { %v5976_v14 = vcombine.low %v5281_v5, %v5288_v1  ;;  %v5978_v2 = vcombine.high %v5281_v5, %v5288_v1  ;;  %v5980_v19 = vcombine.low %v5297_v8, %v5304_v26  ;;  %v5982_v10 = vcombine.high %v5297_v8, %v5304_v26 }
 0x6e2   : > { %v5353_v27 = vrot.slane %v5976_v14, %v9205_v63  ;;  %v5369_v52 = vrot.slane %v5978_v2, %v9205_v63  ;;  %v5385_v36 = vrot.slane %v5980_v19, %v9205_v63  ;;  %v5401_v22 = vrot.slane %v5982_v10, %v9205_v63  ;;  %v6331_v14 = vld [vmem:[#allocation8 + $0x8] sm:$0xff]  }
 0x6e3   : > { %6178 = vmatpush3.bf16.msra.mxu1 %v6331_v14 }
 0x6e4   : > { %v5410_v9 = vcombine.high %v5353_v27, %v5369_v52  ;;  %v5442_v24 = vcombine.high %v5385_v36, %v5401_v22  ;;  %v5409_v4 = vcombine.low %v5353_v27, %v5369_v52  ;;  %v5441_v40 = vcombine.low %v5385_v36, %v5401_v22  ;;  %6191 = vmatprep.subr.bf16.mxu1 %v9155_v37 }
 0x6e6   : > { %v5424_v30 = vrot.slane %v5410_v9, %v9211_v41  ;;  %v5456_v47 = vrot.slane %v5442_v24, %v9211_v41  ;;  %v8752_v6 = vrot.slane %v5409_v4, %v9211_v41  ;;  %v8755_v59 = vrot.slane %v5441_v40, %v9211_v41 }
 0x6e8   : > { %v5475_v25 = vcombine.low %v5424_v30, %v5456_v47  ;;  %v5474_v39 = vcombine.high %v8752_v6, %v8755_v59  ;;  %v5476_v11 = vcombine.high %v5424_v30, %v5456_v47  ;;  %v5473_v20 = vcombine.low %v8752_v6, %v8755_v59 }
 0x6ea   : > { %5486 = vrot.lane.b32.xlu1 %v5475_v25, %s6755_s21  ;;  %5482 = vrot.lane.b32.xlu0 %v5474_v39, %s6756_s27  ;;  %s6762_s27 = smov [#allocation13]  }
 0x6ee   : > { %5490 = vrot.lane.b32.xlu0 %v5476_v11, %s6757_s24  ;;  %s6659_s24 = sshll.u32 %s6762_s27, 4  ;;  %s6660_s24 = int_to_ptr.vmem [resolvable:$false] %s6659_s24 }
 0x6f5   : > { %v4972_v57 = vpop.f32.mrb[28].mxu1  ;;  %v5049_v46 = vpop.f32.mrb[32].mxu0 }
 0x6f6   : > { %v6155_v32 = vpop.f32.mrb[29].mxu1  ;;  %v6161_v44 = vpop.f32.mrb[33].mxu0 }
 0x6f7   : > { %v4975_v55 = vpop.f32.mrb[30].mxu1  ;;  %v5052_v13 = vpop.f32.mrb[34].mxu0 }
 0x6f8   : > { %v6156_v28 = vpop.f32.mrb[31].mxu1  ;;  %v6162_v23 = vpop.f32.mrb[35].mxu0 }
 0x6f9   : > { %v6486_v23 = vld [vmem:[%s7065_s25] sm:$0xff]  ;;  %s6000_s25 = sshll.u32 %s6869_s14, 7 }
 0x6fa   : > { %s8824_s30 = scalar_lea.hbm %s9229_s15, %s6000_s25 }
 0x707   : > { %v5126_v16 = vpop.f32.mrb[32].mxu1 }
 0x708   : > { %v5241_v29 = vcombine.low %v4972_v57, %v5126_v16  ;;  %v5242_v60 = vcombine.high %v4972_v57, %v5126_v16  ;;  %v6167_v12 = vpop.f32.mrb[33].mxu1 }
 0x709   : > { %v5129_v51 = vpop.f32.mrb[34].mxu1 }
 0x70a   : > { %v6168_v62 = vpop.f32.mrb[35].mxu1  ;;  %v5249_v58 = vrot.slane %v5241_v29, %v9205_v63  ;;  %v5256_v35 = vrot.slane %v5242_v60, %v9205_v63 }
 0x712   : > { %v5203_v18 = vpop.f32.mrb[36].mxu0 }
 0x713   : > { %v5257_v48 = vcombine.low %v5049_v46, %v5203_v18  ;;  %v5258_v61 = vcombine.high %v5049_v46, %v5203_v18  ;;  %v6173_v17 = vpop.f32.mrb[37].mxu0 }
 0x714   : > { %v5206_v0 = vpop.f32.mrb[38].mxu0  ;;  %v6333_v17 = vld [vmem:[%s8877_s10 + $0x8] sm:$0xff]  }
 0x715   : > { %v5265_v3 = vrot.slane %v5257_v48, %v9205_v63  ;;  %v5272_v45 = vrot.slane %v5258_v61, %v9205_v63  ;;  %v6174_v56 = vpop.f32.mrb[39].mxu0  ;;  %v6332_v61 = vld [vmem:[%s8877_s10] sm:$0xff]  }
 0x716   : > { %6184 = vmatpush3.bf16.msra.mxu0 %v6332_v61  ;;  %v6334_v0 = vld [vmem:[%s8879_s12] sm:$0xff]  }
 0x717   : > { %v5305_v49 = vcombine.low %v5249_v58, %v5265_v3  ;;  %v5306_v34 = vcombine.high %v5249_v58, %v5265_v3  ;;  %v5321_v42 = vcombine.low %v5256_v35, %v5272_v45  ;;  %v5322_v50 = vcombine.high %v5256_v35, %v5272_v45  ;;  %6185 = vmatprep.subr.bf16.mxu0 %v9155_v37  ;;  %v6335_v3 = vld [vmem:[%s8879_s12 + $0x8] sm:$0xff]  }
 0x719   : > { %v5313_v43 = vrot.slane %v5305_v49, %v9211_v41  ;;  %v5320_v31 = vrot.slane %v5306_v34, %v9211_v41  ;;  %v5329_v21 = vrot.slane %v5321_v42, %v9211_v41  ;;  %v5336_v54 = vrot.slane %v5322_v50, %v9211_v41  ;;  %v5987_v42 = vld [vmem:[#allocation10] ss:$0 sm:$0xff] }
 0x71a   : > { %6186 = vmatpush3.bf16.msra.mxu0 %v6333_v17 }
 0x71b   : > { %v5977_v15 = vcombine.low %v5313_v43, %v5320_v31  ;;  %v5979_v38 = vcombine.high %v5313_v43, %v5320_v31  ;;  %v5981_v33 = vcombine.low %v5329_v21, %v5336_v54  ;;  %v5983_v53 = vcombine.high %v5329_v21, %v5336_v54  ;;  %v6336_v54 = vld [vmem:[%s8879_s12 + $0x10] sm:$0xff]  }
 0x71d   : > { %v5360_v5 = vrot.slane %v5977_v15, %v9205_v63  ;;  %v5376_v1 = vrot.slane %v5979_v38, %v9205_v63  ;;  %v5392_v8 = vrot.slane %v5981_v33, %v9205_v63  ;;  %v5408_v26 = vrot.slane %v5983_v53, %v9205_v63  ;;  %v6337_v15 = vld [vmem:[%s8879_s12 + $0x18] sm:$0xff]   ;;  %v5989_v38 = vld [vmem:[%s8878_s11] ss:$0 sm:$0xff] }
 0x71f   : > { %v5425_v2 = vcombine.low %v5360_v5, %v5376_v1  ;;  %v5457_v19 = vcombine.low %v5392_v8, %v5408_v26  ;;  %v5426_v10 = vcombine.high %v5360_v5, %v5376_v1  ;;  %v5458_v27 = vcombine.high %v5392_v8, %v5408_v26 }
 0x721   : > { %v5433_v52 = vrot.slane %v5425_v2, %v9211_v41  ;;  %v5465_v36 = vrot.slane %v5457_v19, %v9211_v41  ;;  %v5440_v22 = vrot.slane %v5426_v10, %v9211_v41  ;;  %v5472_v9 = vrot.slane %v5458_v27, %v9211_v41 }
 0x723   : > { %v5478_v24 = vcombine.high %v5433_v52, %v5465_v36  ;;  %v5477_v4 = vcombine.low %v5433_v52, %v5465_v36  ;;  %v5480_v40 = vcombine.high %v5440_v22, %v5472_v9  ;;  %v5479_v63 = vcombine.low %v5440_v22, %v5472_v9 }
 0x725   : > { %5498 = vrot.lane.b32.xlu0 %v5478_v24, %s6758_s23  ;;  %5494 = vrot.lane.b32.xlu1 %v5477_v4, %s6759_s20  ;;  %s6661_s23 = scalar_lea.vmem %s6660_s24, 256 }
 0x729   : > { %5506 = vrot.lane.b32.xlu0 %v5480_v40, %s6760_s17  ;;  %5502 = vrot.lane.b32.xlu1 %v5479_v63, %s6761_s3  ;;  %s601_s17 = sand.u32 1, %s6725_s22  }
 0x72a   : > { %s5923_s3 = sshll.u32 %s601_s17, 3  ;;  %s5766_s14 = scalar_lea.sflag [#allocation4], %s601_s17 }
 0x72b   : > { %s603_s16 = scalar_lea.vmem [#allocation13], %s5923_s3 }
 0x72c   : > { %s5779_s26 = sshll.u32 %s603_s16, 4  ;;  %s8826_s26 = int_to_ptr.vmem [resolvable:$true] %s5779_s26 }
 0x72d   : > { %s6655_s21 = scalar_lea.vmem %s8826_s26, 128  ;;  %p6662_p13 = scmp.lt.s32.totalorder %s8826_s26, %s6660_s24 }
 0x72e   : > { %p6656_p4 = scmp.ne.s32.totalorder %s8826_s26, %s6655_s21  ;;  %p6663_p1 = scmp.lt.s32.totalorder %s6661_s23, %s6655_s21 }
 0x730   : > { %p6657_p8 = pnand %p6656_p4, %p9230_p7  ;;  %p6664_p0 = por %p6663_p1, %p6662_p13 }
 0x732   : > { %p6658_p11 = pneg %p6657_p8 }
 0x734   : > { %p6665_p6 = pnand %p6664_p0, %p6658_p11 }
 0x75c   : > { %v5483_v30 = vpop.permute.xlu0 %5482  ;;  %v5487_v47 = vpop.permute.xlu1 %5486 }
 0x75d   : > { %v5509_v41 = vsel %vm1725_vm2, %v5473_v20, %v5483_v30 }
 0x75e   : > { %v5510_v39 = vsel %vm3088_vm4, %v5509_v41, %v5487_v47 }
 0x760   : > { %v5491_v25 = vpop.permute.xlu0 %5490 }
 0x761   : > { %v5512_v11 = vsel %vm5511_vm13, %v5510_v39, %v5491_v25 }
 0x797   : > { %v5499_v57 = vpop.permute.xlu0 %5498  ;;  %v5495_v46 = vpop.permute.xlu1 %5494 }
 0x798   : > { %v5514_v32 = vsel %vm5513_vm14, %v5512_v11, %v5495_v46 }
 0x799   : > { %v5516_v55 = vsel %vm5515_vm15, %v5514_v32, %v5499_v57 }
 0x79b   : > { %v5507_v44 = vpop.permute.xlu0 %5506  ;;  %v5503_v13 = vpop.permute.xlu1 %5502 }
 0x79c   : > { %v5518_v28 = vsel %vm5517_vm3, %v5516_v55, %v5503_v13 }
 0x79d   : > { %v5520_v6 = vsel %vm5519_vm5, %v5518_v28, %v5507_v44 }
 0x79e   : > { %v5521_v59 = vpack.c.bf16 %v5520_v6, %v5520_v6 }
 0x7a0   : > { %6180 = vmatmul.mubr.msk.bf16.vlgmr.msra.gmra.mrb[36].mxu1 %vm617_vm0, %v5521_v59 }
 0x7a1   : > { %6199 = vmatprep.mubr.msk.bf16.mxu1 %vm6744_vm1, %v9155_v37  ;;  %6192 = vmatpush3.bf16.msra.mxu1 %v6334_v0  ;;  %vm5719_vm1 = vcmask 523264  }
 0x7a2   : > { %6193 = vmatprep.subr.bf16.mxu1 %v9155_v37 }
 0x7a5   : > { %6194 = vmatpush3.bf16.msra.mxu1 %v6335_v3 }
 0x7a6   : > { %6195 = vmatprep.subr.bf16.mxu1 %v9155_v37 }
 0x7a9   : > { %6196 = vmatpush3.bf16.msra.mxu1 %v6336_v54 }
 0x7aa   : > { %6197 = vmatprep.subr.bf16.mxu1 %v9155_v37  ;;  %v5993_v37 = vld [vmem:[%s8880_s13] ss:$0 sm:$0xff] }
 0x7ad   : > { %6198 = vmatpush3.bf16.msra.mxu1 %v6337_v15 }
 0x873   : > { %v5575_v20 = vpop.f32.mrb[36].mxu1 }
 0x874   : > { %v5581_v16 = vadd.f32 %v6486_v23, %v5575_v20  ;;  %v6181_v29 = vpop.f32.mrb[37].mxu1 }
 0x875   : > { %v5578_v60 = vpop.f32.mrb[38].mxu1 }
 0x876   : > { %v6182_v12 = vpop.f32.mrb[39].mxu1  ;;  %v5584_v51 = vsel %vm617_vm0, %v5581_v16, 0.0 }
 0x877   : > { %5585 = vadd.xlane.f32.xlu1 %v5584_v51 }
 0x904   : > { %v5586_v62 = vpop.xlane.xlu1 %5585 }
 0x905   : > { %v5587_v18 = vmul.f32 0.03125, %v5586_v62 }
 0x907   : > { %v5588_v58 = vsub.f32 %v5581_v16, %v5587_v18 }
 0x909   : > { %v5589_v35 = vmul.f32 %v5588_v58, %v5588_v58 }
 0x90b   : > { %v5590_v48 = vsel %vm617_vm0, %v5589_v35, 0.0 }
 0x90c   : > { %5591 = vadd.xlane.f32.xlu0 %v5590_v48 }
 0x999   : > { %v5592_v45 = vpop.xlane.xlu0 %5591 }
 0x99a   : > { %v5593_v56 = vmul.f32 0.03125, %v5592_v45 }
 0x99c   : > { %v5594_v49 = vadd.f32 1e-06, %v5593_v56 }
 0x99e   : > { %6484 = vrsqrt.f32 %v5594_v49 }
 0x9a8   : > { %v6485_v34 = vpop.eup %6484 }
 0x9a9   : > { %v5596_v50 = vmul.f32 %v6485_v34, %v5588_v58 }
 0x9ab   : > { %v5603_v43 = vmul.f32 %v5987_v42, %v5596_v50 }
 0x9ad   : > { %v5610_v31 = vadd.f32 %v5988_v7, %v5603_v43 }
 0x9af   : > { %v5611_v21 = vpack.c.bf16 %v5610_v31, %v5610_v31 }
 0x9b1   : > { %6188 = vmatmul.mubr.msk.bf16.vlgmr.msra.gmra.mrb[40].mxu0 %vm617_vm0, %v5611_v21 }
 0xa84   : > { %v5672_v33 = vpop.f32.mrb[40].mxu0 }
 0xa85   : > { %v5673_v53 = vadd.f32 %v5989_v38, %v5672_v33  ;;  %v6189_v5 = vpop.f32.mrb[41].mxu0 }
 0xa86   : > { %v5675_v1 = vpop.f32.mrb[42].mxu0 }
 0xa87   : > { %v5678_v8 = vmax.f32 %v5673_v53, 0.0  ;;  %v6190_v26 = vpop.f32.mrb[43].mxu0 }
 0xa89   : > { %v5679_v14 = vpack.c.bf16 %v5678_v8, %v5678_v8 }
 0xa8b   : > { %6200 = vmatmul.mubr.msk.bf16.vlgmr.msra.gmra.mrb[40].mxu1 %vm5719_vm1, %v5679_v14 }
 0xb5e   : > { %v5757_v2 = vpop.f32.mrb[40].mxu1 }
 0xb5f   : > { %v5758_v19 = vadd.f32 %v5993_v37, %v5757_v2  ;;  %v6201_v10 = vpop.f32.mrb[41].mxu1 }
 0xb60   : > { %v5760_v27 = vpop.f32.mrb[42].mxu1 }
 0xb61   : > { %v5763_v52 = vadd.f32 %v5758_v19, %v5581_v16  ;;  %v6202_v36 = vpop.f32.mrb[43].mxu1 }
 0xb63   : > { %5764 = vst.msk [vmem:[%s603_s16] sm:$0xff] %vm617_vm0, %v5763_v52 }
 0xb64   : > { %6668 = shalt.err (!%p6665_p6)
}
 0xb65   : > { %s6669_s20 = scalar_lea.hbm %s8824_s30, 128  ;;  %s6673_s0 = scalar_lea.hbm %s9229_s15, 256 }
 0xb66   : > { %p6670_p5 = scmp.ne.s32.totalorder %s8824_s30, %s6669_s20  ;;  %p6674_p10 = scmp.lt.u32.totalorder %s8824_s30, %s9229_s15 }
 0xb67   : > { %p6675_p2 = scmp.lt.u32.totalorder %s6673_s0, %s6669_s20  ;;  %p6677_p4 = scmp.lt.u32.totalorder %s6669_s20, %s8824_s30 }
 0xb68   : > { %p6671_p9 = pnand %p6670_p5, %p9230_p7 }
 0xb69   : > { %p6676_p3 = por %p6675_p2, %p6674_p10 }
 0xb6a   : > { %p6672_p12 = pneg %p6671_p9 }
 0xb6b   : > { %p6678_p8 = por %p6677_p4, %p6676_p3 }
 0xb6d   : > { %p6679_p11 = pnand %p6678_p8, %p6672_p12 }
 0xb6f   : > { %6682 = shalt.err (!%p6679_p11)
}
 0xb70   : > { %6227 = dma.vmem_to_hbm [thread:$0]  (%p9230_p7), %s8826_s26, 128, %s8824_s30, %s5766_s14  }
 0xb71 PF: > { %s9231_s16 = sld [smem:[#allocation21_spill]]  ;;  %s9232_s18 = sld [smem:[#allocation19_spill]] }
 0xb72   : > { %s9233_s28 = sld [smem:[#allocation24_spill]] }
 0xb77   : > { %p6264_p13 = scmp.ge.s32.totalorder %s9231_s16, 2  ;;  %s5791_s21 = sand.u32 1, %s9232_s18  }
 0xb78   : > { %p9234_p1 = scmp.ne.s32.totalorder %s9233_s28, 0  ;;  %s5792_s27 = scalar_lea.sflag [#allocation4], %s5791_s21 }
 0xb7a   : > { %p6249_p0 = pnand %p6264_p13, %p9234_p1 }
 0xb7c   : > { %6716 = dma.done.wait (!%p6249_p0), %s5792_s27, 128  }
 0xb7d   : > { %6718 = vsyncadd (!%p6249_p0), %s5792_s27, 4294967168  ;;  %s9235_s24 = sld [smem:[#allocation22_spill]]  ;;  %s9236_s23 = sld [smem:[#allocation20_spill]] }
 0xb7e   : > { %s9237_s20 = sld [smem:[#allocation23_spill]]  ;;  %s9238_s21 = smov %s6725_s22 }
 0xb83   : > { %p30_p6 = scmp.ge.s32.totalorder %s9235_s24, 4   ;;  %s9239_s22 = smov %s9236_s23 }
 0xb84   : > { %s9240_s23 = smov %s9237_s20 }
 0xb85   :  { %32 = sbr.rel (!%p30_p6) target bundleno = 11 (0xb), region = 147 }
 0xb8c   :  { %5797 = vsyncpa [#allocation3], 1 }
 0xb8d   :  { %5799 = vsyncpa [#allocation3 + $0x1], 1 }
 0xb8e   :  { %5800 = vsyncpa [#allocation6], 1 }
 0xb8f   :  { %5801 = vsyncpa [#allocation9], 1 }
 0xb90   :  { %5802 = vsyncpa [#allocation12], 1 }
 0xb91   :  { %5803 = vsyncpa [#allocation4], 1 }
 0xb92   :  { %5805 = vsyncpa [#allocation4 + $0x1], 1 }

</bundles_post_ra>
